<compile_context>
chip_gen: v7x
topology: tpu7x:2x2x1
jax: 0.10.0
libtpu: 0.0.40
codegen_flags: <defaults>
</compile_context>

<pallas_src>
import jax
import jax.numpy as jnp
from jax.experimental import pallas as pl
from jax.experimental.pallas import tpu as pltpu


def _round_up(n, m):
    return ((n + m - 1) // m) * m


# -----------------------------------------------------------------------------
# Pallas kernel: fused 3x3 conv (stride 1, pad 1) + bias + PReLU
# -----------------------------------------------------------------------------
def _conv3x3_prelu_kernel(x_ref, w_ref, b_ref, a_ref, o_ref, xp_ref):
    """x_ref: (1, H, W, Cin) bf16   w_ref: (3, 3, Cin, Cout) bf16
       b_ref/a_ref: (1, Cout) f32   o_ref: (1, H, W, Cout)
       xp_ref: (H+2, W+2, Cin) f32 VMEM scratch (zero-padded tile)."""
    _, H, W, Cout = o_ref.shape
    Cin = x_ref.shape[3]
    Wp = W + 2

    # Zero-pad inside VMEM -> removes the per-layer jnp.pad HBM round trip.
    xp_ref[...] = jnp.zeros_like(xp_ref)
    xp_ref[pl.ds(1, H), pl.ds(1, W), :] = x_ref[0, :, :, :].astype(jnp.float32)

    # One f32 accumulator per horizontal tap.  Every matmul LHS is a
    # *contiguous* row band of the padded tile (no per-tap strided copies);
    # bf16 operands, f32 accumulation on the MXU.
    accs = [jnp.zeros((H * Wp, Cout), jnp.float32) for _ in range(3)]
    for dy in range(3):
        band = xp_ref[pl.ds(dy, H), :, :].reshape(H * Wp, Cin)
        band = band.astype(jnp.bfloat16)
        for dx in range(3):
            accs[dx] = accs[dx] + jnp.dot(
                band, w_ref[dy, dx], preferred_element_type=jnp.float32)

    # Re-align the three horizontal taps: only 3 post-MXU slices per layer.
    y = (accs[0].reshape(H, Wp, Cout)[:, 0:W, :]
         + accs[1].reshape(H, Wp, Cout)[:, 1:W + 1, :]
         + accs[2].reshape(H, Wp, Cout)[:, 2:W + 2, :])

    y = y + b_ref[...]                          # bias in f32
    alpha = a_ref[...]
    y = jnp.where(y > 0, y, y * alpha)          # PReLU (per-channel alpha)
    o_ref[0, :, :, :] = y.astype(o_ref.dtype)


def conv3x3_prelu(x, w, b, a, out_dtype=jnp.bfloat16):
    """x: (B, H, W, Cin) NHWC -> (B, H, W, Cout)."""
    B, H, W, Cin = x.shape
    Cout = w.shape[-1]

    # Pad lane-sparse channel counts (Cin 23/34 -> 24/40, Cout 5 -> 8).
    cin_p = _round_up(Cin, 8)
    cout_p = _round_up(Cout, 8)
    if cin_p != Cin:
        x = jnp.pad(x, ((0, 0), (0, 0), (0, 0), (0, cin_p - Cin)))
        w = jnp.pad(w, ((0, 0), (0, 0), (0, cin_p - Cin), (0, 0)))
    if cout_p != Cout:
        w = jnp.pad(w, ((0, 0), (0, 0), (0, 0), (0, cout_p - Cout)))
        b = jnp.pad(b, ((0, cout_p - Cout),))
        a = jnp.pad(a, ((0, cout_p - Cout),), constant_values=1.0)

    xb = x.astype(jnp.bfloat16)
    wb = w.astype(jnp.bfloat16)
    b2 = b.reshape(1, cout_p).astype(jnp.float32)
    a2 = a.reshape(1, cout_p).astype(jnp.float32)

    out = pl.pallas_call(
        _conv3x3_prelu_kernel,
        out_shape=jax.ShapeDtypeStruct((B, H, W, cout_p), out_dtype),
        grid=(B,),
        in_specs=[
            pl.BlockSpec((1, H, W, cin_p), lambda n: (n, 0, 0, 0)),
            pl.BlockSpec((3, 3, cin_p, cout_p), lambda n: (0, 0, 0, 0)),
            pl.BlockSpec((1, cout_p), lambda n: (0, 0)),
            pl.BlockSpec((1, cout_p), lambda n: (0, 0)),
        ],
        out_specs=pl.BlockSpec((1, H, W, cout_p), lambda n: (n, 0, 0, 0)),
        scratch_shapes=[pltpu.VMEM((H + 2, W + 2, cin_p), jnp.float32)],
        compiler_params=pltpu.CompilerParams(
            dimension_semantics=("parallel",),
            vmem_limit_bytes=32 * 1024 * 1024),
    )(xb, wb, b2, a2)

    if cout_p != Cout:
        out = out[..., :Cout]
    return out


# -----------------------------------------------------------------------------
# Pallas kernel: lane-dense sigmoid-mask blend (channel-major / NCHW-flat)
# -----------------------------------------------------------------------------
def _merge_kernel(w0_ref, w1_ref, m_ref, o_ref, s_ref):
    """merged = w0*sigmoid(m) + w1*(1-sigmoid(m)); also emits sigmoid(m).
       Blocks: w0/w1/o: (1, 3, HW), m/s: (1, 1, HW)  (lanes = HW, dense)."""
    s = jax.nn.sigmoid(m_ref[...])
    s_ref[...] = s
    o_ref[...] = w0_ref[...] * s + w1_ref[...] * (1.0 - s)


def sigmoid_merge(w0_nhwc, w1_nhwc, mask_nhwc):
    """Inputs NHWC; returns (merged, sigmoid(mask)) already in NCHW."""
    B, H, W, _ = w0_nhwc.shape
    HW = H * W
    w0 = jnp.transpose(w0_nhwc, (0, 3, 1, 2)).reshape(B, 3, HW)
    w1 = jnp.transpose(w1_nhwc, (0, 3, 1, 2)).reshape(B, 3, HW)
    m = jnp.transpose(mask_nhwc, (0, 3, 1, 2)).reshape(B, 1, HW)
    merged, sig = pl.pallas_call(
        _merge_kernel,
        out_shape=(jax.ShapeDtypeStruct((B, 3, HW), jnp.float32),
                   jax.ShapeDtypeStruct((B, 1, HW), jnp.float32)),
        grid=(B,),
        in_specs=[
            pl.BlockSpec((1, 3, HW), lambda n: (n, 0, 0)),
            pl.BlockSpec((1, 3, HW), lambda n: (n, 0, 0)),
            pl.BlockSpec((1, 1, HW), lambda n: (n, 0, 0)),
        ],
        out_specs=(pl.BlockSpec((1, 3, HW), lambda n: (n, 0, 0)),
                   pl.BlockSpec((1, 1, HW), lambda n: (n, 0, 0))),
        compiler_params=pltpu.CompilerParams(
            dimension_semantics=("parallel",)),
    )(w0, w1, m)
    return merged.reshape(B, 3, H, W), sig.reshape(B, 1, H, W)


# -----------------------------------------------------------------------------
# JAX glue: bilinear resize (== F.interpolate align_corners=False) and warp
# -----------------------------------------------------------------------------
def _resize_coords(n_out, n_in):
    o = jnp.arange(n_out, dtype=jnp.float32)
    src = jnp.maximum((o + 0.5) * (float(n_in) / float(n_out)) - 0.5, 0.0)
    i0 = jnp.floor(src)
    w = src - i0
    i0 = i0.astype(jnp.int32)
    i1 = jnp.minimum(i0 + 1, n_in - 1)
    return i0, i1, w


def resize_bilinear(x, Hn, Wn):
    """Bilinear resize, PyTorch align_corners=False semantics. x: NHWC."""
    B, H, W, C = x.shape
    if Hn == H and Wn == W:
        return x
    y0, y1, wy = _resize_coords(Hn, H)
    x0, x1, wx = _resize_coords(Wn, W)
    r0 = x[:, y0]
    r1 = x[:, y1]
    wxb = wx[None, None, :, None]
    top = r0[:, :, x0] * (1 - wxb) + r0[:, :, x1] * wxb
    bot = r1[:, :, x0] * (1 - wxb) + r1[:, :, x1] * wxb
    wyb = wy[None, :, None, None]
    return top * (1 - wyb) + bot * wyb


def warp(img, flow):
    """Backward bilinear warp (grid_sample-like, border clamp).

    img: (B,H,W,C), flow: (B,H,W,2) with (dx, dy) in pixels.
    TODO(synk): keep in XLA -- data-dependent gather has no robust in-kernel
                equivalent here.
    """
    B, H, W, C = img.shape
    yy, xx = jnp.meshgrid(jnp.arange(H, dtype=jnp.float32),
                          jnp.arange(W, dtype=jnp.float32), indexing='ij')
    gx = xx[None] + flow[..., 0]
    gy = yy[None] + flow[..., 1]
    x0 = jnp.floor(gx)
    y0 = jnp.floor(gy)
    wx = (gx - x0)[..., None]
    wy = (gy - y0)[..., None]

    flat = img.reshape(B, H * W, C)

    def gather(yi, xi):
        yi = jnp.clip(yi, 0, H - 1).astype(jnp.int32)
        xi = jnp.clip(xi, 0, W - 1).astype(jnp.int32)
        idx = (yi * W + xi).reshape(B, H * W, 1)
        return jnp.take_along_axis(flat, idx, axis=1).reshape(B, H, W, C)

    v00 = gather(y0, x0)
    v01 = gather(y0, x0 + 1)
    v10 = gather(y0 + 1, x0)
    v11 = gather(y0 + 1, x0 + 1)
    return (v00 * (1 - wx) * (1 - wy) + v01 * wx * (1 - wy)
            + v10 * (1 - wx) * wy + v11 * wx * wy)


# -----------------------------------------------------------------------------
# IFBlock (conv / PReLU stack) built on the Pallas conv kernel
# -----------------------------------------------------------------------------
def init_conv_prelu(key, cin, cout):
    kw, kb = jax.random.split(key)
    return {
        'w': (jax.random.normal(kw, (3, 3, cin, cout), jnp.float32) * 0.05),
        'b': (jax.random.normal(kb, (cout,), jnp.float32) * 0.01),
        'a': jnp.full((cout,), 0.25, jnp.float32),   # PReLU init (PyTorch default)
    }


def init_if_block(key, in_planes, c, layers, in_else):
    keys = jax.random.split(key, 3 + layers)
    return {
        'conv0': [init_conv_prelu(keys[0], in_planes + in_else, c),
                  init_conv_prelu(keys[1], c, c)],
        'convblock': [init_conv_prelu(keys[2 + i], c, c) for i in range(layers)],
        'last': init_conv_prelu(keys[2 + layers], c, 5),
    }


def if_block_forward(p, x, flow, feature, scale):
    """IFBlock.forward.  x/flow/feature NHWC; returns (flow, mask, flow_s)."""
    B, H, W, _ = x.shape
    if scale != 1:
        x = resize_bilinear(x, H // scale, W // scale)
    if flow is not None:
        flow = resize_bilinear(flow, H // scale, W // scale) * (1.0 / scale)
        x = jnp.concatenate([x, flow], axis=-1)
    if feature is not None:
        x = jnp.concatenate([x, feature], axis=-1)
    x = conv3x3_prelu(x, **p['conv0'][0])                 # bf16 activations
    x = conv3x3_prelu(x, **p['conv0'][1])
    y = x
    for lp in p['convblock']:
        y = conv3x3_prelu(y, **lp)
    x = y + x
    tmp = conv3x3_prelu(x, **p['last'], out_dtype=jnp.float32)  # Cout 5 (padded to 8)
    flow_s = tmp[..., :4]
    tmp_up = resize_bilinear(tmp, H, W)
    flow_full = tmp_up[..., :4] * float(scale)
    mask = tmp_up[..., 4:5]
    return flow_full, mask, flow_s


# -----------------------------------------------------------------------------
# MultiScaleFlow forward
# -----------------------------------------------------------------------------
EMBED_DIMS = [8, 8]          # embed_dims[-2], embed_dims[-1] (synthetic sizes)
SCALES = [1, 2, 4, 8]


def init_multiscale_flow(key):
    k0, k1 = jax.random.split(key)
    return {
        # IFBlock(embed_dims[-1]*2, 128, layers=2, scale=8, in_else=7)
        'block0': init_if_block(k0, EMBED_DIMS[-1] * 2, 128, 2, 7),
        # IFBlock(embed_dims[-2]*2, 128, layers=2, scale=4, in_else=18)
        'block1': init_if_block(k1, EMBED_DIMS[-2] * 2, 128, 2, 18),
    }


@jax.jit
def multiscale_flow_forward(params, x_nchw, af4_nhwc, af8_nhwc, timestep=0.5):
    """Forward pass of MultiScaleFlow.

    x_nchw:   (B, 6, H, W)  -- img0 | img1 (PyTorch NCHW interface)
    af4_nhwc: (2B, H/4, W/4, embed_dims[-2])   backbone feature (af[-2])
    af8_nhwc: (2B, H/8, W/8, embed_dims[-1])   backbone feature (af[-1])
    timestep: traced scalar (no re-jit per value).
    """
    x = jnp.transpose(x_nchw, (0, 2, 3, 1)).astype(jnp.float32)  # NCHW -> NHWC
    img0, img1 = x[..., :3], x[..., 3:6]
    B, H, W, _ = img0.shape

    # TODO(synk): self.feature_bone (backbone) is not defined in the reference;
    # its outputs `af` are taken as external inputs (af4_nhwc, af8_nhwc).
    af = [af4_nhwc, af8_nhwc]

    # TODO(synk): self.gmflow / InputPadder / matching_feat path not implemented
    # (GMFlow module not provided).

    flow_list, mask_list, merged = [], [], []
    merged_fine = []
    warped_img0, warped_img1 = img0, img1
    flow = mask = flow_s = None
    flow_matching_list = []

    block_params = [params['block0'], params['block1']]
    block_scales = [SCALES[-1], SCALES[-2]]          # [8, 4]

    t_full = jnp.broadcast_to(
        jnp.asarray(timestep, jnp.float32), (B, H, W, 1))

    for i in range(2):
        afm = af[-1 - i]
        af0, af1 = afm[:B], afm[B:]
        feature = jnp.concatenate([af0, af1], axis=-1)
        if flow is not None:
            xin = jnp.concatenate(
                [img0, img1, warped_img0, warped_img1, mask, t_full], axis=-1)
            flow_d, mask_d, flow_s_d = if_block_forward(
                block_params[i], xin, flow, feature, block_scales[i])
            flow = flow + flow_d
            mask = mask + mask_d
            flow_s = resize_bilinear(flow_s, flow_s.shape[1] * 2,
                                     flow_s.shape[2] * 2) * 2.0
            flow_s = flow_s + flow_s_d
        else:
            xin = jnp.concatenate([img0, img1, t_full], axis=-1)
            flow, mask, flow_s = if_block_forward(
                block_params[i], xin, None, feature, block_scales[i])

        warped_img0 = warp(img0, flow[..., :2])
        warped_img1 = warp(img1, flow[..., 2:4])
        merged_i_nchw, mask_sig_nchw = sigmoid_merge(warped_img0, warped_img1,
                                                     mask)
        mask_list.append(mask_sig_nchw)          # already NCHW
        flow_list.append(flow)                   # NHWC, transposed at the end
        merged.append(merged_i_nchw)             # already NCHW

        # TODO(synk): self.matching_block[i] refinement skipped
        # (MatchingBlock module not provided).

    # TODO(synk): self.contextnet / self.unet residual refinement skipped
    # (modules not provided); pred omits the `res` term.
    pred = jnp.clip(merged[-1], 0.0, 1.0)

    merged.extend(merged_fine)

    to_nchw = lambda a: jnp.transpose(a, (0, 3, 1, 2))
    return (
        [to_nchw(f) for f in flow_list],
        mask_list,
        merged,
        pred,
        flow_matching_list,
    )


# -----------------------------------------------------------------------------
# Main
# -----------------------------------------------------------------------------
if __name__ == "__main__":
    key = jax.random.PRNGKey(0)
    kp, kx, ka4, ka8 = jax.random.split(key, 4)

    B, H, W = 2, 16, 16
    params = init_multiscale_flow(kp)

    x = jax.random.uniform(kx, (B, 6, H, W), jnp.float32)           # NCHW input
    af4 = jax.random.normal(ka4, (2 * B, H // 4, W // 4, EMBED_DIMS[-2]),
                            jnp.float32) * 0.1
    af8 = jax.random.normal(ka8, (2 * B, H // 8, W // 8, EMBED_DIMS[-1]),
                            jnp.float32) * 0.1

    flow_list, mask_list, merged, pred, flow_matching_list = \
        multiscale_flow_forward(params, x, af4, af8, 0.5)

    jax.block_until_ready(pred)
    jax.block_until_ready(flow_list[-1])
    jax.block_until_ready(mask_list[-1])

    assert pred.shape == (B, 3, H, W)
    assert flow_list[0].shape == (B, 4, H, W) and flow_list[1].shape == (B, 4, H, W)
    assert mask_list[0].shape == (B, 1, H, W)
    assert merged[0].shape == (B, 3, H, W)
    print("KERNEL_OK")
</pallas_src>

<mosaic_0001>
module attributes {stable_mosaic.version = 11 : i64} {
  func.func @_conv3x3_prelu_kernel(%arg0: i32, %arg1: memref<1x2x2x24xbf16, #tpu.memory_space<vmem>>, %arg2: memref<3x3x24x128xbf16, #tpu.memory_space<vmem>>, %arg3: memref<1x128xf32, #tpu.memory_space<vmem>>, %arg4: memref<1x128xf32, #tpu.memory_space<vmem>>, %arg5: memref<1x2x2x128xbf16, #tpu.memory_space<vmem>>, %arg6: memref<4x4x24xf32, #tpu.memory_space<vmem>>) attributes {dimension_semantics = [#tpu.dimension_semantics<parallel>], iteration_bounds = array<i64: 2>, scalar_prefetch = 0 : i64, scratch_operands = 1 : i64, tpu.core_type = #tpu.core_type<tc>, window_params = [{transform_indices = @transform_0, window_bounds = array<i64: 1, 2, 2, 24>}, {pipeline_mode = #tpu.pipeline_mode<synchronous>, transform_indices = @transform_1, window_bounds = array<i64: 3, 3, 24, 128>}, {pipeline_mode = #tpu.pipeline_mode<synchronous>, transform_indices = @transform_2, window_bounds = array<i64: 1, 128>}, {pipeline_mode = #tpu.pipeline_mode<synchronous>, transform_indices = @transform_3, window_bounds = array<i64: 1, 128>}, {transform_indices = @transform_4, window_bounds = array<i64: 1, 2, 2, 128>}]} {
    %cst = arith.constant 0.000000e+00 : f32
    %0 = vector.broadcast %cst : f32 to vector<4x4x24xf32>
    %c0 = arith.constant 0 : index
    %c0_0 = arith.constant 0 : index
    %c0_1 = arith.constant 0 : index
    %1 = vector.load %arg6[%c0, %c0_0, %c0_1] : memref<4x4x24xf32, #tpu.memory_space<vmem>>, vector<4x4x24xf32>
    tpu.vector_store %arg6[%c0, %c0_0, %c0_1], %0 {strides = array<i32>} : memref<4x4x24xf32, #tpu.memory_space<vmem>>, vector<4x4x24xf32>,
    %c0_2 = arith.constant 0 : index
    %c0_3 = arith.constant 0 : index
    %c0_4 = arith.constant 0 : index
    %c0_5 = arith.constant 0 : index
    %2 = vector.load %arg1[%c0_2, %c0_3, %c0_4, %c0_5] : memref<1x2x2x24xbf16, #tpu.memory_space<vmem>>, vector<1x2x2x24xbf16>
    %3 = vector.shape_cast %2 : vector<1x2x2x24xbf16> to vector<2x2x24xbf16>
    %4 = arith.extf %3 : vector<2x2x24xbf16> to vector<2x2x24xf32>
    %c1 = arith.constant 1 : index
    %c1_6 = arith.constant 1 : index
    %c0_7 = arith.constant 0 : index
    %5 = vector.load %arg6[%c1, %c1_6, %c0_7] : memref<4x4x24xf32, #tpu.memory_space<vmem>>, vector<2x2x24xf32>
    tpu.vector_store %arg6[%c1, %c1_6, %c0_7], %4 {strides = array<i32>} : memref<4x4x24xf32, #tpu.memory_space<vmem>>, vector<2x2x24xf32>,
    %cst_8 = arith.constant 0.000000e+00 : f32
    %6 = vector.broadcast %cst_8 : f32 to vector<8x128xf32>
    %cst_9 = arith.constant 0.000000e+00 : f32
    %7 = vector.broadcast %cst_9 : f32 to vector<8x128xf32>
    %cst_10 = arith.constant 0.000000e+00 : f32
    %8 = vector.broadcast %cst_10 : f32 to vector<8x128xf32>
    %c0_11 = arith.constant 0 : index
    %c0_12 = arith.constant 0 : index
    %c0_13 = arith.constant 0 : index
    %9 = vector.load %arg6[%c0_11, %c0_12, %c0_13] : memref<4x4x24xf32, #tpu.memory_space<vmem>>, vector<2x4x24xf32>
    %10 = vector.shape_cast %9 : vector<2x4x24xf32> to vector<8x24xf32>
    %11 = arith.truncf %10 : vector<8x24xf32> to vector<8x24xbf16>
    %c0_14 = arith.constant 0 : index
    %c0_15 = arith.constant 0 : index
    %c0_16 = arith.constant 0 : index
    %c0_17 = arith.constant 0 : index
    %12 = vector.load %arg2[%c0_14, %c0_15, %c0_16, %c0_17] : memref<3x3x24x128xbf16, #tpu.memory_space<vmem>>, vector<1x1x24x128xbf16>
    %13 = vector.shape_cast %12 : vector<1x1x24x128xbf16> to vector<24x128xbf16>
    %cst_18 = arith.constant dense<0.000000e+00> : vector<8x128xf32>
    %14 = tpu.matmul %11, %13, %cst_18 {dimension_numbers = #tpu.dot_dimension_numbers<[1], [0], [0], [1], [0, 0, 1, 1], [], []>} : vector<8x24xbf16>, vector<24x128xbf16>, vector<8x128xf32> -> vector<8x128xf32>
    %15 = arith.addf %6, %14 : vector<8x128xf32>
    %c0_19 = arith.constant 0 : index
    %c1_20 = arith.constant 1 : index
    %c0_21 = arith.constant 0 : index
    %c0_22 = arith.constant 0 : index
    %16 = vector.load %arg2[%c0_19, %c1_20, %c0_21, %c0_22] : memref<3x3x24x128xbf16, #tpu.memory_space<vmem>>, vector<1x1x24x128xbf16>
    %17 = vector.shape_cast %16 : vector<1x1x24x128xbf16> to vector<24x128xbf16>
    %cst_23 = arith.constant dense<0.000000e+00> : vector<8x128xf32>
    %18 = tpu.matmul %11, %17, %cst_23 {dimension_numbers = #tpu.dot_dimension_numbers<[1], [0], [0], [1], [0, 0, 1, 1], [], []>} : vector<8x24xbf16>, vector<24x128xbf16>, vector<8x128xf32> -> vector<8x128xf32>
    %19 = arith.addf %7, %18 : vector<8x128xf32>
    %c0_24 = arith.constant 0 : index
    %c2 = arith.constant 2 : index
    %c0_25 = arith.constant 0 : index
    %c0_26 = arith.constant 0 : index
    %20 = vector.load %arg2[%c0_24, %c2, %c0_25, %c0_26] : memref<3x3x24x128xbf16, #tpu.memory_space<vmem>>, vector<1x1x24x128xbf16>
    %21 = vector.shape_cast %20 : vector<1x1x24x128xbf16> to vector<24x128xbf16>
    %cst_27 = arith.constant dense<0.000000e+00> : vector<8x128xf32>
    %22 = tpu.matmul %11, %21, %cst_27 {dimension_numbers = #tpu.dot_dimension_numbers<[1], [0], [0], [1], [0, 0, 1, 1], [], []>} : vector<8x24xbf16>, vector<24x128xbf16>, vector<8x128xf32> -> vector<8x128xf32>
    %23 = arith.addf %8, %22 : vector<8x128xf32>
    %c1_28 = arith.constant 1 : index
    %c0_29 = arith.constant 0 : index
    %c0_30 = arith.constant 0 : index
    %24 = vector.load %arg6[%c1_28, %c0_29, %c0_30] : memref<4x4x24xf32, #tpu.memory_space<vmem>>, vector<2x4x24xf32>
    %25 = vector.shape_cast %24 : vector<2x4x24xf32> to vector<8x24xf32>
    %26 = arith.truncf %25 : vector<8x24xf32> to vector<8x24xbf16>
    %c1_31 = arith.constant 1 : index
    %c0_32 = arith.constant 0 : index
    %c0_33 = arith.constant 0 : index
    %c0_34 = arith.constant 0 : index
    %27 = vector.load %arg2[%c1_31, %c0_32, %c0_33, %c0_34] : memref<3x3x24x128xbf16, #tpu.memory_space<vmem>>, vector<1x1x24x128xbf16>
    %28 = vector.shape_cast %27 : vector<1x1x24x128xbf16> to vector<24x128xbf16>
    %cst_35 = arith.constant dense<0.000000e+00> : vector<8x128xf32>
    %29 = tpu.matmul %26, %28, %cst_35 {dimension_numbers = #tpu.dot_dimension_numbers<[1], [0], [0], [1], [0, 0, 1, 1], [], []>} : vector<8x24xbf16>, vector<24x128xbf16>, vector<8x128xf32> -> vector<8x128xf32>
    %30 = arith.addf %15, %29 : vector<8x128xf32>
    %c1_36 = arith.constant 1 : index
    %c1_37 = arith.constant 1 : index
    %c0_38 = arith.constant 0 : index
    %c0_39 = arith.constant 0 : index
    %31 = vector.load %arg2[%c1_36, %c1_37, %c0_38, %c0_39] : memref<3x3x24x128xbf16, #tpu.memory_space<vmem>>, vector<1x1x24x128xbf16>
    %32 = vector.shape_cast %31 : vector<1x1x24x128xbf16> to vector<24x128xbf16>
    %cst_40 = arith.constant dense<0.000000e+00> : vector<8x128xf32>
    %33 = tpu.matmul %26, %32, %cst_40 {dimension_numbers = #tpu.dot_dimension_numbers<[1], [0], [0], [1], [0, 0, 1, 1], [], []>} : vector<8x24xbf16>, vector<24x128xbf16>, vector<8x128xf32> -> vector<8x128xf32>
    %34 = arith.addf %19, %33 : vector<8x128xf32>
    %c1_41 = arith.constant 1 : index
    %c2_42 = arith.constant 2 : index
    %c0_43 = arith.constant 0 : index
    %c0_44 = arith.constant 0 : index
    %35 = vector.load %arg2[%c1_41, %c2_42, %c0_43, %c0_44] : memref<3x3x24x128xbf16, #tpu.memory_space<vmem>>, vector<1x1x24x128xbf16>
    %36 = vector.shape_cast %35 : vector<1x1x24x128xbf16> to vector<24x128xbf16>
    %cst_45 = arith.constant dense<0.000000e+00> : vector<8x128xf32>
    %37 = tpu.matmul %26, %36, %cst_45 {dimension_numbers = #tpu.dot_dimension_numbers<[1], [0], [0], [1], [0, 0, 1, 1], [], []>} : vector<8x24xbf16>, vector<24x128xbf16>, vector<8x128xf32> -> vector<8x128xf32>
    %38 = arith.addf %23, %37 : vector<8x128xf32>
    %c2_46 = arith.constant 2 : index
    %c0_47 = arith.constant 0 : index
    %c0_48 = arith.constant 0 : index
    %39 = vector.load %arg6[%c2_46, %c0_47, %c0_48] : memref<4x4x24xf32, #tpu.memory_space<vmem>>, vector<2x4x24xf32>
    %40 = vector.shape_cast %39 : vector<2x4x24xf32> to vector<8x24xf32>
    %41 = arith.truncf %40 : vector<8x24xf32> to vector<8x24xbf16>
    %c2_49 = arith.constant 2 : index
    %c0_50 = arith.constant 0 : index
    %c0_51 = arith.constant 0 : index
    %c0_52 = arith.constant 0 : index
    %42 = vector.load %arg2[%c2_49, %c0_50, %c0_51, %c0_52] : memref<3x3x24x128xbf16, #tpu.memory_space<vmem>>, vector<1x1x24x128xbf16>
    %43 = vector.shape_cast %42 : vector<1x1x24x128xbf16> to vector<24x128xbf16>
    %cst_53 = arith.constant dense<0.000000e+00> : vector<8x128xf32>
    %44 = tpu.matmul %41, %43, %cst_53 {dimension_numbers = #tpu.dot_dimension_numbers<[1], [0], [0], [1], [0, 0, 1, 1], [], []>} : vector<8x24xbf16>, vector<24x128xbf16>, vector<8x128xf32> -> vector<8x128xf32>
    %45 = arith.addf %30, %44 : vector<8x128xf32>
    %c2_54 = arith.constant 2 : index
    %c1_55 = arith.constant 1 : index
    %c0_56 = arith.constant 0 : index
    %c0_57 = arith.constant 0 : index
    %46 = vector.load %arg2[%c2_54, %c1_55, %c0_56, %c0_57] : memref<3x3x24x128xbf16, #tpu.memory_space<vmem>>, vector<1x1x24x128xbf16>
    %47 = vector.shape_cast %46 : vector<1x1x24x128xbf16> to vector<24x128xbf16>
    %cst_58 = arith.constant dense<0.000000e+00> : vector<8x128xf32>
    %48 = tpu.matmul %41, %47, %cst_58 {dimension_numbers = #tpu.dot_dimension_numbers<[1], [0], [0], [1], [0, 0, 1, 1], [], []>} : vector<8x24xbf16>, vector<24x128xbf16>, vector<8x128xf32> -> vector<8x128xf32>
    %49 = arith.addf %34, %48 : vector<8x128xf32>
    %c2_59 = arith.constant 2 : index
    %c2_60 = arith.constant 2 : index
    %c0_61 = arith.constant 0 : index
    %c0_62 = arith.constant 0 : index
    %50 = vector.load %arg2[%c2_59, %c2_60, %c0_61, %c0_62] : memref<3x3x24x128xbf16, #tpu.memory_space<vmem>>, vector<1x1x24x128xbf16>
    %51 = vector.shape_cast %50 : vector<1x1x24x128xbf16> to vector<24x128xbf16>
    %cst_63 = arith.constant dense<0.000000e+00> : vector<8x128xf32>
    %52 = tpu.matmul %41, %51, %cst_63 {dimension_numbers = #tpu.dot_dimension_numbers<[1], [0], [0], [1], [0, 0, 1, 1], [], []>} : vector<8x24xbf16>, vector<24x128xbf16>, vector<8x128xf32> -> vector<8x128xf32>
    %53 = arith.addf %38, %52 : vector<8x128xf32>
    %54 = vector.shape_cast %45 : vector<8x128xf32> to vector<2x4x128xf32>
    %55 = vector.extract_strided_slice %54 {offsets = [0, 0, 0], sizes = [2, 2, 128], strides = [1, 1, 1]} : vector<2x4x128xf32> to vector<2x2x128xf32>
    %56 = vector.shape_cast %49 : vector<8x128xf32> to vector<2x4x128xf32>
    %57 = vector.extract_strided_slice %56 {offsets = [0, 1, 0], sizes = [2, 2, 128], strides = [1, 1, 1]} : vector<2x4x128xf32> to vector<2x2x128xf32>
    %58 = arith.addf %55, %57 : vector<2x2x128xf32>
    %59 = vector.shape_cast %53 : vector<8x128xf32> to vector<2x4x128xf32>
    %60 = vector.extract_strided_slice %59 {offsets = [0, 2, 0], sizes = [2, 2, 128], strides = [1, 1, 1]} : vector<2x4x128xf32> to vector<2x2x128xf32>
    %61 = arith.addf %58, %60 : vector<2x2x128xf32>
    %c0_64 = arith.constant 0 : index
    %c0_65 = arith.constant 0 : index
    %62 = vector.load %arg3[%c0_64, %c0_65] : memref<1x128xf32, #tpu.memory_space<vmem>>, vector<1x128xf32>
    %63 = vector.shape_cast %62 : vector<1x128xf32> to vector<1x1x128xf32>
    %64 = vector.broadcast %63 : vector<1x1x128xf32> to vector<2x2x128xf32>
    %65 = arith.addf %61, %64 : vector<2x2x128xf32>
    %c0_66 = arith.constant 0 : index
    %c0_67 = arith.constant 0 : index
    %66 = vector.load %arg4[%c0_66, %c0_67] : memref<1x128xf32, #tpu.memory_space<vmem>>, vector<1x128xf32>
    %cst_68 = arith.constant 0.000000e+00 : f32
    %67 = vector.broadcast %cst_68 : f32 to vector<2x2x128xf32>
    %68 = arith.cmpf ogt, %65, %67 : vector<2x2x128xf32>
    %69 = vector.shape_cast %66 : vector<1x128xf32> to vector<1x1x128xf32>
    %70 = vector.broadcast %69 : vector<1x1x128xf32> to vector<2x2x128xf32>
    %71 = arith.mulf %65, %70 : vector<2x2x128xf32>
    %72 = arith.select %68, %65, %71 : vector<2x2x128xi1>, vector<2x2x128xf32>
    %73 = arith.truncf %72 : vector<2x2x128xf32> to vector<2x2x128xbf16>
    %c0_69 = arith.constant 0 : index
    %c0_70 = arith.constant 0 : index
    %c0_71 = arith.constant 0 : index
    %c0_72 = arith.constant 0 : index
    %74 = vector.load %arg5[%c0_69, %c0_70, %c0_71, %c0_72] : memref<1x2x2x128xbf16, #tpu.memory_space<vmem>>, vector<1x2x2x128xbf16>
    %75 = vector.shape_cast %74 : vector<1x2x2x128xbf16> to vector<2x2x128xbf16>
    %76 = vector.shape_cast %73 : vector<2x2x128xbf16> to vector<1x2x2x128xbf16>
    tpu.vector_store %arg5[%c0_69, %c0_70, %c0_71, %c0_72], %76 {strides = array<i32>} : memref<1x2x2x128xbf16, #tpu.memory_space<vmem>>, vector<1x2x2x128xbf16>,
    return
  }
  func.func @transform_0(%arg0: i32) -> (i32, i32, i32, i32) {
    %c0_i32 = arith.constant 0 : i32
    %c0_i32_0 = arith.constant 0 : i32
    %c0_i32_1 = arith.constant 0 : i32
    %c0_i32_2 = arith.constant 0 : i32
    return %arg0, %c0_i32, %c0_i32_0, %c0_i32_1 : i32, i32, i32, i32
  }
  func.func @transform_1(%arg0: i32) -> (i32, i32, i32, i32) {
    %c0_i32 = arith.constant 0 : i32
    %c0_i32_0 = arith.constant 0 : i32
    %c0_i32_1 = arith.constant 0 : i32
    %c0_i32_2 = arith.constant 0 : i32
    %c0_i32_3 = arith.constant 0 : i32
    return %c0_i32, %c0_i32_0, %c0_i32_1, %c0_i32_2 : i32, i32, i32, i32
  }
  func.func @transform_2(%arg0: i32) -> (i32, i32) {
    %c0_i32 = arith.constant 0 : i32
    %c0_i32_0 = arith.constant 0 : i32
    %c0_i32_1 = arith.constant 0 : i32
    return %c0_i32, %c0_i32_0 : i32, i32
  }
  func.func @transform_3(%arg0: i32) -> (i32, i32) {
    %c0_i32 = arith.constant 0 : i32
    %c0_i32_0 = arith.constant 0 : i32
    %c0_i32_1 = arith.constant 0 : i32
    return %c0_i32, %c0_i32_0 : i32, i32
  }
  func.func @transform_4(%arg0: i32) -> (i32, i32, i32, i32) {
    %c0_i32 = arith.constant 0 : i32
    %c0_i32_0 = arith.constant 0 : i32
    %c0_i32_1 = arith.constant 0 : i32
    %c0_i32_2 = arith.constant 0 : i32
    return %arg0, %c0_i32, %c0_i32_0, %c0_i32_1 : i32, i32, i32, i32
  }
}

module attributes {stable_mosaic.version = 11 : i64} {
  func.func @_conv3x3_prelu_kernel(%arg0: i32, %arg1: memref<1x2x2x128xbf16, #tpu.memory_space<vmem>>, %arg2: memref<3x3x128x128xbf16, #tpu.memory_space<vmem>>, %arg3: memref<1x128xf32, #tpu.memory_space<vmem>>, %arg4: memref<1x128xf32, #tpu.memory_space<vmem>>, %arg5: memref<1x2x2x128xbf16, #tpu.memory_space<vmem>>, %arg6: memref<4x4x128xf32, #tpu.memory_space<vmem>>) attributes {dimension_semantics = [#tpu.dimension_semantics<parallel>], iteration_bounds = array<i64: 2>, scalar_prefetch = 0 : i64, scratch_operands = 1 : i64, tpu.core_type = #tpu.core_type<tc>, window_params = [{transform_indices = @transform_0, window_bounds = array<i64: 1, 2, 2, 128>}, {pipeline_mode = #tpu.pipeline_mode<synchronous>, transform_indices = @transform_1, window_bounds = array<i64: 3, 3, 128, 128>}, {pipeline_mode = #tpu.pipeline_mode<synchronous>, transform_indices = @transform_2, window_bounds = array<i64: 1, 128>}, {pipeline_mode = #tpu.pipeline_mode<synchronous>, transform_indices = @transform_3, window_bounds = array<i64: 1, 128>}, {transform_indices = @transform_4, window_bounds = array<i64: 1, 2, 2, 128>}]} {
    %cst = arith.constant 0.000000e+00 : f32
    %0 = vector.broadcast %cst : f32 to vector<4x4x128xf32>
    %c0 = arith.constant 0 : index
    %c0_0 = arith.constant 0 : index
    %c0_1 = arith.constant 0 : index
    %1 = vector.load %arg6[%c0, %c0_0, %c0_1] : memref<4x4x128xf32, #tpu.memory_space<vmem>>, vector<4x4x128xf32>
    tpu.vector_store %arg6[%c0, %c0_0, %c0_1], %0 {strides = array<i32>} : memref<4x4x128xf32, #tpu.memory_space<vmem>>, vector<4x4x128xf32>,
    %c0_2 = arith.constant 0 : index
    %c0_3 = arith.constant 0 : index
    %c0_4 = arith.constant 0 : index
    %c0_5 = arith.constant 0 : index
    %2 = vector.load %arg1[%c0_2, %c0_3, %c0_4, %c0_5] : memref<1x2x2x128xbf16, #tpu.memory_space<vmem>>, vector<1x2x2x128xbf16>
    %3 = vector.shape_cast %2 : vector<1x2x2x128xbf16> to vector<2x2x128xbf16>
    %4 = arith.extf %3 : vector<2x2x128xbf16> to vector<2x2x128xf32>
    %c1 = arith.constant 1 : index
    %c1_6 = arith.constant 1 : index
    %c0_7 = arith.constant 0 : index
    %5 = vector.load %arg6[%c1, %c1_6, %c0_7] : memref<4x4x128xf32, #tpu.memory_space<vmem>>, vector<2x2x128xf32>
    tpu.vector_store %arg6[%c1, %c1_6, %c0_7], %4 {strides = array<i32>} : memref<4x4x128xf32, #tpu.memory_space<vmem>>, vector<2x2x128xf32>,
    %cst_8 = arith.constant 0.000000e+00 : f32
    %6 = vector.broadcast %cst_8 : f32 to vector<8x128xf32>
    %cst_9 = arith.constant 0.000000e+00 : f32
    %7 = vector.broadcast %cst_9 : f32 to vector<8x128xf32>
    %cst_10 = arith.constant 0.000000e+00 : f32
    %8 = vector.broadcast %cst_10 : f32 to vector<8x128xf32>
    %c0_11 = arith.constant 0 : index
    %c0_12 = arith.constant 0 : index
    %c0_13 = arith.constant 0 : index
    %9 = vector.load %arg6[%c0_11, %c0_12, %c0_13] : memref<4x4x128xf32, #tpu.memory_space<vmem>>, vector<2x4x128xf32>
    %10 = vector.shape_cast %9 : vector<2x4x128xf32> to vector<8x128xf32>
    %11 = arith.truncf %10 : vector<8x128xf32> to vector<8x128xbf16>
    %c0_14 = arith.constant 0 : index
    %c0_15 = arith.constant 0 : index
    %c0_16 = arith.constant 0 : index
    %c0_17 = arith.constant 0 : index
    %12 = vector.load %arg2[%c0_14, %c0_15, %c0_16, %c0_17] : memref<3x3x128x128xbf16, #tpu.memory_space<vmem>>, vector<1x1x128x128xbf16>
    %13 = vector.shape_cast %12 : vector<1x1x128x128xbf16> to vector<128x128xbf16>
    %cst_18 = arith.constant dense<0.000000e+00> : vector<8x128xf32>
    %14 = tpu.matmul %11, %13, %cst_18 {dimension_numbers = #tpu.dot_dimension_numbers<[1], [0], [0], [1], [0, 0, 1, 1], [], []>} : vector<8x128xbf16>, vector<128x128xbf16>, vector<8x128xf32> -> vector<8x128xf32>
    %15 = arith.addf %6, %14 : vector<8x128xf32>
    %c0_19 = arith.constant 0 : index
    %c1_20 = arith.constant 1 : index
    %c0_21 = arith.constant 0 : index
    %c0_22 = arith.constant 0 : index
    %16 = vector.load %arg2[%c0_19, %c1_20, %c0_21, %c0_22] : memref<3x3x128x128xbf16, #tpu.memory_space<vmem>>, vector<1x1x128x128xbf16>
    %17 = vector.shape_cast %16 : vector<1x1x128x128xbf16> to vector<128x128xbf16>
    %cst_23 = arith.constant dense<0.000000e+00> : vector<8x128xf32>
    %18 = tpu.matmul %11, %17, %cst_23 {dimension_numbers = #tpu.dot_dimension_numbers<[1], [0], [0], [1], [0, 0, 1, 1], [], []>} : vector<8x128xbf16>, vector<128x128xbf16>, vector<8x128xf32> -> vector<8x128xf32>
    %19 = arith.addf %7, %18 : vector<8x128xf32>
    %c0_24 = arith.constant 0 : index
    %c2 = arith.constant 2 : index
    %c0_25 = arith.constant 0 : index
    %c0_26 = arith.constant 0 : index
    %20 = vector.load %arg2[%c0_24, %c2, %c0_25, %c0_26] : memref<3x3x128x128xbf16, #tpu.memory_space<vmem>>, vector<1x1x128x128xbf16>
    %21 = vector.shape_cast %20 : vector<1x1x128x128xbf16> to vector<128x128xbf16>
    %cst_27 = arith.constant dense<0.000000e+00> : vector<8x128xf32>
    %22 = tpu.matmul %11, %21, %cst_27 {dimension_numbers = #tpu.dot_dimension_numbers<[1], [0], [0], [1], [0, 0, 1, 1], [], []>} : vector<8x128xbf16>, vector<128x128xbf16>, vector<8x128xf32> -> vector<8x128xf32>
    %23 = arith.addf %8, %22 : vector<8x128xf32>
    %c1_28 = arith.constant 1 : index
    %c0_29 = arith.constant 0 : index
    %c0_30 = arith.constant 0 : index
    %24 = vector.load %arg6[%c1_28, %c0_29, %c0_30] : memref<4x4x128xf32, #tpu.memory_space<vmem>>, vector<2x4x128xf32>
    %25 = vector.shape_cast %24 : vector<2x4x128xf32> to vector<8x128xf32>
    %26 = arith.truncf %25 : vector<8x128xf32> to vector<8x128xbf16>
    %c1_31 = arith.constant 1 : index
    %c0_32 = arith.constant 0 : index
    %c0_33 = arith.constant 0 : index
    %c0_34 = arith.constant 0 : index
    %27 = vector.load %arg2[%c1_31, %c0_32, %c0_33, %c0_34] : memref<3x3x128x128xbf16, #tpu.memory_space<vmem>>, vector<1x1x128x128xbf16>
    %28 = vector.shape_cast %27 : vector<1x1x128x128xbf16> to vector<128x128xbf16>
    %cst_35 = arith.constant dense<0.000000e+00> : vector<8x128xf32>
    %29 = tpu.matmul %26, %28, %cst_35 {dimension_numbers = #tpu.dot_dimension_numbers<[1], [0], [0], [1], [0, 0, 1, 1], [], []>} : vector<8x128xbf16>, vector<128x128xbf16>, vector<8x128xf32> -> vector<8x128xf32>
    %30 = arith.addf %15, %29 : vector<8x128xf32>
    %c1_36 = arith.constant 1 : index
    %c1_37 = arith.constant 1 : index
    %c0_38 = arith.constant 0 : index
    %c0_39 = arith.constant 0 : index
    %31 = vector.load %arg2[%c1_36, %c1_37, %c0_38, %c0_39] : memref<3x3x128x128xbf16, #tpu.memory_space<vmem>>, vector<1x1x128x128xbf16>
    %32 = vector.shape_cast %31 : vector<1x1x128x128xbf16> to vector<128x128xbf16>
    %cst_40 = arith.constant dense<0.000000e+00> : vector<8x128xf32>
    %33 = tpu.matmul %26, %32, %cst_40 {dimension_numbers = #tpu.dot_dimension_numbers<[1], [0], [0], [1], [0, 0, 1, 1], [], []>} : vector<8x128xbf16>, vector<128x128xbf16>, vector<8x128xf32> -> vector<8x128xf32>
    %34 = arith.addf %19, %33 : vector<8x128xf32>
    %c1_41 = arith.constant 1 : index
    %c2_42 = arith.constant 2 : index
    %c0_43 = arith.constant 0 : index
    %c0_44 = arith.constant 0 : index
    %35 = vector.load %arg2[%c1_41, %c2_42, %c0_43, %c0_44] : memref<3x3x128x128xbf16, #tpu.memory_space<vmem>>, vector<1x1x128x128xbf16>
    %36 = vector.shape_cast %35 : vector<1x1x128x128xbf16> to vector<128x128xbf16>
    %cst_45 = arith.constant dense<0.000000e+00> : vector<8x128xf32>
    %37 = tpu.matmul %26, %36, %cst_45 {dimension_numbers = #tpu.dot_dimension_numbers<[1], [0], [0], [1], [0, 0, 1, 1], [], []>} : vector<8x128xbf16>, vector<128x128xbf16>, vector<8x128xf32> -> vector<8x128xf32>
    %38 = arith.addf %23, %37 : vector<8x128xf32>
    %c2_46 = arith.constant 2 : index
    %c0_47 = arith.constant 0 : index
    %c0_48 = arith.constant 0 : index
    %39 = vector.load %arg6[%c2_46, %c0_47, %c0_48] : memref<4x4x128xf32, #tpu.memory_space<vmem>>, vector<2x4x128xf32>
    %40 = vector.shape_cast %39 : vector<2x4x128xf32> to vector<8x128xf32>
    %41 = arith.truncf %40 : vector<8x128xf32> to vector<8x128xbf16>
    %c2_49 = arith.constant 2 : index
    %c0_50 = arith.constant 0 : index
    %c0_51 = arith.constant 0 : index
    %c0_52 = arith.constant 0 : index
    %42 = vector.load %arg2[%c2_49, %c0_50, %c0_51, %c0_52] : memref<3x3x128x128xbf16, #tpu.memory_space<vmem>>, vector<1x1x128x128xbf16>
    %43 = vector.shape_cast %42 : vector<1x1x128x128xbf16> to vector<128x128xbf16>
    %cst_53 = arith.constant dense<0.000000e+00> : vector<8x128xf32>
    %44 = tpu.matmul %41, %43, %cst_53 {dimension_numbers = #tpu.dot_dimension_numbers<[1], [0], [0], [1], [0, 0, 1, 1], [], []>} : vector<8x128xbf16>, vector<128x128xbf16>, vector<8x128xf32> -> vector<8x128xf32>
    %45 = arith.addf %30, %44 : vector<8x128xf32>
    %c2_54 = arith.constant 2 : index
    %c1_55 = arith.constant 1 : index
    %c0_56 = arith.constant 0 : index
    %c0_57 = arith.constant 0 : index
    %46 = vector.load %arg2[%c2_54, %c1_55, %c0_56, %c0_57] : memref<3x3x128x128xbf16, #tpu.memory_space<vmem>>, vector<1x1x128x128xbf16>
    %47 = vector.shape_cast %46 : vector<1x1x128x128xbf16> to vector<128x128xbf16>
    %cst_58 = arith.constant dense<0.000000e+00> : vector<8x128xf32>
    %48 = tpu.matmul %41, %47, %cst_58 {dimension_numbers = #tpu.dot_dimension_numbers<[1], [0], [0], [1], [0, 0, 1, 1], [], []>} : vector<8x128xbf16>, vector<128x128xbf16>, vector<8x128xf32> -> vector<8x128xf32>
    %49 = arith.addf %34, %48 : vector<8x128xf32>
    %c2_59 = arith.constant 2 : index
    %c2_60 = arith.constant 2 : index
    %c0_61 = arith.constant 0 : index
    %c0_62 = arith.constant 0 : index
    %50 = vector.load %arg2[%c2_59, %c2_60, %c0_61, %c0_62] : memref<3x3x128x128xbf16, #tpu.memory_space<vmem>>, vector<1x1x128x128xbf16>
    %51 = vector.shape_cast %50 : vector<1x1x128x128xbf16> to vector<128x128xbf16>
    %cst_63 = arith.constant dense<0.000000e+00> : vector<8x128xf32>
    %52 = tpu.matmul %41, %51, %cst_63 {dimension_numbers = #tpu.dot_dimension_numbers<[1], [0], [0], [1], [0, 0, 1, 1], [], []>} : vector<8x128xbf16>, vector<128x128xbf16>, vector<8x128xf32> -> vector<8x128xf32>
    %53 = arith.addf %38, %52 : vector<8x128xf32>
    %54 = vector.shape_cast %45 : vector<8x128xf32> to vector<2x4x128xf32>
    %55 = vector.extract_strided_slice %54 {offsets = [0, 0, 0], sizes = [2, 2, 128], strides = [1, 1, 1]} : vector<2x4x128xf32> to vector<2x2x128xf32>
    %56 = vector.shape_cast %49 : vector<8x128xf32> to vector<2x4x128xf32>
    %57 = vector.extract_strided_slice %56 {offsets = [0, 1, 0], sizes = [2, 2, 128], strides = [1, 1, 1]} : vector<2x4x128xf32> to vector<2x2x128xf32>
    %58 = arith.addf %55, %57 : vector<2x2x128xf32>
    %59 = vector.shape_cast %53 : vector<8x128xf32> to vector<2x4x128xf32>
    %60 = vector.extract_strided_slice %59 {offsets = [0, 2, 0], sizes = [2, 2, 128], strides = [1, 1, 1]} : vector<2x4x128xf32> to vector<2x2x128xf32>
    %61 = arith.addf %58, %60 : vector<2x2x128xf32>
    %c0_64 = arith.constant 0 : index
    %c0_65 = arith.constant 0 : index
    %62 = vector.load %arg3[%c0_64, %c0_65] : memref<1x128xf32, #tpu.memory_space<vmem>>, vector<1x128xf32>
    %63 = vector.shape_cast %62 : vector<1x128xf32> to vector<1x1x128xf32>
    %64 = vector.broadcast %63 : vector<1x1x128xf32> to vector<2x2x128xf32>
    %65 = arith.addf %61, %64 : vector<2x2x128xf32>
    %c0_66 = arith.constant 0 : index
    %c0_67 = arith.constant 0 : index
    %66 = vector.load %arg4[%c0_66, %c0_67] : memref<1x128xf32, #tpu.memory_space<vmem>>, vector<1x128xf32>
    %cst_68 = arith.constant 0.000000e+00 : f32
    %67 = vector.broadcast %cst_68 : f32 to vector<2x2x128xf32>
    %68 = arith.cmpf ogt, %65, %67 : vector<2x2x128xf32>
    %69 = vector.shape_cast %66 : vector<1x128xf32> to vector<1x1x128xf32>
    %70 = vector.broadcast %69 : vector<1x1x128xf32> to vector<2x2x128xf32>
    %71 = arith.mulf %65, %70 : vector<2x2x128xf32>
    %72 = arith.select %68, %65, %71 : vector<2x2x128xi1>, vector<2x2x128xf32>
    %73 = arith.truncf %72 : vector<2x2x128xf32> to vector<2x2x128xbf16>
    %c0_69 = arith.constant 0 : index
    %c0_70 = arith.constant 0 : index
    %c0_71 = arith.constant 0 : index
    %c0_72 = arith.constant 0 : index
    %74 = vector.load %arg5[%c0_69, %c0_70, %c0_71, %c0_72] : memref<1x2x2x128xbf16, #tpu.memory_space<vmem>>, vector<1x2x2x128xbf16>
    %75 = vector.shape_cast %74 : vector<1x2x2x128xbf16> to vector<2x2x128xbf16>
    %76 = vector.shape_cast %73 : vector<2x2x128xbf16> to vector<1x2x2x128xbf16>
    tpu.vector_store %arg5[%c0_69, %c0_70, %c0_71, %c0_72], %76 {strides = array<i32>} : memref<1x2x2x128xbf16, #tpu.memory_space<vmem>>, vector<1x2x2x128xbf16>,
    return
  }
  func.func @transform_0(%arg0: i32) -> (i32, i32, i32, i32) {
    %c0_i32 = arith.constant 0 : i32
    %c0_i32_0 = arith.constant 0 : i32
    %c0_i32_1 = arith.constant 0 : i32
    %c0_i32_2 = arith.constant 0 : i32
    return %arg0, %c0_i32, %c0_i32_0, %c0_i32_1 : i32, i32, i32, i32
  }
  func.func @transform_1(%arg0: i32) -> (i32, i32, i32, i32) {
    %c0_i32 = arith.constant 0 : i32
    %c0_i32_0 = arith.constant 0 : i32
    %c0_i32_1 = arith.constant 0 : i32
    %c0_i32_2 = arith.constant 0 : i32
    %c0_i32_3 = arith.constant 0 : i32
    return %c0_i32, %c0_i32_0, %c0_i32_1, %c0_i32_2 : i32, i32, i32, i32
  }
  func.func @transform_2(%arg0: i32) -> (i32, i32) {
    %c0_i32 = arith.constant 0 : i32
    %c0_i32_0 = arith.constant 0 : i32
    %c0_i32_1 = arith.constant 0 : i32
    return %c0_i32, %c0_i32_0 : i32, i32
  }
  func.func @transform_3(%arg0: i32) -> (i32, i32) {
    %c0_i32 = arith.constant 0 : i32
    %c0_i32_0 = arith.constant 0 : i32
    %c0_i32_1 = arith.constant 0 : i32
    return %c0_i32, %c0_i32_0 : i32, i32
  }
  func.func @transform_4(%arg0: i32) -> (i32, i32, i32, i32) {
    %c0_i32 = arith.constant 0 : i32
    %c0_i32_0 = arith.constant 0 : i32
    %c0_i32_1 = arith.constant 0 : i32
    %c0_i32_2 = arith.constant 0 : i32
    return %arg0, %c0_i32, %c0_i32_0, %c0_i32_1 : i32, i32, i32, i32
  }
}

module attributes {stable_mosaic.version = 11 : i64} {
  func.func @_conv3x3_prelu_kernel(%arg0: i32, %arg1: memref<1x2x2x128xbf16, #tpu.memory_space<vmem>>, %arg2: memref<3x3x128x8xbf16, #tpu.memory_space<vmem>>, %arg3: memref<1x8xf32, #tpu.memory_space<vmem>>, %arg4: memref<1x8xf32, #tpu.memory_space<vmem>>, %arg5: memref<1x2x2x8xf32, #tpu.memory_space<vmem>>, %arg6: memref<4x4x128xf32, #tpu.memory_space<vmem>>) attributes {dimension_semantics = [#tpu.dimension_semantics<parallel>], iteration_bounds = array<i64: 2>, scalar_prefetch = 0 : i64, scratch_operands = 1 : i64, tpu.core_type = #tpu.core_type<tc>, window_params = [{transform_indices = @transform_0, window_bounds = array<i64: 1, 2, 2, 128>}, {pipeline_mode = #tpu.pipeline_mode<synchronous>, transform_indices = @transform_1, window_bounds = array<i64: 3, 3, 128, 8>}, {pipeline_mode = #tpu.pipeline_mode<synchronous>, transform_indices = @transform_2, window_bounds = array<i64: 1, 8>}, {pipeline_mode = #tpu.pipeline_mode<synchronous>, transform_indices = @transform_3, window_bounds = array<i64: 1, 8>}, {transform_indices = @transform_4, window_bounds = array<i64: 1, 2, 2, 8>}]} {
    %cst = arith.constant 0.000000e+00 : f32
    %0 = vector.broadcast %cst : f32 to vector<4x4x128xf32>
    %c0 = arith.constant 0 : index
    %c0_0 = arith.constant 0 : index
    %c0_1 = arith.constant 0 : index
    %1 = vector.load %arg6[%c0, %c0_0, %c0_1] : memref<4x4x128xf32, #tpu.memory_space<vmem>>, vector<4x4x128xf32>
    tpu.vector_store %arg6[%c0, %c0_0, %c0_1], %0 {strides = array<i32>} : memref<4x4x128xf32, #tpu.memory_space<vmem>>, vector<4x4x128xf32>,
    %c0_2 = arith.constant 0 : index
    %c0_3 = arith.constant 0 : index
    %c0_4 = arith.constant 0 : index
    %c0_5 = arith.constant 0 : index
    %2 = vector.load %arg1[%c0_2, %c0_3, %c0_4, %c0_5] : memref<1x2x2x128xbf16, #tpu.memory_space<vmem>>, vector<1x2x2x128xbf16>
    %3 = vector.shape_cast %2 : vector<1x2x2x128xbf16> to vector<2x2x128xbf16>
    %4 = arith.extf %3 : vector<2x2x128xbf16> to vector<2x2x128xf32>
    %c1 = arith.constant 1 : index
    %c1_6 = arith.constant 1 : index
    %c0_7 = arith.constant 0 : index
    %5 = vector.load %arg6[%c1, %c1_6, %c0_7] : memref<4x4x128xf32, #tpu.memory_space<vmem>>, vector<2x2x128xf32>
    tpu.vector_store %arg6[%c1, %c1_6, %c0_7], %4 {strides = array<i32>} : memref<4x4x128xf32, #tpu.memory_space<vmem>>, vector<2x2x128xf32>,
    %cst_8 = arith.constant 0.000000e+00 : f32
    %6 = vector.broadcast %cst_8 : f32 to vector<8x8xf32>
    %cst_9 = arith.constant 0.000000e+00 : f32
    %7 = vector.broadcast %cst_9 : f32 to vector<8x8xf32>
    %cst_10 = arith.constant 0.000000e+00 : f32
    %8 = vector.broadcast %cst_10 : f32 to vector<8x8xf32>
    %c0_11 = arith.constant 0 : index
    %c0_12 = arith.constant 0 : index
    %c0_13 = arith.constant 0 : index
    %9 = vector.load %arg6[%c0_11, %c0_12, %c0_13] : memref<4x4x128xf32, #tpu.memory_space<vmem>>, vector<2x4x128xf32>
    %10 = vector.shape_cast %9 : vector<2x4x128xf32> to vector<8x128xf32>
    %11 = arith.truncf %10 : vector<8x128xf32> to vector<8x128xbf16>
    %c0_14 = arith.constant 0 : index
    %c0_15 = arith.constant 0 : index
    %c0_16 = arith.constant 0 : index
    %c0_17 = arith.constant 0 : index
    %12 = vector.load %arg2[%c0_14, %c0_15, %c0_16, %c0_17] : memref<3x3x128x8xbf16, #tpu.memory_space<vmem>>, vector<1x1x128x8xbf16>
    %13 = vector.shape_cast %12 : vector<1x1x128x8xbf16> to vector<128x8xbf16>
    %cst_18 = arith.constant dense<0.000000e+00> : vector<8x8xf32>
    %14 = tpu.matmul %11, %13, %cst_18 {dimension_numbers = #tpu.dot_dimension_numbers<[1], [0], [0], [1], [0, 0, 1, 1], [], []>} : vector<8x128xbf16>, vector<128x8xbf16>, vector<8x8xf32> -> vector<8x8xf32>
    %15 = arith.addf %6, %14 : vector<8x8xf32>
    %c0_19 = arith.constant 0 : index
    %c1_20 = arith.constant 1 : index
    %c0_21 = arith.constant 0 : index
    %c0_22 = arith.constant 0 : index
    %16 = vector.load %arg2[%c0_19, %c1_20, %c0_21, %c0_22] : memref<3x3x128x8xbf16, #tpu.memory_space<vmem>>, vector<1x1x128x8xbf16>
    %17 = vector.shape_cast %16 : vector<1x1x128x8xbf16> to vector<128x8xbf16>
    %cst_23 = arith.constant dense<0.000000e+00> : vector<8x8xf32>
    %18 = tpu.matmul %11, %17, %cst_23 {dimension_numbers = #tpu.dot_dimension_numbers<[1], [0], [0], [1], [0, 0, 1, 1], [], []>} : vector<8x128xbf16>, vector<128x8xbf16>, vector<8x8xf32> -> vector<8x8xf32>
    %19 = arith.addf %7, %18 : vector<8x8xf32>
    %c0_24 = arith.constant 0 : index
    %c2 = arith.constant 2 : index
    %c0_25 = arith.constant 0 : index
    %c0_26 = arith.constant 0 : index
    %20 = vector.load %arg2[%c0_24, %c2, %c0_25, %c0_26] : memref<3x3x128x8xbf16, #tpu.memory_space<vmem>>, vector<1x1x128x8xbf16>
    %21 = vector.shape_cast %20 : vector<1x1x128x8xbf16> to vector<128x8xbf16>
    %cst_27 = arith.constant dense<0.000000e+00> : vector<8x8xf32>
    %22 = tpu.matmul %11, %21, %cst_27 {dimension_numbers = #tpu.dot_dimension_numbers<[1], [0], [0], [1], [0, 0, 1, 1], [], []>} : vector<8x128xbf16>, vector<128x8xbf16>, vector<8x8xf32> -> vector<8x8xf32>
    %23 = arith.addf %8, %22 : vector<8x8xf32>
    %c1_28 = arith.constant 1 : index
    %c0_29 = arith.constant 0 : index
    %c0_30 = arith.constant 0 : index
    %24 = vector.load %arg6[%c1_28, %c0_29, %c0_30] : memref<4x4x128xf32, #tpu.memory_space<vmem>>, vector<2x4x128xf32>
    %25 = vector.shape_cast %24 : vector<2x4x128xf32> to vector<8x128xf32>
    %26 = arith.truncf %25 : vector<8x128xf32> to vector<8x128xbf16>
    %c1_31 = arith.constant 1 : index
    %c0_32 = arith.constant 0 : index
    %c0_33 = arith.constant 0 : index
    %c0_34 = arith.constant 0 : index
    %27 = vector.load %arg2[%c1_31, %c0_32, %c0_33, %c0_34] : memref<3x3x128x8xbf16, #tpu.memory_space<vmem>>, vector<1x1x128x8xbf16>
    %28 = vector.shape_cast %27 : vector<1x1x128x8xbf16> to vector<128x8xbf16>
    %cst_35 = arith.constant dense<0.000000e+00> : vector<8x8xf32>
    %29 = tpu.matmul %26, %28, %cst_35 {dimension_numbers = #tpu.dot_dimension_numbers<[1], [0], [0], [1], [0, 0, 1, 1], [], []>} : vector<8x128xbf16>, vector<128x8xbf16>, vector<8x8xf32> -> vector<8x8xf32>
    %30 = arith.addf %15, %29 : vector<8x8xf32>
    %c1_36 = arith.constant 1 : index
    %c1_37 = arith.constant 1 : index
    %c0_38 = arith.constant 0 : index
    %c0_39 = arith.constant 0 : index
    %31 = vector.load %arg2[%c1_36, %c1_37, %c0_38, %c0_39] : memref<3x3x128x8xbf16, #tpu.memory_space<vmem>>, vector<1x1x128x8xbf16>
    %32 = vector.shape_cast %31 : vector<1x1x128x8xbf16> to vector<128x8xbf16>
    %cst_40 = arith.constant dense<0.000000e+00> : vector<8x8xf32>
    %33 = tpu.matmul %26, %32, %cst_40 {dimension_numbers = #tpu.dot_dimension_numbers<[1], [0], [0], [1], [0, 0, 1, 1], [], []>} : vector<8x128xbf16>, vector<128x8xbf16>, vector<8x8xf32> -> vector<8x8xf32>
    %34 = arith.addf %19, %33 : vector<8x8xf32>
    %c1_41 = arith.constant 1 : index
    %c2_42 = arith.constant 2 : index
    %c0_43 = arith.constant 0 : index
    %c0_44 = arith.constant 0 : index
    %35 = vector.load %arg2[%c1_41, %c2_42, %c0_43, %c0_44] : memref<3x3x128x8xbf16, #tpu.memory_space<vmem>>, vector<1x1x128x8xbf16>
    %36 = vector.shape_cast %35 : vector<1x1x128x8xbf16> to vector<128x8xbf16>
    %cst_45 = arith.constant dense<0.000000e+00> : vector<8x8xf32>
    %37 = tpu.matmul %26, %36, %cst_45 {dimension_numbers = #tpu.dot_dimension_numbers<[1], [0], [0], [1], [0, 0, 1, 1], [], []>} : vector<8x128xbf16>, vector<128x8xbf16>, vector<8x8xf32> -> vector<8x8xf32>
    %38 = arith.addf %23, %37 : vector<8x8xf32>
    %c2_46 = arith.constant 2 : index
    %c0_47 = arith.constant 0 : index
    %c0_48 = arith.constant 0 : index
    %39 = vector.load %arg6[%c2_46, %c0_47, %c0_48] : memref<4x4x128xf32, #tpu.memory_space<vmem>>, vector<2x4x128xf32>
    %40 = vector.shape_cast %39 : vector<2x4x128xf32> to vector<8x128xf32>
    %41 = arith.truncf %40 : vector<8x128xf32> to vector<8x128xbf16>
    %c2_49 = arith.constant 2 : index
    %c0_50 = arith.constant 0 : index
    %c0_51 = arith.constant 0 : index
    %c0_52 = arith.constant 0 : index
    %42 = vector.load %arg2[%c2_49, %c0_50, %c0_51, %c0_52] : memref<3x3x128x8xbf16, #tpu.memory_space<vmem>>, vector<1x1x128x8xbf16>
    %43 = vector.shape_cast %42 : vector<1x1x128x8xbf16> to vector<128x8xbf16>
    %cst_53 = arith.constant dense<0.000000e+00> : vector<8x8xf32>
    %44 = tpu.matmul %41, %43, %cst_53 {dimension_numbers = #tpu.dot_dimension_numbers<[1], [0], [0], [1], [0, 0, 1, 1], [], []>} : vector<8x128xbf16>, vector<128x8xbf16>, vector<8x8xf32> -> vector<8x8xf32>
    %45 = arith.addf %30, %44 : vector<8x8xf32>
    %c2_54 = arith.constant 2 : index
    %c1_55 = arith.constant 1 : index
    %c0_56 = arith.constant 0 : index
    %c0_57 = arith.constant 0 : index
    %46 = vector.load %arg2[%c2_54, %c1_55, %c0_56, %c0_57] : memref<3x3x128x8xbf16, #tpu.memory_space<vmem>>, vector<1x1x128x8xbf16>
    %47 = vector.shape_cast %46 : vector<1x1x128x8xbf16> to vector<128x8xbf16>
    %cst_58 = arith.constant dense<0.000000e+00> : vector<8x8xf32>
    %48 = tpu.matmul %41, %47, %cst_58 {dimension_numbers = #tpu.dot_dimension_numbers<[1], [0], [0], [1], [0, 0, 1, 1], [], []>} : vector<8x128xbf16>, vector<128x8xbf16>, vector<8x8xf32> -> vector<8x8xf32>
    %49 = arith.addf %34, %48 : vector<8x8xf32>
    %c2_59 = arith.constant 2 : index
    %c2_60 = arith.constant 2 : index
    %c0_61 = arith.constant 0 : index
    %c0_62 = arith.constant 0 : index
    %50 = vector.load %arg2[%c2_59, %c2_60, %c0_61, %c0_62] : memref<3x3x128x8xbf16, #tpu.memory_space<vmem>>, vector<1x1x128x8xbf16>
    %51 = vector.shape_cast %50 : vector<1x1x128x8xbf16> to vector<128x8xbf16>
    %cst_63 = arith.constant dense<0.000000e+00> : vector<8x8xf32>
    %52 = tpu.matmul %41, %51, %cst_63 {dimension_numbers = #tpu.dot_dimension_numbers<[1], [0], [0], [1], [0, 0, 1, 1], [], []>} : vector<8x128xbf16>, vector<128x8xbf16>, vector<8x8xf32> -> vector<8x8xf32>
    %53 = arith.addf %38, %52 : vector<8x8xf32>
    %54 = vector.shape_cast %45 : vector<8x8xf32> to vector<2x4x8xf32>
    %55 = vector.extract_strided_slice %54 {offsets = [0, 0, 0], sizes = [2, 2, 8], strides = [1, 1, 1]} : vector<2x4x8xf32> to vector<2x2x8xf32>
    %56 = vector.shape_cast %49 : vector<8x8xf32> to vector<2x4x8xf32>
    %57 = vector.extract_strided_slice %56 {offsets = [0, 1, 0], sizes = [2, 2, 8], strides = [1, 1, 1]} : vector<2x4x8xf32> to vector<2x2x8xf32>
    %58 = arith.addf %55, %57 : vector<2x2x8xf32>
    %59 = vector.shape_cast %53 : vector<8x8xf32> to vector<2x4x8xf32>
    %60 = vector.extract_strided_slice %59 {offsets = [0, 2, 0], sizes = [2, 2, 8], strides = [1, 1, 1]} : vector<2x4x8xf32> to vector<2x2x8xf32>
    %61 = arith.addf %58, %60 : vector<2x2x8xf32>
    %c0_64 = arith.constant 0 : index
    %c0_65 = arith.constant 0 : index
    %62 = vector.load %arg3[%c0_64, %c0_65] : memref<1x8xf32, #tpu.memory_space<vmem>>, vector<1x8xf32>
    %63 = vector.shape_cast %62 : vector<1x8xf32> to vector<1x1x8xf32>
    %64 = vector.broadcast %63 : vector<1x1x8xf32> to vector<2x2x8xf32>
    %65 = arith.addf %61, %64 : vector<2x2x8xf32>
    %c0_66 = arith.constant 0 : index
    %c0_67 = arith.constant 0 : index
    %66 = vector.load %arg4[%c0_66, %c0_67] : memref<1x8xf32, #tpu.memory_space<vmem>>, vector<1x8xf32>
    %cst_68 = arith.constant 0.000000e+00 : f32
    %67 = vector.broadcast %cst_68 : f32 to vector<2x2x8xf32>
    %68 = arith.cmpf ogt, %65, %67 : vector<2x2x8xf32>
    %69 = vector.shape_cast %66 : vector<1x8xf32> to vector<1x1x8xf32>
    %70 = vector.broadcast %69 : vector<1x1x8xf32> to vector<2x2x8xf32>
    %71 = arith.mulf %65, %70 : vector<2x2x8xf32>
    %72 = arith.select %68, %65, %71 : vector<2x2x8xi1>, vector<2x2x8xf32>
    %c0_69 = arith.constant 0 : index
    %c0_70 = arith.constant 0 : index
    %c0_71 = arith.constant 0 : index
    %c0_72 = arith.constant 0 : index
    %73 = vector.load %arg5[%c0_69, %c0_70, %c0_71, %c0_72] : memref<1x2x2x8xf32, #tpu.memory_space<vmem>>, vector<1x2x2x8xf32>
    %74 = vector.shape_cast %73 : vector<1x2x2x8xf32> to vector<2x2x8xf32>
    %75 = vector.shape_cast %72 : vector<2x2x8xf32> to vector<1x2x2x8xf32>
    tpu.vector_store %arg5[%c0_69, %c0_70, %c0_71, %c0_72], %75 {strides = array<i32>} : memref<1x2x2x8xf32, #tpu.memory_space<vmem>>, vector<1x2x2x8xf32>,
    return
  }
  func.func @transform_0(%arg0: i32) -> (i32, i32, i32, i32) {
    %c0_i32 = arith.constant 0 : i32
    %c0_i32_0 = arith.constant 0 : i32
    %c0_i32_1 = arith.constant 0 : i32
    %c0_i32_2 = arith.constant 0 : i32
    return %arg0, %c0_i32, %c0_i32_0, %c0_i32_1 : i32, i32, i32, i32
  }
  func.func @transform_1(%arg0: i32) -> (i32, i32, i32, i32) {
    %c0_i32 = arith.constant 0 : i32
    %c0_i32_0 = arith.constant 0 : i32
    %c0_i32_1 = arith.constant 0 : i32
    %c0_i32_2 = arith.constant 0 : i32
    %c0_i32_3 = arith.constant 0 : i32
    return %c0_i32, %c0_i32_0, %c0_i32_1, %c0_i32_2 : i32, i32, i32, i32
  }
  func.func @transform_2(%arg0: i32) -> (i32, i32) {
    %c0_i32 = arith.constant 0 : i32
    %c0_i32_0 = arith.constant 0 : i32
    %c0_i32_1 = arith.constant 0 : i32
    return %c0_i32, %c0_i32_0 : i32, i32
  }
  func.func @transform_3(%arg0: i32) -> (i32, i32) {
    %c0_i32 = arith.constant 0 : i32
    %c0_i32_0 = arith.constant 0 : i32
    %c0_i32_1 = arith.constant 0 : i32
    return %c0_i32, %c0_i32_0 : i32, i32
  }
  func.func @transform_4(%arg0: i32) -> (i32, i32, i32, i32) {
    %c0_i32 = arith.constant 0 : i32
    %c0_i32_0 = arith.constant 0 : i32
    %c0_i32_1 = arith.constant 0 : i32
    %c0_i32_2 = arith.constant 0 : i32
    return %arg0, %c0_i32, %c0_i32_0, %c0_i32_1 : i32, i32, i32, i32
  }
}

module attributes {stable_mosaic.version = 11 : i64} {
  func.func @_conv3x3_prelu_kernel(%arg0: i32, %arg1: memref<1x4x4x128xbf16, #tpu.memory_space<vmem>>, %arg2: memref<3x3x128x8xbf16, #tpu.memory_space<vmem>>, %arg3: memref<1x8xf32, #tpu.memory_space<vmem>>, %arg4: memref<1x8xf32, #tpu.memory_space<vmem>>, %arg5: memref<1x4x4x8xf32, #tpu.memory_space<vmem>>, %arg6: memref<6x6x128xf32, #tpu.memory_space<vmem>>) attributes {dimension_semantics = [#tpu.dimension_semantics<parallel>], iteration_bounds = array<i64: 2>, scalar_prefetch = 0 : i64, scratch_operands = 1 : i64, tpu.core_type = #tpu.core_type<tc>, window_params = [{transform_indices = @transform_0, window_bounds = array<i64: 1, 4, 4, 128>}, {pipeline_mode = #tpu.pipeline_mode<synchronous>, transform_indices = @transform_1, window_bounds = array<i64: 3, 3, 128, 8>}, {pipeline_mode = #tpu.pipeline_mode<synchronous>, transform_indices = @transform_2, window_bounds = array<i64: 1, 8>}, {pipeline_mode = #tpu.pipeline_mode<synchronous>, transform_indices = @transform_3, window_bounds = array<i64: 1, 8>}, {transform_indices = @transform_4, window_bounds = array<i64: 1, 4, 4, 8>}]} {
    %cst = arith.constant 0.000000e+00 : f32
    %0 = vector.broadcast %cst : f32 to vector<6x6x128xf32>
    %c0 = arith.constant 0 : index
    %c0_0 = arith.constant 0 : index
    %c0_1 = arith.constant 0 : index
    %1 = vector.load %arg6[%c0, %c0_0, %c0_1] : memref<6x6x128xf32, #tpu.memory_space<vmem>>, vector<6x6x128xf32>
    tpu.vector_store %arg6[%c0, %c0_0, %c0_1], %0 {strides = array<i32>} : memref<6x6x128xf32, #tpu.memory_space<vmem>>, vector<6x6x128xf32>,
    %c0_2 = arith.constant 0 : index
    %c0_3 = arith.constant 0 : index
    %c0_4 = arith.constant 0 : index
    %c0_5 = arith.constant 0 : index
    %2 = vector.load %arg1[%c0_2, %c0_3, %c0_4, %c0_5] : memref<1x4x4x128xbf16, #tpu.memory_space<vmem>>, vector<1x4x4x128xbf16>
    %3 = vector.shape_cast %2 : vector<1x4x4x128xbf16> to vector<4x4x128xbf16>
    %4 = arith.extf %3 : vector<4x4x128xbf16> to vector<4x4x128xf32>
    %c1 = arith.constant 1 : index
    %c1_6 = arith.constant 1 : index
    %c0_7 = arith.constant 0 : index
    %5 = vector.load %arg6[%c1, %c1_6, %c0_7] : memref<6x6x128xf32, #tpu.memory_space<vmem>>, vector<4x4x128xf32>
    tpu.vector_store %arg6[%c1, %c1_6, %c0_7], %4 {strides = array<i32>} : memref<6x6x128xf32, #tpu.memory_space<vmem>>, vector<4x4x128xf32>,
    %cst_8 = arith.constant 0.000000e+00 : f32
    %6 = vector.broadcast %cst_8 : f32 to vector<24x8xf32>
    %cst_9 = arith.constant 0.000000e+00 : f32
    %7 = vector.broadcast %cst_9 : f32 to vector<24x8xf32>
    %cst_10 = arith.constant 0.000000e+00 : f32
    %8 = vector.broadcast %cst_10 : f32 to vector<24x8xf32>
    %c0_11 = arith.constant 0 : index
    %c0_12 = arith.constant 0 : index
    %c0_13 = arith.constant 0 : index
    %9 = vector.load %arg6[%c0_11, %c0_12, %c0_13] : memref<6x6x128xf32, #tpu.memory_space<vmem>>, vector<4x6x128xf32>
    %10 = vector.shape_cast %9 : vector<4x6x128xf32> to vector<24x128xf32>
    %11 = arith.truncf %10 : vector<24x128xf32> to vector<24x128xbf16>
    %c0_14 = arith.constant 0 : index
    %c0_15 = arith.constant 0 : index
    %c0_16 = arith.constant 0 : index
    %c0_17 = arith.constant 0 : index
    %12 = vector.load %arg2[%c0_14, %c0_15, %c0_16, %c0_17] : memref<3x3x128x8xbf16, #tpu.memory_space<vmem>>, vector<1x1x128x8xbf16>
    %13 = vector.shape_cast %12 : vector<1x1x128x8xbf16> to vector<128x8xbf16>
    %cst_18 = arith.constant dense<0.000000e+00> : vector<24x8xf32>
    %14 = tpu.matmul %11, %13, %cst_18 {dimension_numbers = #tpu.dot_dimension_numbers<[1], [0], [0], [1], [0, 0, 1, 1], [], []>} : vector<24x128xbf16>, vector<128x8xbf16>, vector<24x8xf32> -> vector<24x8xf32>
    %15 = arith.addf %6, %14 : vector<24x8xf32>
    %c0_19 = arith.constant 0 : index
    %c1_20 = arith.constant 1 : index
    %c0_21 = arith.constant 0 : index
    %c0_22 = arith.constant 0 : index
    %16 = vector.load %arg2[%c0_19, %c1_20, %c0_21, %c0_22] : memref<3x3x128x8xbf16, #tpu.memory_space<vmem>>, vector<1x1x128x8xbf16>
    %17 = vector.shape_cast %16 : vector<1x1x128x8xbf16> to vector<128x8xbf16>
    %cst_23 = arith.constant dense<0.000000e+00> : vector<24x8xf32>
    %18 = tpu.matmul %11, %17, %cst_23 {dimension_numbers = #tpu.dot_dimension_numbers<[1], [0], [0], [1], [0, 0, 1, 1], [], []>} : vector<24x128xbf16>, vector<128x8xbf16>, vector<24x8xf32> -> vector<24x8xf32>
    %19 = arith.addf %7, %18 : vector<24x8xf32>
    %c0_24 = arith.constant 0 : index
    %c2 = arith.constant 2 : index
    %c0_25 = arith.constant 0 : index
    %c0_26 = arith.constant 0 : index
    %20 = vector.load %arg2[%c0_24, %c2, %c0_25, %c0_26] : memref<3x3x128x8xbf16, #tpu.memory_space<vmem>>, vector<1x1x128x8xbf16>
    %21 = vector.shape_cast %20 : vector<1x1x128x8xbf16> to vector<128x8xbf16>
    %cst_27 = arith.constant dense<0.000000e+00> : vector<24x8xf32>
    %22 = tpu.matmul %11, %21, %cst_27 {dimension_numbers = #tpu.dot_dimension_numbers<[1], [0], [0], [1], [0, 0, 1, 1], [], []>} : vector<24x128xbf16>, vector<128x8xbf16>, vector<24x8xf32> -> vector<24x8xf32>
    %23 = arith.addf %8, %22 : vector<24x8xf32>
    %c1_28 = arith.constant 1 : index
    %c0_29 = arith.constant 0 : index
    %c0_30 = arith.constant 0 : index
    %24 = vector.load %arg6[%c1_28, %c0_29, %c0_30] : memref<6x6x128xf32, #tpu.memory_space<vmem>>, vector<4x6x128xf32>
    %25 = vector.shape_cast %24 : vector<4x6x128xf32> to vector<24x128xf32>
    %26 = arith.truncf %25 : vector<24x128xf32> to vector<24x128xbf16>
    %c1_31 = arith.constant 1 : index
    %c0_32 = arith.constant 0 : index
    %c0_33 = arith.constant 0 : index
    %c0_34 = arith.constant 0 : index
    %27 = vector.load %arg2[%c1_31, %c0_32, %c0_33, %c0_34] : memref<3x3x128x8xbf16, #tpu.memory_space<vmem>>, vector<1x1x128x8xbf16>
    %28 = vector.shape_cast %27 : vector<1x1x128x8xbf16> to vector<128x8xbf16>
    %cst_35 = arith.constant dense<0.000000e+00> : vector<24x8xf32>
    %29 = tpu.matmul %26, %28, %cst_35 {dimension_numbers = #tpu.dot_dimension_numbers<[1], [0], [0], [1], [0, 0, 1, 1], [], []>} : vector<24x128xbf16>, vector<128x8xbf16>, vector<24x8xf32> -> vector<24x8xf32>
    %30 = arith.addf %15, %29 : vector<24x8xf32>
    %c1_36 = arith.constant 1 : index
    %c1_37 = arith.constant 1 : index
    %c0_38 = arith.constant 0 : index
    %c0_39 = arith.constant 0 : index
    %31 = vector.load %arg2[%c1_36, %c1_37, %c0_38, %c0_39] : memref<3x3x128x8xbf16, #tpu.memory_space<vmem>>, vector<1x1x128x8xbf16>
    %32 = vector.shape_cast %31 : vector<1x1x128x8xbf16> to vector<128x8xbf16>
    %cst_40 = arith.constant dense<0.000000e+00> : vector<24x8xf32>
    %33 = tpu.matmul %26, %32, %cst_40 {dimension_numbers = #tpu.dot_dimension_numbers<[1], [0], [0], [1], [0, 0, 1, 1], [], []>} : vector<24x128xbf16>, vector<128x8xbf16>, vector<24x8xf32> -> vector<24x8xf32>
    %34 = arith.addf %19, %33 : vector<24x8xf32>
    %c1_41 = arith.constant 1 : index
    %c2_42 = arith.constant 2 : index
    %c0_43 = arith.constant 0 : index
    %c0_44 = arith.constant 0 : index
    %35 = vector.load %arg2[%c1_41, %c2_42, %c0_43, %c0_44] : memref<3x3x128x8xbf16, #tpu.memory_space<vmem>>, vector<1x1x128x8xbf16>
    %36 = vector.shape_cast %35 : vector<1x1x128x8xbf16> to vector<128x8xbf16>
    %cst_45 = arith.constant dense<0.000000e+00> : vector<24x8xf32>
    %37 = tpu.matmul %26, %36, %cst_45 {dimension_numbers = #tpu.dot_dimension_numbers<[1], [0], [0], [1], [0, 0, 1, 1], [], []>} : vector<24x128xbf16>, vector<128x8xbf16>, vector<24x8xf32> -> vector<24x8xf32>
    %38 = arith.addf %23, %37 : vector<24x8xf32>
    %c2_46 = arith.constant 2 : index
    %c0_47 = arith.constant 0 : index
    %c0_48 = arith.constant 0 : index
    %39 = vector.load %arg6[%c2_46, %c0_47, %c0_48] : memref<6x6x128xf32, #tpu.memory_space<vmem>>, vector<4x6x128xf32>
    %40 = vector.shape_cast %39 : vector<4x6x128xf32> to vector<24x128xf32>
    %41 = arith.truncf %40 : vector<24x128xf32> to vector<24x128xbf16>
    %c2_49 = arith.constant 2 : index
    %c0_50 = arith.constant 0 : index
    %c0_51 = arith.constant 0 : index
    %c0_52 = arith.constant 0 : index
    %42 = vector.load %arg2[%c2_49, %c0_50, %c0_51, %c0_52] : memref<3x3x128x8xbf16, #tpu.memory_space<vmem>>, vector<1x1x128x8xbf16>
    %43 = vector.shape_cast %42 : vector<1x1x128x8xbf16> to vector<128x8xbf16>
    %cst_53 = arith.constant dense<0.000000e+00> : vector<24x8xf32>
    %44 = tpu.matmul %41, %43, %cst_53 {dimension_numbers = #tpu.dot_dimension_numbers<[1], [0], [0], [1], [0, 0, 1, 1], [], []>} : vector<24x128xbf16>, vector<128x8xbf16>, vector<24x8xf32> -> vector<24x8xf32>
    %45 = arith.addf %30, %44 : vector<24x8xf32>
    %c2_54 = arith.constant 2 : index
    %c1_55 = arith.constant 1 : index
    %c0_56 = arith.constant 0 : index
    %c0_57 = arith.constant 0 : index
    %46 = vector.load %arg2[%c2_54, %c1_55, %c0_56, %c0_57] : memref<3x3x128x8xbf16, #tpu.memory_space<vmem>>, vector<1x1x128x8xbf16>
    %47 = vector.shape_cast %46 : vector<1x1x128x8xbf16> to vector<128x8xbf16>
    %cst_58 = arith.constant dense<0.000000e+00> : vector<24x8xf32>
    %48 = tpu.matmul %41, %47, %cst_58 {dimension_numbers = #tpu.dot_dimension_numbers<[1], [0], [0], [1], [0, 0, 1, 1], [], []>} : vector<24x128xbf16>, vector<128x8xbf16>, vector<24x8xf32> -> vector<24x8xf32>
    %49 = arith.addf %34, %48 : vector<24x8xf32>
    %c2_59 = arith.constant 2 : index
    %c2_60 = arith.constant 2 : index
    %c0_61 = arith.constant 0 : index
    %c0_62 = arith.constant 0 : index
    %50 = vector.load %arg2[%c2_59, %c2_60, %c0_61, %c0_62] : memref<3x3x128x8xbf16, #tpu.memory_space<vmem>>, vector<1x1x128x8xbf16>
    %51 = vector.shape_cast %50 : vector<1x1x128x8xbf16> to vector<128x8xbf16>
    %cst_63 = arith.constant dense<0.000000e+00> : vector<24x8xf32>
    %52 = tpu.matmul %41, %51, %cst_63 {dimension_numbers = #tpu.dot_dimension_numbers<[1], [0], [0], [1], [0, 0, 1, 1], [], []>} : vector<24x128xbf16>, vector<128x8xbf16>, vector<24x8xf32> -> vector<24x8xf32>
    %53 = arith.addf %38, %52 : vector<24x8xf32>
    %54 = vector.shape_cast %45 : vector<24x8xf32> to vector<4x6x8xf32>
    %55 = vector.extract_strided_slice %54 {offsets = [0, 0, 0], sizes = [4, 4, 8], strides = [1, 1, 1]} : vector<4x6x8xf32> to vector<4x4x8xf32>
    %56 = vector.shape_cast %49 : vector<24x8xf32> to vector<4x6x8xf32>
    %57 = vector.extract_strided_slice %56 {offsets = [0, 1, 0], sizes = [4, 4, 8], strides = [1, 1, 1]} : vector<4x6x8xf32> to vector<4x4x8xf32>
    %58 = arith.addf %55, %57 : vector<4x4x8xf32>
    %59 = vector.shape_cast %53 : vector<24x8xf32> to vector<4x6x8xf32>
    %60 = vector.extract_strided_slice %59 {offsets = [0, 2, 0], sizes = [4, 4, 8], strides = [1, 1, 1]} : vector<4x6x8xf32> to vector<4x4x8xf32>
    %61 = arith.addf %58, %60 : vector<4x4x8xf32>
    %c0_64 = arith.constant 0 : index
    %c0_65 = arith.constant 0 : index
    %62 = vector.load %arg3[%c0_64, %c0_65] : memref<1x8xf32, #tpu.memory_space<vmem>>, vector<1x8xf32>
    %63 = vector.shape_cast %62 : vector<1x8xf32> to vector<1x1x8xf32>
    %64 = vector.broadcast %63 : vector<1x1x8xf32> to vector<4x4x8xf32>
    %65 = arith.addf %61, %64 : vector<4x4x8xf32>
    %c0_66 = arith.constant 0 : index
    %c0_67 = arith.constant 0 : index
    %66 = vector.load %arg4[%c0_66, %c0_67] : memref<1x8xf32, #tpu.memory_space<vmem>>, vector<1x8xf32>
    %cst_68 = arith.constant 0.000000e+00 : f32
    %67 = vector.broadcast %cst_68 : f32 to vector<4x4x8xf32>
    %68 = arith.cmpf ogt, %65, %67 : vector<4x4x8xf32>
    %69 = vector.shape_cast %66 : vector<1x8xf32> to vector<1x1x8xf32>
    %70 = vector.broadcast %69 : vector<1x1x8xf32> to vector<4x4x8xf32>
    %71 = arith.mulf %65, %70 : vector<4x4x8xf32>
    %72 = arith.select %68, %65, %71 : vector<4x4x8xi1>, vector<4x4x8xf32>
    %c0_69 = arith.constant 0 : index
    %c0_70 = arith.constant 0 : index
    %c0_71 = arith.constant 0 : index
    %c0_72 = arith.constant 0 : index
    %73 = vector.load %arg5[%c0_69, %c0_70, %c0_71, %c0_72] : memref<1x4x4x8xf32, #tpu.memory_space<vmem>>, vector<1x4x4x8xf32>
    %74 = vector.shape_cast %73 : vector<1x4x4x8xf32> to vector<4x4x8xf32>
    %75 = vector.shape_cast %72 : vector<4x4x8xf32> to vector<1x4x4x8xf32>
    tpu.vector_store %arg5[%c0_69, %c0_70, %c0_71, %c0_72], %75 {strides = array<i32>} : memref<1x4x4x8xf32, #tpu.memory_space<vmem>>, vector<1x4x4x8xf32>,
    return
  }
  func.func @transform_0(%arg0: i32) -> (i32, i32, i32, i32) {
    %c0_i32 = arith.constant 0 : i32
    %c0_i32_0 = arith.constant 0 : i32
    %c0_i32_1 = arith.constant 0 : i32
    %c0_i32_2 = arith.constant 0 : i32
    return %arg0, %c0_i32, %c0_i32_0, %c0_i32_1 : i32, i32, i32, i32
  }
  func.func @transform_1(%arg0: i32) -> (i32, i32, i32, i32) {
    %c0_i32 = arith.constant 0 : i32
    %c0_i32_0 = arith.constant 0 : i32
    %c0_i32_1 = arith.constant 0 : i32
    %c0_i32_2 = arith.constant 0 : i32
    %c0_i32_3 = arith.constant 0 : i32
    return %c0_i32, %c0_i32_0, %c0_i32_1, %c0_i32_2 : i32, i32, i32, i32
  }
  func.func @transform_2(%arg0: i32) -> (i32, i32) {
    %c0_i32 = arith.constant 0 : i32
    %c0_i32_0 = arith.constant 0 : i32
    %c0_i32_1 = arith.constant 0 : i32
    return %c0_i32, %c0_i32_0 : i32, i32
  }
  func.func @transform_3(%arg0: i32) -> (i32, i32) {
    %c0_i32 = arith.constant 0 : i32
    %c0_i32_0 = arith.constant 0 : i32
    %c0_i32_1 = arith.constant 0 : i32
    return %c0_i32, %c0_i32_0 : i32, i32
  }
  func.func @transform_4(%arg0: i32) -> (i32, i32, i32, i32) {
    %c0_i32 = arith.constant 0 : i32
    %c0_i32_0 = arith.constant 0 : i32
    %c0_i32_1 = arith.constant 0 : i32
    %c0_i32_2 = arith.constant 0 : i32
    return %arg0, %c0_i32, %c0_i32_0, %c0_i32_1 : i32, i32, i32, i32
  }
}

module attributes {stable_mosaic.version = 11 : i64} {
  func.func @_conv3x3_prelu_kernel(%arg0: i32, %arg1: memref<1x4x4x128xbf16, #tpu.memory_space<vmem>>, %arg2: memref<3x3x128x128xbf16, #tpu.memory_space<vmem>>, %arg3: memref<1x128xf32, #tpu.memory_space<vmem>>, %arg4: memref<1x128xf32, #tpu.memory_space<vmem>>, %arg5: memref<1x4x4x128xbf16, #tpu.memory_space<vmem>>, %arg6: memref<6x6x128xf32, #tpu.memory_space<vmem>>) attributes {dimension_semantics = [#tpu.dimension_semantics<parallel>], iteration_bounds = array<i64: 2>, scalar_prefetch = 0 : i64, scratch_operands = 1 : i64, tpu.core_type = #tpu.core_type<tc>, window_params = [{transform_indices = @transform_0, window_bounds = array<i64: 1, 4, 4, 128>}, {pipeline_mode = #tpu.pipeline_mode<synchronous>, transform_indices = @transform_1, window_bounds = array<i64: 3, 3, 128, 128>}, {pipeline_mode = #tpu.pipeline_mode<synchronous>, transform_indices = @transform_2, window_bounds = array<i64: 1, 128>}, {pipeline_mode = #tpu.pipeline_mode<synchronous>, transform_indices = @transform_3, window_bounds = array<i64: 1, 128>}, {transform_indices = @transform_4, window_bounds = array<i64: 1, 4, 4, 128>}]} {
    %cst = arith.constant 0.000000e+00 : f32
    %0 = vector.broadcast %cst : f32 to vector<6x6x128xf32>
    %c0 = arith.constant 0 : index
    %c0_0 = arith.constant 0 : index
    %c0_1 = arith.constant 0 : index
    %1 = vector.load %arg6[%c0, %c0_0, %c0_1] : memref<6x6x128xf32, #tpu.memory_space<vmem>>, vector<6x6x128xf32>
    tpu.vector_store %arg6[%c0, %c0_0, %c0_1], %0 {strides = array<i32>} : memref<6x6x128xf32, #tpu.memory_space<vmem>>, vector<6x6x128xf32>,
    %c0_2 = arith.constant 0 : index
    %c0_3 = arith.constant 0 : index
    %c0_4 = arith.constant 0 : index
    %c0_5 = arith.constant 0 : index
    %2 = vector.load %arg1[%c0_2, %c0_3, %c0_4, %c0_5] : memref<1x4x4x128xbf16, #tpu.memory_space<vmem>>, vector<1x4x4x128xbf16>
    %3 = vector.shape_cast %2 : vector<1x4x4x128xbf16> to vector<4x4x128xbf16>
    %4 = arith.extf %3 : vector<4x4x128xbf16> to vector<4x4x128xf32>
    %c1 = arith.constant 1 : index
    %c1_6 = arith.constant 1 : index
    %c0_7 = arith.constant 0 : index
    %5 = vector.load %arg6[%c1, %c1_6, %c0_7] : memref<6x6x128xf32, #tpu.memory_space<vmem>>, vector<4x4x128xf32>
    tpu.vector_store %arg6[%c1, %c1_6, %c0_7], %4 {strides = array<i32>} : memref<6x6x128xf32, #tpu.memory_space<vmem>>, vector<4x4x128xf32>,
    %cst_8 = arith.constant 0.000000e+00 : f32
    %6 = vector.broadcast %cst_8 : f32 to vector<24x128xf32>
    %cst_9 = arith.constant 0.000000e+00 : f32
    %7 = vector.broadcast %cst_9 : f32 to vector<24x128xf32>
    %cst_10 = arith.constant 0.000000e+00 : f32
    %8 = vector.broadcast %cst_10 : f32 to vector<24x128xf32>
    %c0_11 = arith.constant 0 : index
    %c0_12 = arith.constant 0 : index
    %c0_13 = arith.constant 0 : index
    %9 = vector.load %arg6[%c0_11, %c0_12, %c0_13] : memref<6x6x128xf32, #tpu.memory_space<vmem>>, vector<4x6x128xf32>
    %10 = vector.shape_cast %9 : vector<4x6x128xf32> to vector<24x128xf32>
    %11 = arith.truncf %10 : vector<24x128xf32> to vector<24x128xbf16>
    %c0_14 = arith.constant 0 : index
    %c0_15 = arith.constant 0 : index
    %c0_16 = arith.constant 0 : index
    %c0_17 = arith.constant 0 : index
    %12 = vector.load %arg2[%c0_14, %c0_15, %c0_16, %c0_17] : memref<3x3x128x128xbf16, #tpu.memory_space<vmem>>, vector<1x1x128x128xbf16>
    %13 = vector.shape_cast %12 : vector<1x1x128x128xbf16> to vector<128x128xbf16>
    %cst_18 = arith.constant dense<0.000000e+00> : vector<24x128xf32>
    %14 = tpu.matmul %11, %13, %cst_18 {dimension_numbers = #tpu.dot_dimension_numbers<[1], [0], [0], [1], [0, 0, 1, 1], [], []>} : vector<24x128xbf16>, vector<128x128xbf16>, vector<24x128xf32> -> vector<24x128xf32>
    %15 = arith.addf %6, %14 : vector<24x128xf32>
    %c0_19 = arith.constant 0 : index
    %c1_20 = arith.constant 1 : index
    %c0_21 = arith.constant 0 : index
    %c0_22 = arith.constant 0 : index
    %16 = vector.load %arg2[%c0_19, %c1_20, %c0_21, %c0_22] : memref<3x3x128x128xbf16, #tpu.memory_space<vmem>>, vector<1x1x128x128xbf16>
    %17 = vector.shape_cast %16 : vector<1x1x128x128xbf16> to vector<128x128xbf16>
    %cst_23 = arith.constant dense<0.000000e+00> : vector<24x128xf32>
    %18 = tpu.matmul %11, %17, %cst_23 {dimension_numbers = #tpu.dot_dimension_numbers<[1], [0], [0], [1], [0, 0, 1, 1], [], []>} : vector<24x128xbf16>, vector<128x128xbf16>, vector<24x128xf32> -> vector<24x128xf32>
    %19 = arith.addf %7, %18 : vector<24x128xf32>
    %c0_24 = arith.constant 0 : index
    %c2 = arith.constant 2 : index
    %c0_25 = arith.constant 0 : index
    %c0_26 = arith.constant 0 : index
    %20 = vector.load %arg2[%c0_24, %c2, %c0_25, %c0_26] : memref<3x3x128x128xbf16, #tpu.memory_space<vmem>>, vector<1x1x128x128xbf16>
    %21 = vector.shape_cast %20 : vector<1x1x128x128xbf16> to vector<128x128xbf16>
    %cst_27 = arith.constant dense<0.000000e+00> : vector<24x128xf32>
    %22 = tpu.matmul %11, %21, %cst_27 {dimension_numbers = #tpu.dot_dimension_numbers<[1], [0], [0], [1], [0, 0, 1, 1], [], []>} : vector<24x128xbf16>, vector<128x128xbf16>, vector<24x128xf32> -> vector<24x128xf32>
    %23 = arith.addf %8, %22 : vector<24x128xf32>
    %c1_28 = arith.constant 1 : index
    %c0_29 = arith.constant 0 : index
    %c0_30 = arith.constant 0 : index
    %24 = vector.load %arg6[%c1_28, %c0_29, %c0_30] : memref<6x6x128xf32, #tpu.memory_space<vmem>>, vector<4x6x128xf32>
    %25 = vector.shape_cast %24 : vector<4x6x128xf32> to vector<24x128xf32>
    %26 = arith.truncf %25 : vector<24x128xf32> to vector<24x128xbf16>
    %c1_31 = arith.constant 1 : index
    %c0_32 = arith.constant 0 : index
    %c0_33 = arith.constant 0 : index
    %c0_34 = arith.constant 0 : index
    %27 = vector.load %arg2[%c1_31, %c0_32, %c0_33, %c0_34] : memref<3x3x128x128xbf16, #tpu.memory_space<vmem>>, vector<1x1x128x128xbf16>
    %28 = vector.shape_cast %27 : vector<1x1x128x128xbf16> to vector<128x128xbf16>
    %cst_35 = arith.constant dense<0.000000e+00> : vector<24x128xf32>
    %29 = tpu.matmul %26, %28, %cst_35 {dimension_numbers = #tpu.dot_dimension_numbers<[1], [0], [0], [1], [0, 0, 1, 1], [], []>} : vector<24x128xbf16>, vector<128x128xbf16>, vector<24x128xf32> -> vector<24x128xf32>
    %30 = arith.addf %15, %29 : vector<24x128xf32>
    %c1_36 = arith.constant 1 : index
    %c1_37 = arith.constant 1 : index
    %c0_38 = arith.constant 0 : index
    %c0_39 = arith.constant 0 : index
    %31 = vector.load %arg2[%c1_36, %c1_37, %c0_38, %c0_39] : memref<3x3x128x128xbf16, #tpu.memory_space<vmem>>, vector<1x1x128x128xbf16>
    %32 = vector.shape_cast %31 : vector<1x1x128x128xbf16> to vector<128x128xbf16>
    %cst_40 = arith.constant dense<0.000000e+00> : vector<24x128xf32>
    %33 = tpu.matmul %26, %32, %cst_40 {dimension_numbers = #tpu.dot_dimension_numbers<[1], [0], [0], [1], [0, 0, 1, 1], [], []>} : vector<24x128xbf16>, vector<128x128xbf16>, vector<24x128xf32> -> vector<24x128xf32>
    %34 = arith.addf %19, %33 : vector<24x128xf32>
    %c1_41 = arith.constant 1 : index
    %c2_42 = arith.constant 2 : index
    %c0_43 = arith.constant 0 : index
    %c0_44 = arith.constant 0 : index
    %35 = vector.load %arg2[%c1_41, %c2_42, %c0_43, %c0_44] : memref<3x3x128x128xbf16, #tpu.memory_space<vmem>>, vector<1x1x128x128xbf16>
    %36 = vector.shape_cast %35 : vector<1x1x128x128xbf16> to vector<128x128xbf16>
    %cst_45 = arith.constant dense<0.000000e+00> : vector<24x128xf32>
    %37 = tpu.matmul %26, %36, %cst_45 {dimension_numbers = #tpu.dot_dimension_numbers<[1], [0], [0], [1], [0, 0, 1, 1], [], []>} : vector<24x128xbf16>, vector<128x128xbf16>, vector<24x128xf32> -> vector<24x128xf32>
    %38 = arith.addf %23, %37 : vector<24x128xf32>
    %c2_46 = arith.constant 2 : index
    %c0_47 = arith.constant 0 : index
    %c0_48 = arith.constant 0 : index
    %39 = vector.load %arg6[%c2_46, %c0_47, %c0_48] : memref<6x6x128xf32, #tpu.memory_space<vmem>>, vector<4x6x128xf32>
    %40 = vector.shape_cast %39 : vector<4x6x128xf32> to vector<24x128xf32>
    %41 = arith.truncf %40 : vector<24x128xf32> to vector<24x128xbf16>
    %c2_49 = arith.constant 2 : index
    %c0_50 = arith.constant 0 : index
    %c0_51 = arith.constant 0 : index
    %c0_52 = arith.constant 0 : index
    %42 = vector.load %arg2[%c2_49, %c0_50, %c0_51, %c0_52] : memref<3x3x128x128xbf16, #tpu.memory_space<vmem>>, vector<1x1x128x128xbf16>
    %43 = vector.shape_cast %42 : vector<1x1x128x128xbf16> to vector<128x128xbf16>
    %cst_53 = arith.constant dense<0.000000e+00> : vector<24x128xf32>
    %44 = tpu.matmul %41, %43, %cst_53 {dimension_numbers = #tpu.dot_dimension_numbers<[1], [0], [0], [1], [0, 0, 1, 1], [], []>} : vector<24x128xbf16>, vector<128x128xbf16>, vector<24x128xf32> -> vector<24x128xf32>
    %45 = arith.addf %30, %44 : vector<24x128xf32>
    %c2_54 = arith.constant 2 : index
    %c1_55 = arith.constant 1 : index
    %c0_56 = arith.constant 0 : index
    %c0_57 = arith.constant 0 : index
    %46 = vector.load %arg2[%c2_54, %c1_55, %c0_56, %c0_57] : memref<3x3x128x128xbf16, #tpu.memory_space<vmem>>, vector<1x1x128x128xbf16>
    %47 = vector.shape_cast %46 : vector<1x1x128x128xbf16> to vector<128x128xbf16>
    %cst_58 = arith.constant dense<0.000000e+00> : vector<24x128xf32>
    %48 = tpu.matmul %41, %47, %cst_58 {dimension_numbers = #tpu.dot_dimension_numbers<[1], [0], [0], [1], [0, 0, 1, 1], [], []>} : vector<24x128xbf16>, vector<128x128xbf16>, vector<24x128xf32> -> vector<24x128xf32>
    %49 = arith.addf %34, %48 : vector<24x128xf32>
    %c2_59 = arith.constant 2 : index
    %c2_60 = arith.constant 2 : index
    %c0_61 = arith.constant 0 : index
    %c0_62 = arith.constant 0 : index
    %50 = vector.load %arg2[%c2_59, %c2_60, %c0_61, %c0_62] : memref<3x3x128x128xbf16, #tpu.memory_space<vmem>>, vector<1x1x128x128xbf16>
    %51 = vector.shape_cast %50 : vector<1x1x128x128xbf16> to vector<128x128xbf16>
    %cst_63 = arith.constant dense<0.000000e+00> : vector<24x128xf32>
    %52 = tpu.matmul %41, %51, %cst_63 {dimension_numbers = #tpu.dot_dimension_numbers<[1], [0], [0], [1], [0, 0, 1, 1], [], []>} : vector<24x128xbf16>, vector<128x128xbf16>, vector<24x128xf32> -> vector<24x128xf32>
    %53 = arith.addf %38, %52 : vector<24x128xf32>
    %54 = vector.shape_cast %45 : vector<24x128xf32> to vector<4x6x128xf32>
    %55 = vector.extract_strided_slice %54 {offsets = [0, 0, 0], sizes = [4, 4, 128], strides = [1, 1, 1]} : vector<4x6x128xf32> to vector<4x4x128xf32>
    %56 = vector.shape_cast %49 : vector<24x128xf32> to vector<4x6x128xf32>
    %57 = vector.extract_strided_slice %56 {offsets = [0, 1, 0], sizes = [4, 4, 128], strides = [1, 1, 1]} : vector<4x6x128xf32> to vector<4x4x128xf32>
    %58 = arith.addf %55, %57 : vector<4x4x128xf32>
    %59 = vector.shape_cast %53 : vector<24x128xf32> to vector<4x6x128xf32>
    %60 = vector.extract_strided_slice %59 {offsets = [0, 2, 0], sizes = [4, 4, 128], strides = [1, 1, 1]} : vector<4x6x128xf32> to vector<4x4x128xf32>
    %61 = arith.addf %58, %60 : vector<4x4x128xf32>
    %c0_64 = arith.constant 0 : index
    %c0_65 = arith.constant 0 : index
    %62 = vector.load %arg3[%c0_64, %c0_65] : memref<1x128xf32, #tpu.memory_space<vmem>>, vector<1x128xf32>
    %63 = vector.shape_cast %62 : vector<1x128xf32> to vector<1x1x128xf32>
    %64 = vector.broadcast %63 : vector<1x1x128xf32> to vector<4x4x128xf32>
    %65 = arith.addf %61, %64 : vector<4x4x128xf32>
    %c0_66 = arith.constant 0 : index
    %c0_67 = arith.constant 0 : index
    %66 = vector.load %arg4[%c0_66, %c0_67] : memref<1x128xf32, #tpu.memory_space<vmem>>, vector<1x128xf32>
    %cst_68 = arith.constant 0.000000e+00 : f32
    %67 = vector.broadcast %cst_68 : f32 to vector<4x4x128xf32>
    %68 = arith.cmpf ogt, %65, %67 : vector<4x4x128xf32>
    %69 = vector.shape_cast %66 : vector<1x128xf32> to vector<1x1x128xf32>
    %70 = vector.broadcast %69 : vector<1x1x128xf32> to vector<4x4x128xf32>
    %71 = arith.mulf %65, %70 : vector<4x4x128xf32>
    %72 = arith.select %68, %65, %71 : vector<4x4x128xi1>, vector<4x4x128xf32>
    %73 = arith.truncf %72 : vector<4x4x128xf32> to vector<4x4x128xbf16>
    %c0_69 = arith.constant 0 : index
    %c0_70 = arith.constant 0 : index
    %c0_71 = arith.constant 0 : index
    %c0_72 = arith.constant 0 : index
    %74 = vector.load %arg5[%c0_69, %c0_70, %c0_71, %c0_72] : memref<1x4x4x128xbf16, #tpu.memory_space<vmem>>, vector<1x4x4x128xbf16>
    %75 = vector.shape_cast %74 : vector<1x4x4x128xbf16> to vector<4x4x128xbf16>
    %76 = vector.shape_cast %73 : vector<4x4x128xbf16> to vector<1x4x4x128xbf16>
    tpu.vector_store %arg5[%c0_69, %c0_70, %c0_71, %c0_72], %76 {strides = array<i32>} : memref<1x4x4x128xbf16, #tpu.memory_space<vmem>>, vector<1x4x4x128xbf16>,
    return
  }
  func.func @transform_0(%arg0: i32) -> (i32, i32, i32, i32) {
    %c0_i32 = arith.constant 0 : i32
    %c0_i32_0 = arith.constant 0 : i32
    %c0_i32_1 = arith.constant 0 : i32
    %c0_i32_2 = arith.constant 0 : i32
    return %arg0, %c0_i32, %c0_i32_0, %c0_i32_1 : i32, i32, i32, i32
  }
  func.func @transform_1(%arg0: i32) -> (i32, i32, i32, i32) {
    %c0_i32 = arith.constant 0 : i32
    %c0_i32_0 = arith.constant 0 : i32
    %c0_i32_1 = arith.constant 0 : i32
    %c0_i32_2 = arith.constant 0 : i32
    %c0_i32_3 = arith.constant 0 : i32
    return %c0_i32, %c0_i32_0, %c0_i32_1, %c0_i32_2 : i32, i32, i32, i32
  }
  func.func @transform_2(%arg0: i32) -> (i32, i32) {
    %c0_i32 = arith.constant 0 : i32
    %c0_i32_0 = arith.constant 0 : i32
    %c0_i32_1 = arith.constant 0 : i32
    return %c0_i32, %c0_i32_0 : i32, i32
  }
  func.func @transform_3(%arg0: i32) -> (i32, i32) {
    %c0_i32 = arith.constant 0 : i32
    %c0_i32_0 = arith.constant 0 : i32
    %c0_i32_1 = arith.constant 0 : i32
    return %c0_i32, %c0_i32_0 : i32, i32
  }
  func.func @transform_4(%arg0: i32) -> (i32, i32, i32, i32) {
    %c0_i32 = arith.constant 0 : i32
    %c0_i32_0 = arith.constant 0 : i32
    %c0_i32_1 = arith.constant 0 : i32
    %c0_i32_2 = arith.constant 0 : i32
    return %arg0, %c0_i32, %c0_i32_0, %c0_i32_1 : i32, i32, i32, i32
  }
}

module attributes {stable_mosaic.version = 11 : i64} {
  func.func @_conv3x3_prelu_kernel(%arg0: i32, %arg1: memref<1x4x4x40xbf16, #tpu.memory_space<vmem>>, %arg2: memref<3x3x40x128xbf16, #tpu.memory_space<vmem>>, %arg3: memref<1x128xf32, #tpu.memory_space<vmem>>, %arg4: memref<1x128xf32, #tpu.memory_space<vmem>>, %arg5: memref<1x4x4x128xbf16, #tpu.memory_space<vmem>>, %arg6: memref<6x6x40xf32, #tpu.memory_space<vmem>>) attributes {dimension_semantics = [#tpu.dimension_semantics<parallel>], iteration_bounds = array<i64: 2>, scalar_prefetch = 0 : i64, scratch_operands = 1 : i64, tpu.core_type = #tpu.core_type<tc>, window_params = [{transform_indices = @transform_0, window_bounds = array<i64: 1, 4, 4, 40>}, {pipeline_mode = #tpu.pipeline_mode<synchronous>, transform_indices = @transform_1, window_bounds = array<i64: 3, 3, 40, 128>}, {pipeline_mode = #tpu.pipeline_mode<synchronous>, transform_indices = @transform_2, window_bounds = array<i64: 1, 128>}, {pipeline_mode = #tpu.pipeline_mode<synchronous>, transform_indices = @transform_3, window_bounds = array<i64: 1, 128>}, {transform_indices = @transform_4, window_bounds = array<i64: 1, 4, 4, 128>}]} {
    %cst = arith.constant 0.000000e+00 : f32
    %0 = vector.broadcast %cst : f32 to vector<6x6x40xf32>
    %c0 = arith.constant 0 : index
    %c0_0 = arith.constant 0 : index
    %c0_1 = arith.constant 0 : index
    %1 = vector.load %arg6[%c0, %c0_0, %c0_1] : memref<6x6x40xf32, #tpu.memory_space<vmem>>, vector<6x6x40xf32>
    tpu.vector_store %arg6[%c0, %c0_0, %c0_1], %0 {strides = array<i32>} : memref<6x6x40xf32, #tpu.memory_space<vmem>>, vector<6x6x40xf32>,
    %c0_2 = arith.constant 0 : index
    %c0_3 = arith.constant 0 : index
    %c0_4 = arith.constant 0 : index
    %c0_5 = arith.constant 0 : index
    %2 = vector.load %arg1[%c0_2, %c0_3, %c0_4, %c0_5] : memref<1x4x4x40xbf16, #tpu.memory_space<vmem>>, vector<1x4x4x40xbf16>
    %3 = vector.shape_cast %2 : vector<1x4x4x40xbf16> to vector<4x4x40xbf16>
    %4 = arith.extf %3 : vector<4x4x40xbf16> to vector<4x4x40xf32>
    %c1 = arith.constant 1 : index
    %c1_6 = arith.constant 1 : index
    %c0_7 = arith.constant 0 : index
    %5 = vector.load %arg6[%c1, %c1_6, %c0_7] : memref<6x6x40xf32, #tpu.memory_space<vmem>>, vector<4x4x40xf32>
    tpu.vector_store %arg6[%c1, %c1_6, %c0_7], %4 {strides = array<i32>} : memref<6x6x40xf32, #tpu.memory_space<vmem>>, vector<4x4x40xf32>,
    %cst_8 = arith.constant 0.000000e+00 : f32
    %6 = vector.broadcast %cst_8 : f32 to vector<24x128xf32>
    %cst_9 = arith.constant 0.000000e+00 : f32
    %7 = vector.broadcast %cst_9 : f32 to vector<24x128xf32>
    %cst_10 = arith.constant 0.000000e+00 : f32
    %8 = vector.broadcast %cst_10 : f32 to vector<24x128xf32>
    %c0_11 = arith.constant 0 : index
    %c0_12 = arith.constant 0 : index
    %c0_13 = arith.constant 0 : index
    %9 = vector.load %arg6[%c0_11, %c0_12, %c0_13] : memref<6x6x40xf32, #tpu.memory_space<vmem>>, vector<4x6x40xf32>
    %10 = vector.shape_cast %9 : vector<4x6x40xf32> to vector<24x40xf32>
    %11 = arith.truncf %10 : vector<24x40xf32> to vector<24x40xbf16>
    %c0_14 = arith.constant 0 : index
    %c0_15 = arith.constant 0 : index
    %c0_16 = arith.constant 0 : index
    %c0_17 = arith.constant 0 : index
    %12 = vector.load %arg2[%c0_14, %c0_15, %c0_16, %c0_17] : memref<3x3x40x128xbf16, #tpu.memory_space<vmem>>, vector<1x1x40x128xbf16>
    %13 = vector.shape_cast %12 : vector<1x1x40x128xbf16> to vector<40x128xbf16>
    %cst_18 = arith.constant dense<0.000000e+00> : vector<24x128xf32>
    %14 = tpu.matmul %11, %13, %cst_18 {dimension_numbers = #tpu.dot_dimension_numbers<[1], [0], [0], [1], [0, 0, 1, 1], [], []>} : vector<24x40xbf16>, vector<40x128xbf16>, vector<24x128xf32> -> vector<24x128xf32>
    %15 = arith.addf %6, %14 : vector<24x128xf32>
    %c0_19 = arith.constant 0 : index
    %c1_20 = arith.constant 1 : index
    %c0_21 = arith.constant 0 : index
    %c0_22 = arith.constant 0 : index
    %16 = vector.load %arg2[%c0_19, %c1_20, %c0_21, %c0_22] : memref<3x3x40x128xbf16, #tpu.memory_space<vmem>>, vector<1x1x40x128xbf16>
    %17 = vector.shape_cast %16 : vector<1x1x40x128xbf16> to vector<40x128xbf16>
    %cst_23 = arith.constant dense<0.000000e+00> : vector<24x128xf32>
    %18 = tpu.matmul %11, %17, %cst_23 {dimension_numbers = #tpu.dot_dimension_numbers<[1], [0], [0], [1], [0, 0, 1, 1], [], []>} : vector<24x40xbf16>, vector<40x128xbf16>, vector<24x128xf32> -> vector<24x128xf32>
    %19 = arith.addf %7, %18 : vector<24x128xf32>
    %c0_24 = arith.constant 0 : index
    %c2 = arith.constant 2 : index
    %c0_25 = arith.constant 0 : index
    %c0_26 = arith.constant 0 : index
    %20 = vector.load %arg2[%c0_24, %c2, %c0_25, %c0_26] : memref<3x3x40x128xbf16, #tpu.memory_space<vmem>>, vector<1x1x40x128xbf16>
    %21 = vector.shape_cast %20 : vector<1x1x40x128xbf16> to vector<40x128xbf16>
    %cst_27 = arith.constant dense<0.000000e+00> : vector<24x128xf32>
    %22 = tpu.matmul %11, %21, %cst_27 {dimension_numbers = #tpu.dot_dimension_numbers<[1], [0], [0], [1], [0, 0, 1, 1], [], []>} : vector<24x40xbf16>, vector<40x128xbf16>, vector<24x128xf32> -> vector<24x128xf32>
    %23 = arith.addf %8, %22 : vector<24x128xf32>
    %c1_28 = arith.constant 1 : index
    %c0_29 = arith.constant 0 : index
    %c0_30 = arith.constant 0 : index
    %24 = vector.load %arg6[%c1_28, %c0_29, %c0_30] : memref<6x6x40xf32, #tpu.memory_space<vmem>>, vector<4x6x40xf32>
    %25 = vector.shape_cast %24 : vector<4x6x40xf32> to vector<24x40xf32>
    %26 = arith.truncf %25 : vector<24x40xf32> to vector<24x40xbf16>
    %c1_31 = arith.constant 1 : index
    %c0_32 = arith.constant 0 : index
    %c0_33 = arith.constant 0 : index
    %c0_34 = arith.constant 0 : index
    %27 = vector.load %arg2[%c1_31, %c0_32, %c0_33, %c0_34] : memref<3x3x40x128xbf16, #tpu.memory_space<vmem>>, vector<1x1x40x128xbf16>
    %28 = vector.shape_cast %27 : vector<1x1x40x128xbf16> to vector<40x128xbf16>
    %cst_35 = arith.constant dense<0.000000e+00> : vector<24x128xf32>
    %29 = tpu.matmul %26, %28, %cst_35 {dimension_numbers = #tpu.dot_dimension_numbers<[1], [0], [0], [1], [0, 0, 1, 1], [], []>} : vector<24x40xbf16>, vector<40x128xbf16>, vector<24x128xf32> -> vector<24x128xf32>
    %30 = arith.addf %15, %29 : vector<24x128xf32>
    %c1_36 = arith.constant 1 : index
    %c1_37 = arith.constant 1 : index
    %c0_38 = arith.constant 0 : index
    %c0_39 = arith.constant 0 : index
    %31 = vector.load %arg2[%c1_36, %c1_37, %c0_38, %c0_39] : memref<3x3x40x128xbf16, #tpu.memory_space<vmem>>, vector<1x1x40x128xbf16>
    %32 = vector.shape_cast %31 : vector<1x1x40x128xbf16> to vector<40x128xbf16>
    %cst_40 = arith.constant dense<0.000000e+00> : vector<24x128xf32>
    %33 = tpu.matmul %26, %32, %cst_40 {dimension_numbers = #tpu.dot_dimension_numbers<[1], [0], [0], [1], [0, 0, 1, 1], [], []>} : vector<24x40xbf16>, vector<40x128xbf16>, vector<24x128xf32> -> vector<24x128xf32>
    %34 = arith.addf %19, %33 : vector<24x128xf32>
    %c1_41 = arith.constant 1 : index
    %c2_42 = arith.constant 2 : index
    %c0_43 = arith.constant 0 : index
    %c0_44 = arith.constant 0 : index
    %35 = vector.load %arg2[%c1_41, %c2_42, %c0_43, %c0_44] : memref<3x3x40x128xbf16, #tpu.memory_space<vmem>>, vector<1x1x40x128xbf16>
    %36 = vector.shape_cast %35 : vector<1x1x40x128xbf16> to vector<40x128xbf16>
    %cst_45 = arith.constant dense<0.000000e+00> : vector<24x128xf32>
    %37 = tpu.matmul %26, %36, %cst_45 {dimension_numbers = #tpu.dot_dimension_numbers<[1], [0], [0], [1], [0, 0, 1, 1], [], []>} : vector<24x40xbf16>, vector<40x128xbf16>, vector<24x128xf32> -> vector<24x128xf32>
    %38 = arith.addf %23, %37 : vector<24x128xf32>
    %c2_46 = arith.constant 2 : index
    %c0_47 = arith.constant 0 : index
    %c0_48 = arith.constant 0 : index
    %39 = vector.load %arg6[%c2_46, %c0_47, %c0_48] : memref<6x6x40xf32, #tpu.memory_space<vmem>>, vector<4x6x40xf32>
    %40 = vector.shape_cast %39 : vector<4x6x40xf32> to vector<24x40xf32>
    %41 = arith.truncf %40 : vector<24x40xf32> to vector<24x40xbf16>
    %c2_49 = arith.constant 2 : index
    %c0_50 = arith.constant 0 : index
    %c0_51 = arith.constant 0 : index
    %c0_52 = arith.constant 0 : index
    %42 = vector.load %arg2[%c2_49, %c0_50, %c0_51, %c0_52] : memref<3x3x40x128xbf16, #tpu.memory_space<vmem>>, vector<1x1x40x128xbf16>
    %43 = vector.shape_cast %42 : vector<1x1x40x128xbf16> to vector<40x128xbf16>
    %cst_53 = arith.constant dense<0.000000e+00> : vector<24x128xf32>
    %44 = tpu.matmul %41, %43, %cst_53 {dimension_numbers = #tpu.dot_dimension_numbers<[1], [0], [0], [1], [0, 0, 1, 1], [], []>} : vector<24x40xbf16>, vector<40x128xbf16>, vector<24x128xf32> -> vector<24x128xf32>
    %45 = arith.addf %30, %44 : vector<24x128xf32>
    %c2_54 = arith.constant 2 : index
    %c1_55 = arith.constant 1 : index
    %c0_56 = arith.constant 0 : index
    %c0_57 = arith.constant 0 : index
    %46 = vector.load %arg2[%c2_54, %c1_55, %c0_56, %c0_57] : memref<3x3x40x128xbf16, #tpu.memory_space<vmem>>, vector<1x1x40x128xbf16>
    %47 = vector.shape_cast %46 : vector<1x1x40x128xbf16> to vector<40x128xbf16>
    %cst_58 = arith.constant dense<0.000000e+00> : vector<24x128xf32>
    %48 = tpu.matmul %41, %47, %cst_58 {dimension_numbers = #tpu.dot_dimension_numbers<[1], [0], [0], [1], [0, 0, 1, 1], [], []>} : vector<24x40xbf16>, vector<40x128xbf16>, vector<24x128xf32> -> vector<24x128xf32>
    %49 = arith.addf %34, %48 : vector<24x128xf32>
    %c2_59 = arith.constant 2 : index
    %c2_60 = arith.constant 2 : index
    %c0_61 = arith.constant 0 : index
    %c0_62 = arith.constant 0 : index
    %50 = vector.load %arg2[%c2_59, %c2_60, %c0_61, %c0_62] : memref<3x3x40x128xbf16, #tpu.memory_space<vmem>>, vector<1x1x40x128xbf16>
    %51 = vector.shape_cast %50 : vector<1x1x40x128xbf16> to vector<40x128xbf16>
    %cst_63 = arith.constant dense<0.000000e+00> : vector<24x128xf32>
    %52 = tpu.matmul %41, %51, %cst_63 {dimension_numbers = #tpu.dot_dimension_numbers<[1], [0], [0], [1], [0, 0, 1, 1], [], []>} : vector<24x40xbf16>, vector<40x128xbf16>, vector<24x128xf32> -> vector<24x128xf32>
    %53 = arith.addf %38, %52 : vector<24x128xf32>
    %54 = vector.shape_cast %45 : vector<24x128xf32> to vector<4x6x128xf32>
    %55 = vector.extract_strided_slice %54 {offsets = [0, 0, 0], sizes = [4, 4, 128], strides = [1, 1, 1]} : vector<4x6x128xf32> to vector<4x4x128xf32>
    %56 = vector.shape_cast %49 : vector<24x128xf32> to vector<4x6x128xf32>
    %57 = vector.extract_strided_slice %56 {offsets = [0, 1, 0], sizes = [4, 4, 128], strides = [1, 1, 1]} : vector<4x6x128xf32> to vector<4x4x128xf32>
    %58 = arith.addf %55, %57 : vector<4x4x128xf32>
    %59 = vector.shape_cast %53 : vector<24x128xf32> to vector<4x6x128xf32>
    %60 = vector.extract_strided_slice %59 {offsets = [0, 2, 0], sizes = [4, 4, 128], strides = [1, 1, 1]} : vector<4x6x128xf32> to vector<4x4x128xf32>
    %61 = arith.addf %58, %60 : vector<4x4x128xf32>
    %c0_64 = arith.constant 0 : index
    %c0_65 = arith.constant 0 : index
    %62 = vector.load %arg3[%c0_64, %c0_65] : memref<1x128xf32, #tpu.memory_space<vmem>>, vector<1x128xf32>
    %63 = vector.shape_cast %62 : vector<1x128xf32> to vector<1x1x128xf32>
    %64 = vector.broadcast %63 : vector<1x1x128xf32> to vector<4x4x128xf32>
    %65 = arith.addf %61, %64 : vector<4x4x128xf32>
    %c0_66 = arith.constant 0 : index
    %c0_67 = arith.constant 0 : index
    %66 = vector.load %arg4[%c0_66, %c0_67] : memref<1x128xf32, #tpu.memory_space<vmem>>, vector<1x128xf32>
    %cst_68 = arith.constant 0.000000e+00 : f32
    %67 = vector.broadcast %cst_68 : f32 to vector<4x4x128xf32>
    %68 = arith.cmpf ogt, %65, %67 : vector<4x4x128xf32>
    %69 = vector.shape_cast %66 : vector<1x128xf32> to vector<1x1x128xf32>
    %70 = vector.broadcast %69 : vector<1x1x128xf32> to vector<4x4x128xf32>
    %71 = arith.mulf %65, %70 : vector<4x4x128xf32>
    %72 = arith.select %68, %65, %71 : vector<4x4x128xi1>, vector<4x4x128xf32>
    %73 = arith.truncf %72 : vector<4x4x128xf32> to vector<4x4x128xbf16>
    %c0_69 = arith.constant 0 : index
    %c0_70 = arith.constant 0 : index
    %c0_71 = arith.constant 0 : index
    %c0_72 = arith.constant 0 : index
    %74 = vector.load %arg5[%c0_69, %c0_70, %c0_71, %c0_72] : memref<1x4x4x128xbf16, #tpu.memory_space<vmem>>, vector<1x4x4x128xbf16>
    %75 = vector.shape_cast %74 : vector<1x4x4x128xbf16> to vector<4x4x128xbf16>
    %76 = vector.shape_cast %73 : vector<4x4x128xbf16> to vector<1x4x4x128xbf16>
    tpu.vector_store %arg5[%c0_69, %c0_70, %c0_71, %c0_72], %76 {strides = array<i32>} : memref<1x4x4x128xbf16, #tpu.memory_space<vmem>>, vector<1x4x4x128xbf16>,
    return
  }
  func.func @transform_0(%arg0: i32) -> (i32, i32, i32, i32) {
    %c0_i32 = arith.constant 0 : i32
    %c0_i32_0 = arith.constant 0 : i32
    %c0_i32_1 = arith.constant 0 : i32
    %c0_i32_2 = arith.constant 0 : i32
    return %arg0, %c0_i32, %c0_i32_0, %c0_i32_1 : i32, i32, i32, i32
  }
  func.func @transform_1(%arg0: i32) -> (i32, i32, i32, i32) {
    %c0_i32 = arith.constant 0 : i32
    %c0_i32_0 = arith.constant 0 : i32
    %c0_i32_1 = arith.constant 0 : i32
    %c0_i32_2 = arith.constant 0 : i32
    %c0_i32_3 = arith.constant 0 : i32
    return %c0_i32, %c0_i32_0, %c0_i32_1, %c0_i32_2 : i32, i32, i32, i32
  }
  func.func @transform_2(%arg0: i32) -> (i32, i32) {
    %c0_i32 = arith.constant 0 : i32
    %c0_i32_0 = arith.constant 0 : i32
    %c0_i32_1 = arith.constant 0 : i32
    return %c0_i32, %c0_i32_0 : i32, i32
  }
  func.func @transform_3(%arg0: i32) -> (i32, i32) {
    %c0_i32 = arith.constant 0 : i32
    %c0_i32_0 = arith.constant 0 : i32
    %c0_i32_1 = arith.constant 0 : i32
    return %c0_i32, %c0_i32_0 : i32, i32
  }
  func.func @transform_4(%arg0: i32) -> (i32, i32, i32, i32) {
    %c0_i32 = arith.constant 0 : i32
    %c0_i32_0 = arith.constant 0 : i32
    %c0_i32_1 = arith.constant 0 : i32
    %c0_i32_2 = arith.constant 0 : i32
    return %arg0, %c0_i32, %c0_i32_0, %c0_i32_1 : i32, i32, i32, i32
  }
}

module attributes {stable_mosaic.version = 11 : i64} {
  func.func @_merge_kernel(%arg0: i32, %arg1: memref<1x3x256xf32, #tpu.memory_space<vmem>>, %arg2: memref<1x3x256xf32, #tpu.memory_space<vmem>>, %arg3: memref<1x1x256xf32, #tpu.memory_space<vmem>>, %arg4: memref<1x3x256xf32, #tpu.memory_space<vmem>>, %arg5: memref<1x1x256xf32, #tpu.memory_space<vmem>>) attributes {dimension_semantics = [#tpu.dimension_semantics<parallel>], iteration_bounds = array<i64: 2>, scalar_prefetch = 0 : i64, scratch_operands = 0 : i64, tpu.core_type = #tpu.core_type<tc>, window_params = [{transform_indices = @transform_0, window_bounds = array<i64: 1, 3, 256>}, {transform_indices = @transform_1, window_bounds = array<i64: 1, 3, 256>}, {transform_indices = @transform_2, window_bounds = array<i64: 1, 1, 256>}, {transform_indices = @transform_3, window_bounds = array<i64: 1, 3, 256>}, {transform_indices = @transform_4, window_bounds = array<i64: 1, 1, 256>}]} {
    %c0 = arith.constant 0 : index
    %c0_0 = arith.constant 0 : index
    %c0_1 = arith.constant 0 : index
    %0 = vector.load %arg3[%c0, %c0_0, %c0_1] : memref<1x1x256xf32, #tpu.memory_space<vmem>>, vector<1x1x256xf32>
    %1 = arith.negf %0 : vector<1x1x256xf32>
    %2 = math.exp %1 : vector<1x1x256xf32>
    %cst = arith.constant 1.000000e+00 : f32
    %3 = vector.broadcast %cst : f32 to vector<1x1x256xf32>
    %4 = arith.addf %3, %2 : vector<1x1x256xf32>
    %5 = arith.divf %3, %4 : vector<1x1x256xf32>
    %c0_2 = arith.constant 0 : index
    %c0_3 = arith.constant 0 : index
    %c0_4 = arith.constant 0 : index
    %6 = vector.load %arg5[%c0_2, %c0_3, %c0_4] : memref<1x1x256xf32, #tpu.memory_space<vmem>>, vector<1x1x256xf32>
    tpu.vector_store %arg5[%c0_2, %c0_3, %c0_4], %5 {strides = array<i32>} : memref<1x1x256xf32, #tpu.memory_space<vmem>>, vector<1x1x256xf32>,
    %c0_5 = arith.constant 0 : index
    %c0_6 = arith.constant 0 : index
    %c0_7 = arith.constant 0 : index
    %7 = vector.load %arg1[%c0_5, %c0_6, %c0_7] : memref<1x3x256xf32, #tpu.memory_space<vmem>>, vector<1x3x256xf32>
    %8 = vector.broadcast %5 : vector<1x1x256xf32> to vector<1x3x256xf32>
    %9 = arith.mulf %7, %8 : vector<1x3x256xf32>
    %c0_8 = arith.constant 0 : index
    %c0_9 = arith.constant 0 : index
    %c0_10 = arith.constant 0 : index
    %10 = vector.load %arg2[%c0_8, %c0_9, %c0_10] : memref<1x3x256xf32, #tpu.memory_space<vmem>>, vector<1x3x256xf32>
    %cst_11 = arith.constant 1.000000e+00 : f32
    %11 = vector.broadcast %cst_11 : f32 to vector<1x1x256xf32>
    %12 = arith.subf %11, %5 : vector<1x1x256xf32>
    %13 = vector.broadcast %12 : vector<1x1x256xf32> to vector<1x3x256xf32>
    %14 = arith.mulf %10, %13 : vector<1x3x256xf32>
    %15 = arith.addf %9, %14 : vector<1x3x256xf32>
    %c0_12 = arith.constant 0 : index
    %c0_13 = arith.constant 0 : index
    %c0_14 = arith.constant 0 : index
    %16 = vector.load %arg4[%c0_12, %c0_13, %c0_14] : memref<1x3x256xf32, #tpu.memory_space<vmem>>, vector<1x3x256xf32>
    tpu.vector_store %arg4[%c0_12, %c0_13, %c0_14], %15 {strides = array<i32>} : memref<1x3x256xf32, #tpu.memory_space<vmem>>, vector<1x3x256xf32>,
    return
  }
  func.func @transform_0(%arg0: i32) -> (i32, i32, i32) {
    %c0_i32 = arith.constant 0 : i32
    %c0_i32_0 = arith.constant 0 : i32
    %c0_i32_1 = arith.constant 0 : i32
    return %arg0, %c0_i32, %c0_i32_0 : i32, i32, i32
  }
  func.func @transform_1(%arg0: i32) -> (i32, i32, i32) {
    %c0_i32 = arith.constant 0 : i32
    %c0_i32_0 = arith.constant 0 : i32
    %c0_i32_1 = arith.constant 0 : i32
    return %arg0, %c0_i32, %c0_i32_0 : i32, i32, i32
  }
  func.func @transform_2(%arg0: i32) -> (i32, i32, i32) {
    %c0_i32 = arith.constant 0 : i32
    %c0_i32_0 = arith.constant 0 : i32
    %c0_i32_1 = arith.constant 0 : i32
    return %arg0, %c0_i32, %c0_i32_0 : i32, i32, i32
  }
  func.func @transform_3(%arg0: i32) -> (i32, i32, i32) {
    %c0_i32 = arith.constant 0 : i32
    %c0_i32_0 = arith.constant 0 : i32
    %c0_i32_1 = arith.constant 0 : i32
    return %arg0, %c0_i32, %c0_i32_0 : i32, i32, i32
  }
  func.func @transform_4(%arg0: i32) -> (i32, i32, i32) {
    %c0_i32 = arith.constant 0 : i32
    %c0_i32_0 = arith.constant 0 : i32
    %c0_i32_1 = arith.constant 0 : i32
    return %arg0, %c0_i32, %c0_i32_0 : i32, i32, i32
  }
}

</mosaic_0001>

<bundles_post_ra>
// kernel: multiscale_flow_forward.12
= control target key start
LH: loop header
LB: loop body
LE: loop exit
PB: predicated region body
PF: predicated region fallthrough
CT: control target
= control target key end

     0   :  { %s1100_s15 = smov 0   ;;  %s1242_s0 = inlined_call_operand.vmem [shape: bf16[2,2,2,24], index: 0, kind: input, shape index: {}]   ;;  %s1243_s1 = inlined_call_operand.vmem [shape: bf16[3,3,24,128], index: 1, kind: input, shape index: {}]   ;;  %s1244_s2 = inlined_call_operand.vmem [shape: f32[1,128], index: 2, kind: input, shape index: {}]   ;;  %s1245_s3 = inlined_call_operand.vmem [shape: f32[1,128], index: 3, kind: input, shape index: {}]   ;;  %s1246_s4 = inlined_call_operand.vmem [shape: bf16[2,2,2,128], index: 4, kind: output, shape index: {}]  }
   0x1 LB: > { %s848_s16 = sadd.s32 4294967295, %s1071_s15   ;;  %p852_p0 = scmp.ge.s32.totalorder %s1071_s15, 1  ;;  %s1071_s15 = sphi %s1100_s15, %s14_s15  }
   0x2   : > { %p161_p1 = scmp.lt.s32.totalorder %s1071_s15, 3 }
   0x4   : > { %p162_p2 = pnand %p852_p0, %p161_p1 }
   0x5   : > { %v1044_v0 = vld [vmem:[%s1243_s1] sm:$0xff] (!%p162_p2)   ;;  %v1073_v1 = vmov (!%p162_p2), 0.0   ;;  %vm249_vm0 = vcmask (!%p162_p2), 1043456   ;;  %v1046_v3 = vld [vmem:[%s1243_s1 + $0x8] ss:$0 sps:$4 sm:$0xff] (!%p162_p2)   ;;  %p185_p3 = scmp.lt.s32.totalorder (!%p162_p2), %s848_s16, 1 }
   0x6   : > { %165 = sbr.rel (%p162_p2) target bundleno = 292 (0x124), region = 36  ;;  %949 = vmatprep.subr.bf16.mxu0 (!%p162_p2), %v1073_v1  ;;  %941 = vmatprep.subr.bf16.mxu1 (!%p162_p2), %v1073_v1  ;;  %v1045_v2 = vld [vmem:[%s1243_s1 + $0x24] sm:$0xff] (!%p162_p2)   ;;  %v1047_v4 = vld [vmem:[%s1243_s1 + $0x2c] ss:$0 sps:$4 sm:$0xff] (!%p162_p2)   ;;  %vm194_vm1 = vcmask (!%p162_p2), 191488   ;;  %v306_v5 = vsel (!%p162_p2), %vm249_vm0, %v1046_v3, 0 }
   0x7   : > { %950 = vmatpush3.bf16.msra.mxu0 (!%p162_p2), %v1044_v0  ;;  %942 = vmatpush3.bf16.msra.mxu1 (!%p162_p2), %v1045_v2  ;;  %vm1074_vm2 = vmmov (!%p162_p2), 0   ;;  %196 = vst.msk [vmem:[#allocation2 + $0x4] sm:$0xf] (!%p162_p2), %vm194_vm1, %v1073_v1  ;;  %197 = vst.msk [vmem:[#allocation2 + $0x8] sm:$0xf] (!%p162_p2), %vm194_vm1, %v1073_v1  ;;  %v251_v6 = vsel (!%p162_p2), %vm249_vm0, %v1047_v4, 0 }
   0x8   : > { %951 = vmatprep.subr.bf16.mxu0 (!%p162_p2), %v1073_v1  ;;  %943 = vmatprep.subr.bf16.mxu1 (!%p162_p2), %v1073_v1  ;;  %195 = vst.msk [vmem:[#allocation2] sm:$0xf] (!%p162_p2), %vm194_vm1, %v1073_v1  ;;  %198 = vst.msk [vmem:[#allocation2 + $0xc] sm:$0xf] (!%p162_p2), %vm194_vm1, %v1073_v1  ;;  %vm204_vm3 = vcmask (!%p162_p2), 189440   ;;  %v1051_v11 = vld [vmem:[%s1243_s1 + $0x30] sm:$0xff] (!%p162_p2)  }
   0x9   : > { %945 = vmatprep.mubr.msk.bf16.mxu1 (!%p162_p2), %vm1074_vm2, %v1073_v1  ;;  %953 = vmatprep.mubr.msk.bf16.mxu0 (!%p162_p2), %vm1074_vm2, %v1073_v1  ;;  %vm245_vm4 = vcmask (!%p162_p2), 195584   ;;  %v1050_v15 = vld [vmem:[%s1243_s1 + $0x3c] sm:$0xff] (!%p162_p2)   ;;  %v1053_v16 = vld [vmem:[%s1243_s1 + $0x38] ss:$0 sps:$4 sm:$0xff] (!%p162_p2)   ;;  %v1052_v18 = vld [vmem:[%s1243_s1 + $0x44] ss:$0 sps:$4 sm:$0xff] (!%p162_p2)  }
   0xa   : > { %v362_v19 = vsel (!%p162_p2), %vm249_vm0, %v1053_v16, 0  ;;  %v470_v20 = vsel (!%p162_p2), %vm249_vm0, %v1052_v18, 0  ;;  %v1055_v21 = vld [vmem:[%s1243_s1 + $0xc] sm:$0xff] (!%p162_p2)   ;;  %v1054_v22 = vld [vmem:[%s1243_s1 + $0x18] sm:$0xff] (!%p162_p2)   ;;  %v1057_v23 = vld [vmem:[%s1243_s1 + $0x14] ss:$0 sps:$4 sm:$0xff] (!%p162_p2)  }
   0xb   : > { %952 = vmatpush3.bf16.msra.mxu0 (!%p162_p2), %v306_v5  ;;  %944 = vmatpush3.bf16.msra.mxu1 (!%p162_p2), %v251_v6  ;;  %v1056_v24 = vld [vmem:[%s1243_s1 + $0x20] ss:$0 sps:$4 sm:$0xff] (!%p162_p2)   ;;  %v414_v25 = vsel (!%p162_p2), %vm249_vm0, %v1057_v23, 0  ;;  %v1059_v27 = vld [vmem:[%s1243_s1 + $0x54] sm:$0xff] (!%p162_p2)   ;;  %v1058_v28 = vld [vmem:[%s1243_s1 + $0x48] sm:$0xff] (!%p162_p2)  }
   0xc   : > { %973 = vmatprep.subr.bf16.mxu0 (!%p162_p2), %v1073_v1  ;;  %957 = vmatprep.subr.bf16.mxu1 (!%p162_p2), %v1073_v1  ;;  %v522_v26 = vsel (!%p162_p2), %vm249_vm0, %v1056_v24, 0  ;;  %v1062_v29 = vld [vmem:[%s1243_s1 + $0x5c] ss:$0 sps:$4 sm:$0xff] (!%p162_p2)   ;;  %v1060_v30 = vld [vmem:[%s1243_s1 + $0x50] ss:$0 sps:$4 sm:$0xff] (!%p162_p2)   ;;  %v1063_v35 = vld [vmem:[%s1243_s1 + $0x60] sm:$0xff] (!%p162_p2)  }
   0xd   : > { %s1248_s16 = smov (!%p185_p3, %s848_s16), 1  ;;  %v646_v32 = vsel %vm249_vm0, %v1062_v29, 0  ;;  %v589_v33 = vsel %vm249_vm0, %v1060_v30, 0  ;;  %v1064_v36 = vld [vmem:[%s1243_s1 + $0x68] ss:$0 sps:$4 sm:$0xff]  }
   0xe   : > { %s853_s25 = sshll.u32 %s1248_s16, 1  ;;  %v703_v37 = vsel %vm249_vm0, %v1064_v36, 0  ;;  %v910_v61 = vld [vmem:[%s1244_s2] ss:$0 sm:$0xff] }
   0xf   : > { %s188_s28 = scalar_lea.vmem %s1242_s0, %s853_s25  ;;  %v911_v2 = vld [vmem:[%s1245_s3] ss:$0 sm:$0xff]  ;;  %s192_s14 = scalar_lea.vmem %s1246_s4, %s853_s25 }
  0x10   : > { %v199_v7 = vld [vmem:[%s188_s28] sm:$0x1]  ;;  %v200_v8 = vld [vmem:[%s188_s28 + $0x1] sm:$0x1] }
  0x11   : > { %v201_v9 = vunpack.c.l.bf16 %v199_v7  ;;  %v202_v10 = vunpack.c.l.bf16 %v200_v8 }
  0x13   : > { %205 = vst.msk [vmem:[#allocation2 + $0x5] sm:$0x3] %vm204_vm3, %v201_v9  ;;  %206 = vst.msk [vmem:[#allocation2 + $0x9] sm:$0x3] %vm204_vm3, %v202_v10 }
  0x1a   : > { %v1048_v12 = vld [vmem:[#allocation2 + $0x4] sm:$0xff]  }
  0x1b   : > { %v1049_v13 = vld [vmem:[#allocation2] sm:$0xff]   ;;  %v231_v14 = vpack.c.bf16 %v1048_v12, %v1048_v12  ;;  %v1061_v31 = vld [vmem:[#allocation2 + $0x8] sm:$0xff]  }
  0x1c   : > { %v213_v17 = vpack.c.bf16 %v1049_v13, %v1049_v13  ;;  %v571_v34 = vpack.c.bf16 %v1061_v31, %v1061_v31 }
  0x1d   : > { %946 = vmatmul.mubr.msk.bf16.vlgmr.msra.gmra.mrb[0].mxu1 %vm245_vm4, %v231_v14 }
  0x1e   : > { %954 = vmatmul.mubr.msk.bf16.vlgmr.msra.gmra.mrb[0].mxu0 %vm245_vm4, %v213_v17  ;;  %958 = vmatpush3.bf16.msra.mxu1 %v1051_v11 }
  0x1f   : > { %974 = vmatpush3.bf16.msra.mxu0 %v1050_v15  ;;  %959 = vmatprep.subr.bf16.mxu1 %v1073_v1 }
  0x20   : > { %975 = vmatprep.subr.bf16.mxu0 %v1073_v1  ;;  %961 = vmatprep.mubr.msk.bf16.mxu1 %vm1074_vm2, %v1073_v1 }
  0x21   : > { %977 = vmatprep.mubr.msk.bf16.mxu0 %vm1074_vm2, %v1073_v1 }
  0x22   : > { %960 = vmatpush3.bf16.msra.mxu1 %v362_v19 }
  0x23   : > { %976 = vmatpush3.bf16.msra.mxu0 %v470_v20  ;;  %965 = vmatprep.subr.bf16.mxu1 %v1073_v1 }
  0x24   : > { %981 = vmatprep.subr.bf16.mxu0 %v1073_v1 }
  0x25   : > { %962 = vmatmul.mubr.msk.bf16.vlgmr.msra.gmra.mrb[4].mxu1 %vm245_vm4, %v231_v14 }
  0x26   : > { %978 = vmatmul.mubr.msk.bf16.vlgmr.msra.gmra.mrb[4].mxu0 %vm245_vm4, %v231_v14  ;;  %966 = vmatpush3.bf16.msra.mxu1 %v1055_v21 }
  0x27   : > { %982 = vmatpush3.bf16.msra.mxu0 %v1054_v22  ;;  %967 = vmatprep.subr.bf16.mxu1 %v1073_v1 }
  0x28   : > { %983 = vmatprep.subr.bf16.mxu0 %v1073_v1  ;;  %969 = vmatprep.mubr.msk.bf16.mxu1 %vm1074_vm2, %v1073_v1 }
  0x29   : > { %985 = vmatprep.mubr.msk.bf16.mxu0 %vm1074_vm2, %v1073_v1 }
  0x2a   : > { %968 = vmatpush3.bf16.msra.mxu1 %v414_v25 }
  0x2b   : > { %984 = vmatpush3.bf16.msra.mxu0 %v522_v26  ;;  %997 = vmatprep.subr.bf16.mxu1 %v1073_v1 }
  0x2c   : > { %989 = vmatprep.subr.bf16.mxu0 %v1073_v1 }
  0x31   : > { %970 = vmatmul.mubr.msk.bf16.vlgmr.msra.gmra.mrb[4].mxu1 %vm245_vm4, %v213_v17 }
  0x32   : > { %986 = vmatmul.mubr.msk.bf16.vlgmr.msra.gmra.mrb[4].mxu0 %vm245_vm4, %v213_v17  ;;  %998 = vmatpush3.bf16.msra.mxu1 %v1059_v27 }
  0x33   : > { %990 = vmatpush3.bf16.msra.mxu0 %v1058_v28  ;;  %993 = vmatprep.mubr.msk.bf16.mxu0 %vm1074_vm2, %v1073_v1 }
  0x34   : > { %991 = vmatprep.subr.bf16.mxu0 %v1073_v1  ;;  %999 = vmatprep.subr.bf16.mxu1 %v1073_v1 }
  0x35   : > { %1001 = vmatprep.mubr.msk.bf16.mxu1 %vm1074_vm2, %v1073_v1 }
  0x36   : > { %1000 = vmatpush3.bf16.msra.mxu1 %v646_v32 }
  0x37   : > { %992 = vmatpush3.bf16.msra.mxu0 %v589_v33 }
  0x38   : > { %1005 = vmatprep.subr.bf16.mxu0 %v1073_v1 }
  0x3a   : > { %994 = vmatmul.mubr.msk.bf16.vlgmr.msra.gmra.mrb[0].mxu0 %vm245_vm4, %v571_v34 }
  0x3b   : > { %1006 = vmatpush3.bf16.msra.mxu0 %v1063_v35  ;;  %1009 = vmatprep.mubr.msk.bf16.mxu0 %vm1074_vm2, %v1073_v1 }
  0x3c   : > { %1007 = vmatprep.subr.bf16.mxu0 %v1073_v1 }
  0x3d   : > { %1002 = vmatmul.mubr.msk.bf16.vlgmr.msra.gmra.mrb[4].mxu1 %vm245_vm4, %v571_v34 }
  0x3f   : > { %1008 = vmatpush3.bf16.msra.mxu0 %v703_v37 }
  0x42   : > { %1010 = vmatmul.mubr.msk.bf16.vlgmr.msra.gmra.mrb[4].mxu0 %vm245_vm4, %v571_v34 }
  0xf0   : > { %v287_v38 = vpop.f32.mrb[0].mxu1 }
  0xf1   : > { %v947_v39 = vpop.f32.mrb[1].mxu1 }
  0xf2   : > { %v290_v40 = vpop.f32.mrb[2].mxu1 }
  0xf3   : > { %v948_v41 = vpop.f32.mrb[3].mxu1 }
 0x10d   : > { %v625_v42 = vpop.f32.mrb[0].mxu0 }
 0x10e   : > { %v1013_v43 = vadd.f32 %v625_v42, %v287_v38  ;;  %v995_v44 = vpop.f32.mrb[1].mxu0 }
 0x10f   : > { %v628_v45 = vpop.f32.mrb[2].mxu0 }
 0x110   : > { %v996_v46 = vpop.f32.mrb[3].mxu0  ;;  %v682_v47 = vpop.f32.mrb[4].mxu1  ;;  %v747_v52 = vcombine.high %v1013_v43, %v1013_v43 }
 0x111   : > { %v750_v48 = vcombine.high %v682_v47, %v682_v47  ;;  %v906_v49 = vrot.slane %v682_v47, 9  ;;  %v1003_v50 = vpop.f32.mrb[5].mxu1 }
 0x112   : > { %v685_v51 = vpop.f32.mrb[6].mxu1 }
 0x113   : > { %v907_v53 = vrot.slane %v750_v48, 9  ;;  %v757_v54 = vadd.f32 %v1013_v43, %v906_v49  ;;  %v1004_v55 = vpop.f32.mrb[7].mxu1 }
 0x115   : > { %v758_v56 = vadd.f32 %v907_v53, %v747_v52  ;;  %v739_v57 = vpop.f32.mrb[4].mxu0 }
 0x116   : > { %v760_v58 = vcombine.high %v739_v57, %v739_v57  ;;  %v908_v59 = vrot.slane %v739_v57, 10  ;;  %v1011_v60 = vpop.f32.mrb[5].mxu0 }
 0x117   : > { %v742_v62 = vpop.f32.mrb[6].mxu0 }
 0x118   : > { %v909_v63 = vrot.slane %v760_v58, 10  ;;  %v767_v0 = vadd.f32 %v908_v59, %v757_v54  ;;  %v1012_v1 = vpop.f32.mrb[7].mxu0 }
 0x11a   : > { %v768_v3 = vadd.f32 %v909_v63, %v758_v56  ;;  %v776_v4 = vadd.f32 %v910_v61, %v767_v0 }
 0x11c   : > { %v777_v5 = vadd.f32 %v910_v61, %v768_v3  ;;  %vm779_vm5 = vcmp.gt.f32.partialorder %v776_v4, 0.0  ;;  %v787_v6 = vmul.f32 %v911_v2, %v776_v4 }
 0x11e   : > { %vm780_vm6 = vcmp.gt.f32.partialorder %v777_v5, 0.0  ;;  %v788_v7 = vmul.f32 %v911_v2, %v777_v5  ;;  %v789_v8 = vsel %vm779_vm5, %v776_v4, %v787_v6 }
 0x11f   : > { %v791_v9 = vpack.c.bf16 %v789_v8, %v789_v8 }
 0x120   : > { %v790_v10 = vsel %vm780_vm6, %v777_v5, %v788_v7 }
 0x121   : > { %v792_v11 = vpack.c.bf16 %v790_v10, %v790_v10  ;;  %793 = vst [vmem:[%s192_s14] sm:$0x1] %v791_v9 }
 0x123   : > { %794 = vst [vmem:[%s192_s14 + $0x1] sm:$0x1] %v792_v11 }
 0x124 PF: > { %s14_s15 = sadd.s32 1, %s1071_s15  }
 0x125   : > { %p11_p4 = scmp.ge.s32.totalorder %s14_s15, 4  }
 0x127   :  { %13 = sbr.rel (!%p11_p4) target bundleno = 1 (0x1), region = 76 }

// kernel: multiscale_flow_forward.13
= control target key start
LH: loop header
LB: loop body
LE: loop exit
PB: predicated region body
PF: predicated region fallthrough
CT: control target
= control target key end

     0   :  { %s1893_s15 = smov 0   ;;  %s2238_s0 = inlined_call_operand.vmem [shape: bf16[2,2,2,128], index: 0, kind: input, shape index: {}]   ;;  %s2239_s1 = inlined_call_operand.vmem [shape: bf16[3,3,128,128], index: 1, kind: input, shape index: {}]   ;;  %s2240_s2 = inlined_call_operand.vmem [shape: f32[1,128], index: 2, kind: input, shape index: {}]   ;;  %s2241_s3 = inlined_call_operand.vmem [shape: f32[1,128], index: 3, kind: input, shape index: {}]   ;;  %s2242_s4 = inlined_call_operand.vmem [shape: bf16[2,2,2,128], index: 4, kind: output, shape index: {}]  }
   0x1 LB: > { %s1276_s16 = sadd.s32 4294967295, %s1864_s15   ;;  %p1280_p0 = scmp.ge.s32.totalorder %s1864_s15, 1  ;;  %s1864_s15 = sphi %s1893_s15, %s14_s15  }
   0x2   : > { %p161_p1 = scmp.lt.s32.totalorder %s1864_s15, 3 }
   0x4   : > { %p162_p2 = pnand %p1280_p0, %p161_p1 }
   0x5   : > { %v1783_v0 = vld [vmem:[%s2239_s1 + $0xc0] sm:$0xff] (!%p162_p2)   ;;  %v1866_v1 = vmov (!%p162_p2), 0.0   ;;  %v1785_v3 = vld [vmem:[%s2239_s1 + $0xc8] sm:$0xff] (!%p162_p2)   ;;  %vm1867_vm0 = vmmov (!%p162_p2), 0   ;;  %p185_p3 = scmp.lt.s32.totalorder (!%p162_p2), %s1276_s16, 1  ;;  %v1787_v5 = vld [vmem:[%s2239_s1 + $0xd0] sm:$0xff] (!%p162_p2)  }
   0x6   : > { %165 = sbr.rel (%p162_p2) target bundleno = 393 (0x189), region = 36  ;;  %1572 = vmatprep.subr.bf16.mxu1 (!%p162_p2), %v1866_v1  ;;  %194 = vst [vmem:[#allocation2] sm:$0xf] (!%p162_p2), %v1866_v1  ;;  %195 = vst [vmem:[#allocation2 + $0x4] sm:$0xf] (!%p162_p2), %v1866_v1  ;;  %1592 = vmatprep.subr.bf16.mxu0 (!%p162_p2), %v1866_v1  ;;  %v1784_v2 = vld [vmem:[%s2239_s1] sm:$0xff] (!%p162_p2)  }
   0x7   : > { %196 = vst [vmem:[#allocation2 + $0x8] sm:$0xf] (!%p162_p2), %v1866_v1  ;;  %197 = vst [vmem:[#allocation2 + $0xc] sm:$0xf] (!%p162_p2), %v1866_v1  ;;  %1573 = vmatpush3.bf16.msra.mxu1 (!%p162_p2), %v1783_v0  ;;  %1588 = vmatprep.mubr.msk.bf16.mxu1 (!%p162_p2), %vm1867_vm0, %v1866_v1  ;;  %v1786_v4 = vld [vmem:[%s2239_s1 + $0x8] sm:$0xff] (!%p162_p2)   ;;  %v1788_v6 = vld [vmem:[%s2239_s1 + $0x10] sm:$0xff] (!%p162_p2)  }
   0x8   : > { %1593 = vmatpush3.bf16.msra.mxu0 (!%p162_p2), %v1784_v2  ;;  %1574 = vmatprep.subr.bf16.mxu1 (!%p162_p2), %v1866_v1  ;;  %v1789_v7 = vld [vmem:[%s2239_s1 + $0xd8] sm:$0xff] (!%p162_p2)   ;;  %v1791_v9 = vld [vmem:[%s2239_s1 + $0xe0] sm:$0xff] (!%p162_p2)   ;;  %v1793_v15 = vld [vmem:[%s2239_s1 + $0xe8] sm:$0xff] (!%p162_p2)  }
   0x9   : > { %1594 = vmatprep.subr.bf16.mxu0 (!%p162_p2), %v1866_v1  ;;  %1608 = vmatprep.mubr.msk.bf16.mxu0 (!%p162_p2), %vm1867_vm0, %v1866_v1  ;;  %v1790_v8 = vld [vmem:[%s2239_s1 + $0x18] sm:$0xff] (!%p162_p2)   ;;  %v1792_v10 = vld [vmem:[%s2239_s1 + $0x20] sm:$0xff] (!%p162_p2)   ;;  %v1794_v16 = vld [vmem:[%s2239_s1 + $0x28] sm:$0xff] (!%p162_p2)  }
   0xa   : > { %v1795_v17 = vld [vmem:[%s2239_s1 + $0xf0] sm:$0xff] (!%p162_p2)   ;;  %v1797_v19 = vld [vmem:[%s2239_s1 + $0xf8] sm:$0xff] (!%p162_p2)   ;;  %v1801_v25 = vld [vmem:[%s2239_s1 + $0x100] sm:$0xff] (!%p162_p2)  }
   0xb   : > { %1575 = vmatpush3.bf16.msra.mxu1 (!%p162_p2), %v1785_v3  ;;  %v1796_v18 = vld [vmem:[%s2239_s1 + $0x30] sm:$0xff] (!%p162_p2)   ;;  %v1798_v20 = vld [vmem:[%s2239_s1 + $0x38] sm:$0xff] (!%p162_p2)   ;;  %v1802_v26 = vld [vmem:[%s2239_s1 + $0x140] sm:$0xff] (!%p162_p2)  }
   0xc   : > { %1595 = vmatpush3.bf16.msra.mxu0 (!%p162_p2), %v1786_v4  ;;  %1576 = vmatprep.subr.bf16.mxu1 (!%p162_p2), %v1866_v1  ;;  %v1803_v27 = vld [vmem:[%s2239_s1 + $0x108] sm:$0xff] (!%p162_p2)   ;;  %v1805_v29 = vld [vmem:[%s2239_s1 + $0x110] sm:$0xff] (!%p162_p2)   ;;  %v1807_v31 = vld [vmem:[%s2239_s1 + $0x118] sm:$0xff] (!%p162_p2)  }
   0xd   : > { %s2244_s16 = smov (!%p185_p3, %s1276_s16), 1  ;;  %1596 = vmatprep.subr.bf16.mxu0 %v1866_v1  ;;  %v1804_v28 = vld [vmem:[%s2239_s1 + $0x148] sm:$0xff]   ;;  %v1806_v30 = vld [vmem:[%s2239_s1 + $0x150] sm:$0xff]   ;;  %v1808_v32 = vld [vmem:[%s2239_s1 + $0x158] sm:$0xff]  }
   0xe   : > { %s1281_s5 = sshll.u32 %s2244_s16, 1  ;;  %v1809_v33 = vld [vmem:[%s2239_s1 + $0x120] sm:$0xff]   ;;  %v1811_v35 = vld [vmem:[%s2239_s1 + $0x128] sm:$0xff]   ;;  %v1813_v37 = vld [vmem:[%s2239_s1 + $0x130] sm:$0xff]  }
   0xf   : > { %1577 = vmatpush3.bf16.msra.mxu1 %v1787_v5  ;;  %s188_s10 = scalar_lea.vmem %s2238_s0, %s1281_s5  ;;  %v1810_v34 = vld [vmem:[%s2239_s1 + $0x160] sm:$0xff]   ;;  %v1812_v36 = vld [vmem:[%s2239_s1 + $0x168] sm:$0xff]   ;;  %v1814_v38 = vld [vmem:[%s2239_s1 + $0x170] sm:$0xff]   ;;  %s192_s7 = scalar_lea.vmem %s2242_s4, %s1281_s5 }
  0x10   : > { %1597 = vmatpush3.bf16.msra.mxu0 %v1788_v6  ;;  %1578 = vmatprep.subr.bf16.mxu1 %v1866_v1  ;;  %v198_v11 = vld [vmem:[%s188_s10] sm:$0x1]  ;;  %v199_v12 = vld [vmem:[%s188_s10 + $0x1] sm:$0x1]  ;;  %v1815_v39 = vld [vmem:[%s2239_s1 + $0x138] sm:$0xff]  }
  0x11   : > { %1598 = vmatprep.subr.bf16.mxu0 %v1866_v1  ;;  %v200_v13 = vunpack.c.l.bf16 %v198_v11  ;;  %v201_v14 = vunpack.c.l.bf16 %v199_v12  ;;  %v1816_v40 = vld [vmem:[%s2239_s1 + $0x178] sm:$0xff]   ;;  %v1817_v41 = vld [vmem:[%s2239_s1 + $0x40] sm:$0xff]   ;;  %v1819_v43 = vld [vmem:[%s2239_s1 + $0x48] sm:$0xff]  }
  0x12   : > { %v1818_v42 = vld [vmem:[%s2239_s1 + $0x80] sm:$0xff]   ;;  %v1820_v44 = vld [vmem:[%s2239_s1 + $0x88] sm:$0xff]   ;;  %v1821_v45 = vld [vmem:[%s2239_s1 + $0x50] sm:$0xff]  }
  0x13   : > { %1579 = vmatpush3.bf16.msra.mxu1 %v1789_v7  ;;  %203 = vst [vmem:[#allocation2 + $0x5] sm:$0x3] %v200_v13  ;;  %204 = vst [vmem:[#allocation2 + $0x9] sm:$0x3] %v201_v14  ;;  %v1822_v46 = vld [vmem:[%s2239_s1 + $0x90] sm:$0xff]   ;;  %v1823_v47 = vld [vmem:[%s2239_s1 + $0x58] sm:$0xff]  }
  0x14   : > { %1599 = vmatpush3.bf16.msra.mxu0 %v1790_v8  ;;  %1580 = vmatprep.subr.bf16.mxu1 %v1866_v1  ;;  %v1824_v48 = vld [vmem:[%s2239_s1 + $0x98] sm:$0xff]   ;;  %v1825_v49 = vld [vmem:[%s2239_s1 + $0x60] sm:$0xff]   ;;  %v1827_v51 = vld [vmem:[%s2239_s1 + $0x68] sm:$0xff]  }
  0x15   : > { %1600 = vmatprep.subr.bf16.mxu0 %v1866_v1  ;;  %v1826_v50 = vld [vmem:[%s2239_s1 + $0xa0] sm:$0xff]   ;;  %v1828_v52 = vld [vmem:[%s2239_s1 + $0xa8] sm:$0xff]   ;;  %v1829_v53 = vld [vmem:[%s2239_s1 + $0x70] sm:$0xff]  }
  0x16   : > { %v1830_v54 = vld [vmem:[%s2239_s1 + $0xb0] sm:$0xff]   ;;  %v1831_v55 = vld [vmem:[%s2239_s1 + $0x78] sm:$0xff]   ;;  %v1834_v57 = vld [vmem:[%s2239_s1 + $0x1c0] sm:$0xff]  }
  0x17   : > { %1581 = vmatpush3.bf16.msra.mxu1 %v1791_v9  ;;  %v1832_v56 = vld [vmem:[%s2239_s1 + $0xb8] sm:$0xff]   ;;  %v1833_v58 = vld [vmem:[%s2239_s1 + $0x180] sm:$0xff]   ;;  %v1836_v59 = vld [vmem:[%s2239_s1 + $0x1c8] sm:$0xff]  }
  0x18   : > { %1601 = vmatpush3.bf16.msra.mxu0 %v1792_v10  ;;  %1582 = vmatprep.subr.bf16.mxu1 %v1866_v1  ;;  %v1835_v60 = vld [vmem:[%s2239_s1 + $0x188] sm:$0xff]   ;;  %v1838_v61 = vld [vmem:[%s2239_s1 + $0x1d0] sm:$0xff]   ;;  %v1840_v63 = vld [vmem:[%s2239_s1 + $0x1d8] sm:$0xff]  }
  0x19   : > { %1602 = vmatprep.subr.bf16.mxu0 %v1866_v1  ;;  %v1837_v62 = vld [vmem:[%s2239_s1 + $0x190] sm:$0xff]   ;;  %v1839_v0 = vld [vmem:[%s2239_s1 + $0x198] sm:$0xff]   ;;  %v1842_v2 = vld [vmem:[%s2239_s1 + $0x1e0] sm:$0xff]  }
  0x1a   : > { %v1799_v21 = vld [vmem:[#allocation2 + $0x4] sm:$0xff]   ;;  %v1846_v6 = vld [vmem:[%s2239_s1 + $0x1f0] sm:$0xff]   ;;  %v1848_v9 = vld [vmem:[%s2239_s1 + $0x1f8] sm:$0xff]  }
  0x1b   : > { %1583 = vmatpush3.bf16.msra.mxu1 %v1793_v15  ;;  %v1800_v22 = vld [vmem:[#allocation2] sm:$0xff]   ;;  %v268_v23 = vpack.c.bf16 %v1799_v21, %v1799_v21  ;;  %v1844_v4 = vld [vmem:[%s2239_s1 + $0x1e8] sm:$0xff]   ;;  %v1845_v7 = vld [vmem:[%s2239_s1 + $0x1b0] sm:$0xff]  }
  0x1c   : > { %1603 = vmatpush3.bf16.msra.mxu0 %v1794_v16  ;;  %1584 = vmatprep.subr.bf16.mxu1 %v1866_v1  ;;  %v1981_v24 = vpack.c.bf16 %v1800_v22, %v1800_v22  ;;  %v1841_v3 = vld [vmem:[%s2239_s1 + $0x1a0] sm:$0xff]   ;;  %v1843_v5 = vld [vmem:[%s2239_s1 + $0x1a8] sm:$0xff]   ;;  %v1847_v10 = vld [vmem:[%s2239_s1 + $0x1b8] sm:$0xff]  }
  0x1d   : > { %1604 = vmatprep.subr.bf16.mxu0 %v1866_v1  ;;  %v1849_v8 = vld [vmem:[#allocation2 + $0x8] sm:$0xff]   ;;  %v1850_v12 = vld [vmem:[%s2239_s1 + $0x200] sm:$0xff]   ;;  %v1852_v14 = vld [vmem:[%s2239_s1 + $0x210] sm:$0xff]  }
  0x1e   : > { %v855_v11 = vpack.c.bf16 %v1849_v8, %v1849_v8  ;;  %v1851_v13 = vld [vmem:[%s2239_s1 + $0x208] sm:$0xff]   ;;  %v1853_v15 = vld [vmem:[%s2239_s1 + $0x218] sm:$0xff]   ;;  %v1854_v16 = vld [vmem:[%s2239_s1 + $0x220] sm:$0xff]  }
  0x1f   : > { %1585 = vmatpush3.bf16.msra.mxu1 %v1795_v17  ;;  %v1855_v17 = vld [vmem:[%s2239_s1 + $0x228] sm:$0xff]  }
  0x20   : > { %1605 = vmatpush3.bf16.msra.mxu0 %v1796_v18  ;;  %1586 = vmatprep.subr.bf16.mxu1 %v1866_v1  ;;  %v1856_v18 = vld [vmem:[%s2239_s1 + $0x230] sm:$0xff]  }
  0x21   : > { %1606 = vmatprep.subr.bf16.mxu0 %v1866_v1 }
  0x23   : > { %1587 = vmatpush3.bf16.msra.mxu1 %v1797_v19  ;;  %v1857_v19 = vld [vmem:[%s2239_s1 + $0x238] sm:$0xff]  }
  0x24   : > { %1607 = vmatpush3.bf16.msra.mxu0 %v1798_v20  ;;  %1612 = vmatprep.subr.bf16.mxu1 %v1866_v1 }
  0x25   : > { %1652 = vmatprep.subr.bf16.mxu0 %v1866_v1 }
  0x26   : > { %1589 = vmatmul.mubr.bf16.vlgmr.msra.gmra.mrb[0].mxu1 %v268_v23 }
  0x27   : > { %1609 = vmatmul.mubr.bf16.vlgmr.msra.gmra.mrb[0].mxu0 %v1981_v24  ;;  %1613 = vmatpush3.bf16.msra.mxu1 %v1801_v25 }
  0x28   : > { %1653 = vmatpush3.bf16.msra.mxu0 %v1802_v26  ;;  %1614 = vmatprep.subr.bf16.mxu1 %v1866_v1 }
  0x29   : > { %1654 = vmatprep.subr.bf16.mxu0 %v1866_v1  ;;  %1628 = vmatprep.mubr.msk.bf16.mxu1 %vm1867_vm0, %v1866_v1 }
  0x2a   : > { %1668 = vmatprep.mubr.msk.bf16.mxu0 %vm1867_vm0, %v1866_v1 }
  0x2b   : > { %1615 = vmatpush3.bf16.msra.mxu1 %v1803_v27 }
  0x2c   : > { %1655 = vmatpush3.bf16.msra.mxu0 %v1804_v28  ;;  %1616 = vmatprep.subr.bf16.mxu1 %v1866_v1 }
  0x2d   : > { %1656 = vmatprep.subr.bf16.mxu0 %v1866_v1 }
  0x2f   : > { %1617 = vmatpush3.bf16.msra.mxu1 %v1805_v29 }
  0x30   : > { %1657 = vmatpush3.bf16.msra.mxu0 %v1806_v30  ;;  %1618 = vmatprep.subr.bf16.mxu1 %v1866_v1 }
  0x31   : > { %1658 = vmatprep.subr.bf16.mxu0 %v1866_v1 }
  0x33   : > { %1619 = vmatpush3.bf16.msra.mxu1 %v1807_v31 }
  0x34   : > { %1659 = vmatpush3.bf16.msra.mxu0 %v1808_v32  ;;  %1620 = vmatprep.subr.bf16.mxu1 %v1866_v1 }
  0x35   : > { %1660 = vmatprep.subr.bf16.mxu0 %v1866_v1 }
  0x37   : > { %1621 = vmatpush3.bf16.msra.mxu1 %v1809_v33 }
  0x38   : > { %1661 = vmatpush3.bf16.msra.mxu0 %v1810_v34  ;;  %1622 = vmatprep.subr.bf16.mxu1 %v1866_v1 }
  0x39   : > { %1662 = vmatprep.subr.bf16.mxu0 %v1866_v1 }
  0x3b   : > { %1623 = vmatpush3.bf16.msra.mxu1 %v1811_v35 }
  0x3c   : > { %1663 = vmatpush3.bf16.msra.mxu0 %v1812_v36  ;;  %1624 = vmatprep.subr.bf16.mxu1 %v1866_v1 }
  0x3d   : > { %1664 = vmatprep.subr.bf16.mxu0 %v1866_v1 }
  0x3f   : > { %1625 = vmatpush3.bf16.msra.mxu1 %v1813_v37 }
  0x40   : > { %1665 = vmatpush3.bf16.msra.mxu0 %v1814_v38  ;;  %1626 = vmatprep.subr.bf16.mxu1 %v1866_v1 }
  0x41   : > { %1666 = vmatprep.subr.bf16.mxu0 %v1866_v1 }
  0x43   : > { %1627 = vmatpush3.bf16.msra.mxu1 %v1815_v39 }
  0x44   : > { %1667 = vmatpush3.bf16.msra.mxu0 %v1816_v40  ;;  %1632 = vmatprep.subr.bf16.mxu1 %v1866_v1 }
  0x45   : > { %1672 = vmatprep.subr.bf16.mxu0 %v1866_v1 }
  0x46   : > { %1629 = vmatmul.mubr.bf16.vlgmr.msra.gmra.mrb[4].mxu1 %v268_v23 }
  0x47   : > { %1633 = vmatpush3.bf16.msra.mxu1 %v1817_v41  ;;  %1669 = vmatmul.mubr.bf16.vlgmr.msra.gmra.mrb[4].mxu0 %v268_v23 }
  0x48   : > { %1673 = vmatpush3.bf16.msra.mxu0 %v1818_v42  ;;  %1634 = vmatprep.subr.bf16.mxu1 %v1866_v1  ;;  %v1487_v42 = vld [vmem:[%s2240_s2] ss:$0 sm:$0xff] }
  0x49   : > { %1674 = vmatprep.subr.bf16.mxu0 %v1866_v1  ;;  %1648 = vmatprep.mubr.msk.bf16.mxu1 %vm1867_vm0, %v1866_v1 }
  0x4a   : > { %1688 = vmatprep.mubr.msk.bf16.mxu0 %vm1867_vm0, %v1866_v1 }
  0x4b   : > { %1635 = vmatpush3.bf16.msra.mxu1 %v1819_v43 }
  0x4c   : > { %1675 = vmatpush3.bf16.msra.mxu0 %v1820_v44  ;;  %1636 = vmatprep.subr.bf16.mxu1 %v1866_v1 }
  0x4d   : > { %1676 = vmatprep.subr.bf16.mxu0 %v1866_v1 }
  0x4f   : > { %1637 = vmatpush3.bf16.msra.mxu1 %v1821_v45 }
  0x50   : > { %1677 = vmatpush3.bf16.msra.mxu0 %v1822_v46  ;;  %1638 = vmatprep.subr.bf16.mxu1 %v1866_v1 }
  0x51   : > { %1678 = vmatprep.subr.bf16.mxu0 %v1866_v1 }
  0x53   : > { %1639 = vmatpush3.bf16.msra.mxu1 %v1823_v47  ;;  %v1488_v47 = vld [vmem:[%s2241_s3] ss:$0 sm:$0xff] }
  0x54   : > { %1679 = vmatpush3.bf16.msra.mxu0 %v1824_v48  ;;  %1640 = vmatprep.subr.bf16.mxu1 %v1866_v1 }
  0x55   : > { %1680 = vmatprep.subr.bf16.mxu0 %v1866_v1 }
  0x57   : > { %1641 = vmatpush3.bf16.msra.mxu1 %v1825_v49 }
  0x58   : > { %1681 = vmatpush3.bf16.msra.mxu0 %v1826_v50  ;;  %1642 = vmatprep.subr.bf16.mxu1 %v1866_v1 }
  0x59   : > { %1682 = vmatprep.subr.bf16.mxu0 %v1866_v1 }
  0x5b   : > { %1643 = vmatpush3.bf16.msra.mxu1 %v1827_v51 }
  0x5c   : > { %1683 = vmatpush3.bf16.msra.mxu0 %v1828_v52  ;;  %1644 = vmatprep.subr.bf16.mxu1 %v1866_v1 }
  0x5d   : > { %1684 = vmatprep.subr.bf16.mxu0 %v1866_v1 }
  0x5f   : > { %1645 = vmatpush3.bf16.msra.mxu1 %v1829_v53 }
  0x60   : > { %1685 = vmatpush3.bf16.msra.mxu0 %v1830_v54  ;;  %1646 = vmatprep.subr.bf16.mxu1 %v1866_v1 }
  0x61   : > { %1686 = vmatprep.subr.bf16.mxu0 %v1866_v1 }
  0x63   : > { %1647 = vmatpush3.bf16.msra.mxu1 %v1831_v55 }
  0x64   : > { %1687 = vmatpush3.bf16.msra.mxu0 %v1832_v56  ;;  %1712 = vmatprep.subr.bf16.mxu1 %v1866_v1 }
  0x65   : > { %1692 = vmatprep.subr.bf16.mxu0 %v1866_v1 }
  0x66   : > { %1649 = vmatmul.mubr.bf16.vlgmr.msra.gmra.mrb[4].mxu1 %v1981_v24 }
  0x67   : > { %1689 = vmatmul.mubr.bf16.vlgmr.msra.gmra.mrb[4].mxu0 %v1981_v24  ;;  %1713 = vmatpush3.bf16.msra.mxu1 %v1834_v57 }
  0x68   : > { %1693 = vmatpush3.bf16.msra.mxu0 %v1833_v58  ;;  %1714 = vmatprep.subr.bf16.mxu1 %v1866_v1 }
  0x69   : > { %1694 = vmatprep.subr.bf16.mxu0 %v1866_v1  ;;  %1708 = vmatprep.mubr.msk.bf16.mxu0 %vm1867_vm0, %v1866_v1 }
  0x6a   : > { %1728 = vmatprep.mubr.msk.bf16.mxu1 %vm1867_vm0, %v1866_v1 }
  0x6b   : > { %1715 = vmatpush3.bf16.msra.mxu1 %v1836_v59 }
  0x6c   : > { %1695 = vmatpush3.bf16.msra.mxu0 %v1835_v60  ;;  %1716 = vmatprep.subr.bf16.mxu1 %v1866_v1 }
  0x6d   : > { %1696 = vmatprep.subr.bf16.mxu0 %v1866_v1 }
  0x6f   : > { %1717 = vmatpush3.bf16.msra.mxu1 %v1838_v61 }
  0x70   : > { %1697 = vmatpush3.bf16.msra.mxu0 %v1837_v62  ;;  %1718 = vmatprep.subr.bf16.mxu1 %v1866_v1 }
  0x71   : > { %1698 = vmatprep.subr.bf16.mxu0 %v1866_v1 }
  0x73   : > { %1719 = vmatpush3.bf16.msra.mxu1 %v1840_v63 }
  0x74   : > { %1699 = vmatpush3.bf16.msra.mxu0 %v1839_v0  ;;  %1720 = vmatprep.subr.bf16.mxu1 %v1866_v1 }
  0x75   : > { %1700 = vmatprep.subr.bf16.mxu0 %v1866_v1 }
  0x77   : > { %1721 = vmatpush3.bf16.msra.mxu1 %v1842_v2 }
  0x78   : > { %1701 = vmatpush3.bf16.msra.mxu0 %v1841_v3  ;;  %1722 = vmatprep.subr.bf16.mxu1 %v1866_v1 }
  0x79   : > { %1702 = vmatprep.subr.bf16.mxu0 %v1866_v1 }
  0x7b   : > { %1723 = vmatpush3.bf16.msra.mxu1 %v1844_v4 }
  0x7c   : > { %1703 = vmatpush3.bf16.msra.mxu0 %v1843_v5  ;;  %1724 = vmatprep.subr.bf16.mxu1 %v1866_v1 }
  0x7d   : > { %1704 = vmatprep.subr.bf16.mxu0 %v1866_v1 }
  0x7f   : > { %1725 = vmatpush3.bf16.msra.mxu1 %v1846_v6 }
  0x80   : > { %1705 = vmatpush3.bf16.msra.mxu0 %v1845_v7  ;;  %1726 = vmatprep.subr.bf16.mxu1 %v1866_v1 }
  0x81   : > { %1706 = vmatprep.subr.bf16.mxu0 %v1866_v1 }
  0x83   : > { %1727 = vmatpush3.bf16.msra.mxu1 %v1848_v9 }
  0x84   : > { %1707 = vmatpush3.bf16.msra.mxu0 %v1847_v10 }
  0x85   : > { %1732 = vmatprep.subr.bf16.mxu0 %v1866_v1 }
  0x86   : > { %1729 = vmatmul.mubr.bf16.vlgmr.msra.gmra.mrb[4].mxu1 %v855_v11 }
  0x87   : > { %1709 = vmatmul.mubr.bf16.vlgmr.msra.gmra.mrb[0].mxu0 %v855_v11 }
  0x88   : > { %1733 = vmatpush3.bf16.msra.mxu0 %v1850_v12  ;;  %1748 = vmatprep.mubr.msk.bf16.mxu0 %vm1867_vm0, %v1866_v1 }
  0x89   : > { %1734 = vmatprep.subr.bf16.mxu0 %v1866_v1 }
  0x8c   : > { %1735 = vmatpush3.bf16.msra.mxu0 %v1851_v13 }
  0x8d   : > { %1736 = vmatprep.subr.bf16.mxu0 %v1866_v1 }
  0x90   : > { %1737 = vmatpush3.bf16.msra.mxu0 %v1852_v14 }
  0x91   : > { %1738 = vmatprep.subr.bf16.mxu0 %v1866_v1 }
  0x94   : > { %1739 = vmatpush3.bf16.msra.mxu0 %v1853_v15 }
  0x95   : > { %1740 = vmatprep.subr.bf16.mxu0 %v1866_v1 }
  0x98   : > { %1741 = vmatpush3.bf16.msra.mxu0 %v1854_v16 }
  0x99   : > { %1742 = vmatprep.subr.bf16.mxu0 %v1866_v1 }
  0x9c   : > { %1743 = vmatpush3.bf16.msra.mxu0 %v1855_v17 }
  0x9d   : > { %1744 = vmatprep.subr.bf16.mxu0 %v1866_v1 }
  0xa0   : > { %1745 = vmatpush3.bf16.msra.mxu0 %v1856_v18 }
  0xa1   : > { %1746 = vmatprep.subr.bf16.mxu0 %v1866_v1 }
  0xa4   : > { %1747 = vmatpush3.bf16.msra.mxu0 %v1857_v19 }
  0xa7   : > { %1749 = vmatmul.mubr.bf16.vlgmr.msra.gmra.mrb[4].mxu0 %v855_v11 }
  0xf9   : > { %v368_v20 = vpop.f32.mrb[0].mxu1 }
  0xfa   : > { %v1590_v21 = vpop.f32.mrb[1].mxu1 }
  0xfb   : > { %v371_v22 = vpop.f32.mrb[2].mxu1 }
  0xfc   : > { %v1591_v23 = vpop.f32.mrb[3].mxu1 }
 0x159   : > { %v1061_v24 = vpop.f32.mrb[4].mxu1 }
 0x15a   : > { %v955_v25 = vpop.f32.mrb[0].mxu0  ;;  %v1178_v26 = vcombine.high %v1061_v24, %v1061_v24  ;;  %v1483_v27 = vrot.slane %v1061_v24, 9  ;;  %v1730_v28 = vpop.f32.mrb[5].mxu1 }
 0x15b   : > { %v1752_v29 = vadd.f32 %v955_v25, %v368_v20  ;;  %v1710_v30 = vpop.f32.mrb[1].mxu0  ;;  %v1064_v31 = vpop.f32.mrb[6].mxu1 }
 0x15c   : > { %v1484_v32 = vrot.slane %v1178_v26, 9  ;;  %v958_v33 = vpop.f32.mrb[2].mxu0  ;;  %v1731_v34 = vpop.f32.mrb[7].mxu1 }
 0x15d   : > { %v1175_v35 = vcombine.high %v1752_v29, %v1752_v29  ;;  %v1185_v36 = vadd.f32 %v1752_v29, %v1483_v27  ;;  %v1711_v1 = vpop.f32.mrb[3].mxu0 }
 0x15f   : > { %v1186_v37 = vadd.f32 %v1484_v32, %v1175_v35 }
 0x17a   : > { %v1167_v38 = vpop.f32.mrb[4].mxu0 }
 0x17b   : > { %v1188_v39 = vcombine.high %v1167_v38, %v1167_v38  ;;  %v1485_v40 = vrot.slane %v1167_v38, 10  ;;  %v1750_v41 = vpop.f32.mrb[5].mxu0 }
 0x17c   : > { %v1170_v43 = vpop.f32.mrb[6].mxu0 }
 0x17d   : > { %v1486_v44 = vrot.slane %v1188_v39, 10  ;;  %v1195_v45 = vadd.f32 %v1485_v40, %v1185_v36  ;;  %v1751_v46 = vpop.f32.mrb[7].mxu0 }
 0x17f   : > { %v1196_v48 = vadd.f32 %v1486_v44, %v1186_v37  ;;  %v1204_v49 = vadd.f32 %v1487_v42, %v1195_v45 }
 0x181   : > { %v1205_v50 = vadd.f32 %v1487_v42, %v1196_v48  ;;  %vm1207_vm1 = vcmp.gt.f32.partialorder %v1204_v49, 0.0  ;;  %v1215_v51 = vmul.f32 %v1488_v47, %v1204_v49 }
 0x183   : > { %vm1208_vm2 = vcmp.gt.f32.partialorder %v1205_v50, 0.0  ;;  %v1216_v52 = vmul.f32 %v1488_v47, %v1205_v50  ;;  %v1217_v53 = vsel %vm1207_vm1, %v1204_v49, %v1215_v51 }
 0x184   : > { %v1219_v54 = vpack.c.bf16 %v1217_v53, %v1217_v53 }
 0x185   : > { %v1218_v55 = vsel %vm1208_vm2, %v1205_v50, %v1216_v52 }
 0x186   : > { %v1220_v56 = vpack.c.bf16 %v1218_v55, %v1218_v55  ;;  %1221 = vst [vmem:[%s192_s7] sm:$0x1] %v1219_v54 }
 0x188   : > { %1222 = vst [vmem:[%s192_s7 + $0x1] sm:$0x1] %v1220_v56 }
 0x189 PF: > { %s14_s15 = sadd.s32 1, %s1864_s15  }
 0x18a   : > { %p11_p4 = scmp.ge.s32.totalorder %s14_s15, 4  }
 0x18c   :  { %13 = sbr.rel (!%p11_p4) target bundleno = 1 (0x1), region = 76 }

// kernel: multiscale_flow_forward.16
= control target key start
LH: loop header
LB: loop body
LE: loop exit
PB: predicated region body
PF: predicated region fallthrough
CT: control target
= control target key end

     0   :  { %s1898_s15 = smov 0   ;;  %s2240_s0 = inlined_call_operand.vmem [shape: bf16[2,2,2,128], index: 0, kind: input, shape index: {}]   ;;  %s2241_s1 = inlined_call_operand.vmem [shape: bf16[3,3,128,8], index: 1, kind: input, shape index: {}]   ;;  %s2242_s2 = inlined_call_operand.vmem [shape: f32[1,8], index: 2, kind: input, shape index: {}]   ;;  %s2243_s3 = inlined_call_operand.vmem [shape: f32[1,8], index: 3, kind: input, shape index: {}]   ;;  %s2244_s4 = inlined_call_operand.vmem [shape: f32[2,2,2,8], index: 4, kind: output, shape index: {}]  }
   0x1 LB: > { %s1279_s16 = sadd.s32 4294967295, %s1869_s15   ;;  %p1283_p0 = scmp.ge.s32.totalorder %s1869_s15, 1  ;;  %s1869_s15 = sphi %s1898_s15, %s14_s15  }
   0x2   : > { %p161_p1 = scmp.lt.s32.totalorder %s1869_s15, 3 }
   0x4   : > { %p162_p2 = pnand %p1283_p0, %p161_p1 }
   0x5   : > { %v1788_v0 = vld [vmem:[%s2241_s1 + $0xc0] sm:$0xff] (!%p162_p2)   ;;  %v1871_v1 = vmov (!%p162_p2), 0.0   ;;  %v1790_v3 = vld [vmem:[%s2241_s1 + $0xc8] sm:$0xff] (!%p162_p2)   ;;  %vm1872_vm0 = vmmov (!%p162_p2), 0   ;;  %p186_p3 = scmp.lt.s32.totalorder (!%p162_p2), %s1279_s16, 1  ;;  %v1792_v5 = vld [vmem:[%s2241_s1 + $0xd0] sm:$0xff] (!%p162_p2)  }
   0x6   : > { %165 = sbr.rel (%p162_p2) target bundleno = 391 (0x187), region = 36  ;;  %1577 = vmatprep.subr.bf16.mxu1 (!%p162_p2), %v1871_v1  ;;  %196 = vst [vmem:[#allocation2] sm:$0xf] (!%p162_p2), %v1871_v1  ;;  %197 = vst [vmem:[#allocation2 + $0x4] sm:$0xf] (!%p162_p2), %v1871_v1  ;;  %1597 = vmatprep.subr.bf16.mxu0 (!%p162_p2), %v1871_v1  ;;  %v1789_v2 = vld [vmem:[%s2241_s1] sm:$0xff] (!%p162_p2)  }
   0x7   : > { %198 = vst [vmem:[#allocation2 + $0x8] sm:$0xf] (!%p162_p2), %v1871_v1  ;;  %199 = vst [vmem:[#allocation2 + $0xc] sm:$0xf] (!%p162_p2), %v1871_v1  ;;  %1578 = vmatpush3.bf16.msra.mxu1 (!%p162_p2), %v1788_v0  ;;  %1593 = vmatprep.mubr.msk.bf16.mxu1 (!%p162_p2), %vm1872_vm0, %v1871_v1  ;;  %v1791_v4 = vld [vmem:[%s2241_s1 + $0x8] sm:$0xff] (!%p162_p2)   ;;  %v1793_v6 = vld [vmem:[%s2241_s1 + $0x10] sm:$0xff] (!%p162_p2)  }
   0x8   : > { %1598 = vmatpush3.bf16.msra.mxu0 (!%p162_p2), %v1789_v2  ;;  %1579 = vmatprep.subr.bf16.mxu1 (!%p162_p2), %v1871_v1  ;;  %v1794_v7 = vld [vmem:[%s2241_s1 + $0xd8] sm:$0xff] (!%p162_p2)   ;;  %v1796_v9 = vld [vmem:[%s2241_s1 + $0xe0] sm:$0xff] (!%p162_p2)   ;;  %v1798_v15 = vld [vmem:[%s2241_s1 + $0xe8] sm:$0xff] (!%p162_p2)   ;;  %vm1221_vm2 = vcmask (!%p162_p2), 58368  }
   0x9   : > { %1599 = vmatprep.subr.bf16.mxu0 (!%p162_p2), %v1871_v1  ;;  %1613 = vmatprep.mubr.msk.bf16.mxu0 (!%p162_p2), %vm1872_vm0, %v1871_v1  ;;  %v1795_v8 = vld [vmem:[%s2241_s1 + $0x18] sm:$0xff] (!%p162_p2)   ;;  %v1797_v10 = vld [vmem:[%s2241_s1 + $0x20] sm:$0xff] (!%p162_p2)   ;;  %v1799_v16 = vld [vmem:[%s2241_s1 + $0x28] sm:$0xff] (!%p162_p2)  }
   0xa   : > { %v1800_v17 = vld [vmem:[%s2241_s1 + $0xf0] sm:$0xff] (!%p162_p2)   ;;  %v1802_v19 = vld [vmem:[%s2241_s1 + $0xf8] sm:$0xff] (!%p162_p2)   ;;  %v1806_v25 = vld [vmem:[%s2241_s1 + $0x100] sm:$0xff] (!%p162_p2)  }
   0xb   : > { %1580 = vmatpush3.bf16.msra.mxu1 (!%p162_p2), %v1790_v3  ;;  %v1801_v18 = vld [vmem:[%s2241_s1 + $0x30] sm:$0xff] (!%p162_p2)   ;;  %v1803_v20 = vld [vmem:[%s2241_s1 + $0x38] sm:$0xff] (!%p162_p2)   ;;  %v1807_v26 = vld [vmem:[%s2241_s1 + $0x140] sm:$0xff] (!%p162_p2)  }
   0xc   : > { %1600 = vmatpush3.bf16.msra.mxu0 (!%p162_p2), %v1791_v4  ;;  %1581 = vmatprep.subr.bf16.mxu1 (!%p162_p2), %v1871_v1  ;;  %v1808_v27 = vld [vmem:[%s2241_s1 + $0x108] sm:$0xff] (!%p162_p2)   ;;  %v1810_v29 = vld [vmem:[%s2241_s1 + $0x110] sm:$0xff] (!%p162_p2)   ;;  %v1812_v31 = vld [vmem:[%s2241_s1 + $0x118] sm:$0xff] (!%p162_p2)  }
   0xd   : > { %s2246_s16 = smov (!%p186_p3, %s1279_s16), 1  ;;  %1601 = vmatprep.subr.bf16.mxu0 %v1871_v1  ;;  %v1809_v28 = vld [vmem:[%s2241_s1 + $0x148] sm:$0xff]   ;;  %v1811_v30 = vld [vmem:[%s2241_s1 + $0x150] sm:$0xff]   ;;  %v1813_v32 = vld [vmem:[%s2241_s1 + $0x158] sm:$0xff]  }
   0xe   : > { %s1284_s5 = sshll.u32 %s2246_s16, 1  ;;  %v1814_v33 = vld [vmem:[%s2241_s1 + $0x120] sm:$0xff]   ;;  %v1816_v35 = vld [vmem:[%s2241_s1 + $0x128] sm:$0xff]   ;;  %v1818_v37 = vld [vmem:[%s2241_s1 + $0x130] sm:$0xff]   ;;  %s1495_s23 = sshll.u32 %s2246_s16, 2 }
   0xf   : > { %1582 = vmatpush3.bf16.msra.mxu1 %v1792_v5  ;;  %s189_s10 = scalar_lea.vmem %s2240_s0, %s1284_s5  ;;  %v1815_v34 = vld [vmem:[%s2241_s1 + $0x160] sm:$0xff]   ;;  %v1817_v36 = vld [vmem:[%s2241_s1 + $0x168] sm:$0xff]   ;;  %v1819_v38 = vld [vmem:[%s2241_s1 + $0x170] sm:$0xff]   ;;  %s194_s28 = scalar_lea.vmem %s2244_s4, %s1495_s23 }
  0x10   : > { %1602 = vmatpush3.bf16.msra.mxu0 %v1793_v6  ;;  %1583 = vmatprep.subr.bf16.mxu1 %v1871_v1  ;;  %v200_v11 = vld [vmem:[%s189_s10] sm:$0x1]  ;;  %v201_v12 = vld [vmem:[%s189_s10 + $0x1] sm:$0x1]  ;;  %v1820_v39 = vld [vmem:[%s2241_s1 + $0x138] sm:$0xff]  }
  0x11   : > { %1603 = vmatprep.subr.bf16.mxu0 %v1871_v1  ;;  %v202_v13 = vunpack.c.l.bf16 %v200_v11  ;;  %v203_v14 = vunpack.c.l.bf16 %v201_v12  ;;  %v1821_v40 = vld [vmem:[%s2241_s1 + $0x178] sm:$0xff]   ;;  %v1822_v41 = vld [vmem:[%s2241_s1 + $0x40] sm:$0xff]   ;;  %v1824_v43 = vld [vmem:[%s2241_s1 + $0x48] sm:$0xff]  }
  0x12   : > { %v1823_v42 = vld [vmem:[%s2241_s1 + $0x80] sm:$0xff]   ;;  %v1825_v44 = vld [vmem:[%s2241_s1 + $0x88] sm:$0xff]   ;;  %v1826_v45 = vld [vmem:[%s2241_s1 + $0x50] sm:$0xff]  }
  0x13   : > { %1584 = vmatpush3.bf16.msra.mxu1 %v1794_v7  ;;  %205 = vst [vmem:[#allocation2 + $0x5] sm:$0x3] %v202_v13  ;;  %206 = vst [vmem:[#allocation2 + $0x9] sm:$0x3] %v203_v14  ;;  %v1827_v46 = vld [vmem:[%s2241_s1 + $0x90] sm:$0xff]   ;;  %v1828_v47 = vld [vmem:[%s2241_s1 + $0x58] sm:$0xff]  }
  0x14   : > { %1604 = vmatpush3.bf16.msra.mxu0 %v1795_v8  ;;  %1585 = vmatprep.subr.bf16.mxu1 %v1871_v1  ;;  %v1829_v48 = vld [vmem:[%s2241_s1 + $0x98] sm:$0xff]   ;;  %v1830_v49 = vld [vmem:[%s2241_s1 + $0x60] sm:$0xff]   ;;  %v1832_v51 = vld [vmem:[%s2241_s1 + $0x68] sm:$0xff]  }
  0x15   : > { %1605 = vmatprep.subr.bf16.mxu0 %v1871_v1  ;;  %v1831_v50 = vld [vmem:[%s2241_s1 + $0xa0] sm:$0xff]   ;;  %v1833_v52 = vld [vmem:[%s2241_s1 + $0xa8] sm:$0xff]   ;;  %v1834_v53 = vld [vmem:[%s2241_s1 + $0x70] sm:$0xff]  }
  0x16   : > { %v1835_v54 = vld [vmem:[%s2241_s1 + $0xb0] sm:$0xff]   ;;  %v1836_v55 = vld [vmem:[%s2241_s1 + $0x78] sm:$0xff]   ;;  %v1839_v57 = vld [vmem:[%s2241_s1 + $0x1c0] sm:$0xff]  }
  0x17   : > { %1586 = vmatpush3.bf16.msra.mxu1 %v1796_v9  ;;  %v1837_v56 = vld [vmem:[%s2241_s1 + $0xb8] sm:$0xff]   ;;  %v1838_v58 = vld [vmem:[%s2241_s1 + $0x180] sm:$0xff]   ;;  %v1841_v59 = vld [vmem:[%s2241_s1 + $0x1c8] sm:$0xff]  }
  0x18   : > { %1606 = vmatpush3.bf16.msra.mxu0 %v1797_v10  ;;  %1587 = vmatprep.subr.bf16.mxu1 %v1871_v1  ;;  %v1840_v60 = vld [vmem:[%s2241_s1 + $0x188] sm:$0xff]   ;;  %v1843_v61 = vld [vmem:[%s2241_s1 + $0x1d0] sm:$0xff]   ;;  %v1845_v63 = vld [vmem:[%s2241_s1 + $0x1d8] sm:$0xff]  }
  0x19   : > { %1607 = vmatprep.subr.bf16.mxu0 %v1871_v1  ;;  %v1842_v62 = vld [vmem:[%s2241_s1 + $0x190] sm:$0xff]   ;;  %v1844_v0 = vld [vmem:[%s2241_s1 + $0x198] sm:$0xff]   ;;  %v1847_v2 = vld [vmem:[%s2241_s1 + $0x1e0] sm:$0xff]  }
  0x1a   : > { %v1804_v21 = vld [vmem:[#allocation2 + $0x4] sm:$0xff]   ;;  %v1851_v6 = vld [vmem:[%s2241_s1 + $0x1f0] sm:$0xff]   ;;  %v1853_v9 = vld [vmem:[%s2241_s1 + $0x1f8] sm:$0xff]  }
  0x1b   : > { %1588 = vmatpush3.bf16.msra.mxu1 %v1798_v15  ;;  %v1805_v22 = vld [vmem:[#allocation2] sm:$0xff]   ;;  %v270_v23 = vpack.c.bf16 %v1804_v21, %v1804_v21  ;;  %v1849_v4 = vld [vmem:[%s2241_s1 + $0x1e8] sm:$0xff]   ;;  %v1850_v7 = vld [vmem:[%s2241_s1 + $0x1b0] sm:$0xff]  }
  0x1c   : > { %1608 = vmatpush3.bf16.msra.mxu0 %v1799_v16  ;;  %1589 = vmatprep.subr.bf16.mxu1 %v1871_v1  ;;  %v1984_v24 = vpack.c.bf16 %v1805_v22, %v1805_v22  ;;  %v1846_v3 = vld [vmem:[%s2241_s1 + $0x1a0] sm:$0xff]   ;;  %v1848_v5 = vld [vmem:[%s2241_s1 + $0x1a8] sm:$0xff]   ;;  %v1852_v10 = vld [vmem:[%s2241_s1 + $0x1b8] sm:$0xff]  }
  0x1d   : > { %1609 = vmatprep.subr.bf16.mxu0 %v1871_v1  ;;  %v1854_v8 = vld [vmem:[#allocation2 + $0x8] sm:$0xff]   ;;  %v1855_v12 = vld [vmem:[%s2241_s1 + $0x200] sm:$0xff]   ;;  %v1857_v14 = vld [vmem:[%s2241_s1 + $0x210] sm:$0xff]  }
  0x1e   : > { %v857_v11 = vpack.c.bf16 %v1854_v8, %v1854_v8  ;;  %v1856_v13 = vld [vmem:[%s2241_s1 + $0x208] sm:$0xff]   ;;  %v1858_v15 = vld [vmem:[%s2241_s1 + $0x218] sm:$0xff]   ;;  %v1859_v16 = vld [vmem:[%s2241_s1 + $0x220] sm:$0xff]  }
  0x1f   : > { %1590 = vmatpush3.bf16.msra.mxu1 %v1800_v17  ;;  %v1860_v17 = vld [vmem:[%s2241_s1 + $0x228] sm:$0xff]  }
  0x20   : > { %1610 = vmatpush3.bf16.msra.mxu0 %v1801_v18  ;;  %1591 = vmatprep.subr.bf16.mxu1 %v1871_v1  ;;  %v1861_v18 = vld [vmem:[%s2241_s1 + $0x230] sm:$0xff]  }
  0x21   : > { %1611 = vmatprep.subr.bf16.mxu0 %v1871_v1 }
  0x23   : > { %1592 = vmatpush3.bf16.msra.mxu1 %v1802_v19  ;;  %v1862_v19 = vld [vmem:[%s2241_s1 + $0x238] sm:$0xff]  }
  0x24   : > { %1612 = vmatpush3.bf16.msra.mxu0 %v1803_v20  ;;  %1617 = vmatprep.subr.bf16.mxu1 %v1871_v1 }
  0x25   : > { %1657 = vmatprep.subr.bf16.mxu0 %v1871_v1 }
  0x26   : > { %1594 = vmatmul.mubr.bf16.vlgmr.msra.gmra.mrb[0].mxu1 %v270_v23 }
  0x27   : > { %1614 = vmatmul.mubr.bf16.vlgmr.msra.gmra.mrb[0].mxu0 %v1984_v24  ;;  %1618 = vmatpush3.bf16.msra.mxu1 %v1806_v25 }
  0x28   : > { %1658 = vmatpush3.bf16.msra.mxu0 %v1807_v26  ;;  %1619 = vmatprep.subr.bf16.mxu1 %v1871_v1 }
  0x29   : > { %1659 = vmatprep.subr.bf16.mxu0 %v1871_v1  ;;  %1633 = vmatprep.mubr.msk.bf16.mxu1 %vm1872_vm0, %v1871_v1 }
  0x2a   : > { %1673 = vmatprep.mubr.msk.bf16.mxu0 %vm1872_vm0, %v1871_v1 }
  0x2b   : > { %1620 = vmatpush3.bf16.msra.mxu1 %v1808_v27 }
  0x2c   : > { %1660 = vmatpush3.bf16.msra.mxu0 %v1809_v28  ;;  %1621 = vmatprep.subr.bf16.mxu1 %v1871_v1 }
  0x2d   : > { %1661 = vmatprep.subr.bf16.mxu0 %v1871_v1 }
  0x2f   : > { %1622 = vmatpush3.bf16.msra.mxu1 %v1810_v29 }
  0x30   : > { %1662 = vmatpush3.bf16.msra.mxu0 %v1811_v30  ;;  %1623 = vmatprep.subr.bf16.mxu1 %v1871_v1 }
  0x31   : > { %1663 = vmatprep.subr.bf16.mxu0 %v1871_v1 }
  0x33   : > { %1624 = vmatpush3.bf16.msra.mxu1 %v1812_v31 }
  0x34   : > { %1664 = vmatpush3.bf16.msra.mxu0 %v1813_v32  ;;  %1625 = vmatprep.subr.bf16.mxu1 %v1871_v1 }
  0x35   : > { %1665 = vmatprep.subr.bf16.mxu0 %v1871_v1 }
  0x37   : > { %1626 = vmatpush3.bf16.msra.mxu1 %v1814_v33 }
  0x38   : > { %1666 = vmatpush3.bf16.msra.mxu0 %v1815_v34  ;;  %1627 = vmatprep.subr.bf16.mxu1 %v1871_v1 }
  0x39   : > { %1667 = vmatprep.subr.bf16.mxu0 %v1871_v1 }
  0x3b   : > { %1628 = vmatpush3.bf16.msra.mxu1 %v1816_v35 }
  0x3c   : > { %1668 = vmatpush3.bf16.msra.mxu0 %v1817_v36  ;;  %1629 = vmatprep.subr.bf16.mxu1 %v1871_v1 }
  0x3d   : > { %1669 = vmatprep.subr.bf16.mxu0 %v1871_v1 }
  0x3f   : > { %1630 = vmatpush3.bf16.msra.mxu1 %v1818_v37 }
  0x40   : > { %1670 = vmatpush3.bf16.msra.mxu0 %v1819_v38  ;;  %1631 = vmatprep.subr.bf16.mxu1 %v1871_v1 }
  0x41   : > { %1671 = vmatprep.subr.bf16.mxu0 %v1871_v1 }
  0x43   : > { %1632 = vmatpush3.bf16.msra.mxu1 %v1820_v39 }
  0x44   : > { %1672 = vmatpush3.bf16.msra.mxu0 %v1821_v40  ;;  %1637 = vmatprep.subr.bf16.mxu1 %v1871_v1 }
  0x45   : > { %1677 = vmatprep.subr.bf16.mxu0 %v1871_v1 }
  0x46   : > { %1634 = vmatmul.mubr.bf16.vlgmr.msra.gmra.mrb[4].mxu1 %v270_v23 }
  0x47   : > { %1638 = vmatpush3.bf16.msra.mxu1 %v1822_v41  ;;  %1674 = vmatmul.mubr.bf16.vlgmr.msra.gmra.mrb[4].mxu0 %v270_v23 }
  0x48   : > { %1678 = vmatpush3.bf16.msra.mxu0 %v1823_v42  ;;  %1639 = vmatprep.subr.bf16.mxu1 %v1871_v1  ;;  %v1491_v42 = vld [vmem:[%s2242_s2] ss:$0 sm:$0xff] }
  0x49   : > { %1679 = vmatprep.subr.bf16.mxu0 %v1871_v1  ;;  %1653 = vmatprep.mubr.msk.bf16.mxu1 %vm1872_vm0, %v1871_v1 }
  0x4a   : > { %1693 = vmatprep.mubr.msk.bf16.mxu0 %vm1872_vm0, %v1871_v1 }
  0x4b   : > { %1640 = vmatpush3.bf16.msra.mxu1 %v1824_v43 }
  0x4c   : > { %1680 = vmatpush3.bf16.msra.mxu0 %v1825_v44  ;;  %1641 = vmatprep.subr.bf16.mxu1 %v1871_v1 }
  0x4d   : > { %1681 = vmatprep.subr.bf16.mxu0 %v1871_v1 }
  0x4f   : > { %1642 = vmatpush3.bf16.msra.mxu1 %v1826_v45 }
  0x50   : > { %1682 = vmatpush3.bf16.msra.mxu0 %v1827_v46  ;;  %1643 = vmatprep.subr.bf16.mxu1 %v1871_v1 }
  0x51   : > { %1683 = vmatprep.subr.bf16.mxu0 %v1871_v1 }
  0x53   : > { %1644 = vmatpush3.bf16.msra.mxu1 %v1828_v47  ;;  %v1492_v47 = vld [vmem:[%s2243_s3] ss:$0 sm:$0xff] }
  0x54   : > { %1684 = vmatpush3.bf16.msra.mxu0 %v1829_v48  ;;  %1645 = vmatprep.subr.bf16.mxu1 %v1871_v1 }
  0x55   : > { %1685 = vmatprep.subr.bf16.mxu0 %v1871_v1 }
  0x57   : > { %1646 = vmatpush3.bf16.msra.mxu1 %v1830_v49 }
  0x58   : > { %1686 = vmatpush3.bf16.msra.mxu0 %v1831_v50  ;;  %1647 = vmatprep.subr.bf16.mxu1 %v1871_v1 }
  0x59   : > { %1687 = vmatprep.subr.bf16.mxu0 %v1871_v1 }
  0x5b   : > { %1648 = vmatpush3.bf16.msra.mxu1 %v1832_v51 }
  0x5c   : > { %1688 = vmatpush3.bf16.msra.mxu0 %v1833_v52  ;;  %1649 = vmatprep.subr.bf16.mxu1 %v1871_v1 }
  0x5d   : > { %1689 = vmatprep.subr.bf16.mxu0 %v1871_v1 }
  0x5f   : > { %1650 = vmatpush3.bf16.msra.mxu1 %v1834_v53 }
  0x60   : > { %1690 = vmatpush3.bf16.msra.mxu0 %v1835_v54  ;;  %1651 = vmatprep.subr.bf16.mxu1 %v1871_v1 }
  0x61   : > { %1691 = vmatprep.subr.bf16.mxu0 %v1871_v1 }
  0x63   : > { %1652 = vmatpush3.bf16.msra.mxu1 %v1836_v55 }
  0x64   : > { %1692 = vmatpush3.bf16.msra.mxu0 %v1837_v56  ;;  %1717 = vmatprep.subr.bf16.mxu1 %v1871_v1 }
  0x65   : > { %1697 = vmatprep.subr.bf16.mxu0 %v1871_v1 }
  0x66   : > { %1654 = vmatmul.mubr.bf16.vlgmr.msra.gmra.mrb[4].mxu1 %v1984_v24 }
  0x67   : > { %1694 = vmatmul.mubr.bf16.vlgmr.msra.gmra.mrb[4].mxu0 %v1984_v24  ;;  %1718 = vmatpush3.bf16.msra.mxu1 %v1839_v57 }
  0x68   : > { %1698 = vmatpush3.bf16.msra.mxu0 %v1838_v58  ;;  %1719 = vmatprep.subr.bf16.mxu1 %v1871_v1 }
  0x69   : > { %1699 = vmatprep.subr.bf16.mxu0 %v1871_v1  ;;  %1713 = vmatprep.mubr.msk.bf16.mxu0 %vm1872_vm0, %v1871_v1 }
  0x6a   : > { %1733 = vmatprep.mubr.msk.bf16.mxu1 %vm1872_vm0, %v1871_v1 }
  0x6b   : > { %1720 = vmatpush3.bf16.msra.mxu1 %v1841_v59 }
  0x6c   : > { %1700 = vmatpush3.bf16.msra.mxu0 %v1840_v60  ;;  %1721 = vmatprep.subr.bf16.mxu1 %v1871_v1 }
  0x6d   : > { %1701 = vmatprep.subr.bf16.mxu0 %v1871_v1 }
  0x6f   : > { %1722 = vmatpush3.bf16.msra.mxu1 %v1843_v61 }
  0x70   : > { %1702 = vmatpush3.bf16.msra.mxu0 %v1842_v62  ;;  %1723 = vmatprep.subr.bf16.mxu1 %v1871_v1 }
  0x71   : > { %1703 = vmatprep.subr.bf16.mxu0 %v1871_v1 }
  0x73   : > { %1724 = vmatpush3.bf16.msra.mxu1 %v1845_v63 }
  0x74   : > { %1704 = vmatpush3.bf16.msra.mxu0 %v1844_v0  ;;  %1725 = vmatprep.subr.bf16.mxu1 %v1871_v1 }
  0x75   : > { %1705 = vmatprep.subr.bf16.mxu0 %v1871_v1 }
  0x77   : > { %1726 = vmatpush3.bf16.msra.mxu1 %v1847_v2 }
  0x78   : > { %1706 = vmatpush3.bf16.msra.mxu0 %v1846_v3  ;;  %1727 = vmatprep.subr.bf16.mxu1 %v1871_v1 }
  0x79   : > { %1707 = vmatprep.subr.bf16.mxu0 %v1871_v1 }
  0x7b   : > { %1728 = vmatpush3.bf16.msra.mxu1 %v1849_v4 }
  0x7c   : > { %1708 = vmatpush3.bf16.msra.mxu0 %v1848_v5  ;;  %1729 = vmatprep.subr.bf16.mxu1 %v1871_v1 }
  0x7d   : > { %1709 = vmatprep.subr.bf16.mxu0 %v1871_v1 }
  0x7f   : > { %1730 = vmatpush3.bf16.msra.mxu1 %v1851_v6 }
  0x80   : > { %1710 = vmatpush3.bf16.msra.mxu0 %v1850_v7  ;;  %1731 = vmatprep.subr.bf16.mxu1 %v1871_v1 }
  0x81   : > { %1711 = vmatprep.subr.bf16.mxu0 %v1871_v1 }
  0x83   : > { %1732 = vmatpush3.bf16.msra.mxu1 %v1853_v9 }
  0x84   : > { %1712 = vmatpush3.bf16.msra.mxu0 %v1852_v10 }
  0x85   : > { %1737 = vmatprep.subr.bf16.mxu0 %v1871_v1 }
  0x86   : > { %1734 = vmatmul.mubr.bf16.vlgmr.msra.gmra.mrb[4].mxu1 %v857_v11 }
  0x87   : > { %1714 = vmatmul.mubr.bf16.vlgmr.msra.gmra.mrb[0].mxu0 %v857_v11 }
  0x88   : > { %1738 = vmatpush3.bf16.msra.mxu0 %v1855_v12  ;;  %1753 = vmatprep.mubr.msk.bf16.mxu0 %vm1872_vm0, %v1871_v1 }
  0x89   : > { %1739 = vmatprep.subr.bf16.mxu0 %v1871_v1 }
  0x8c   : > { %1740 = vmatpush3.bf16.msra.mxu0 %v1856_v13 }
  0x8d   : > { %1741 = vmatprep.subr.bf16.mxu0 %v1871_v1 }
  0x90   : > { %1742 = vmatpush3.bf16.msra.mxu0 %v1857_v14 }
  0x91   : > { %1743 = vmatprep.subr.bf16.mxu0 %v1871_v1 }
  0x94   : > { %1744 = vmatpush3.bf16.msra.mxu0 %v1858_v15 }
  0x95   : > { %1745 = vmatprep.subr.bf16.mxu0 %v1871_v1 }
  0x98   : > { %1746 = vmatpush3.bf16.msra.mxu0 %v1859_v16 }
  0x99   : > { %1747 = vmatprep.subr.bf16.mxu0 %v1871_v1 }
  0x9c   : > { %1748 = vmatpush3.bf16.msra.mxu0 %v1860_v17 }
  0x9d   : > { %1749 = vmatprep.subr.bf16.mxu0 %v1871_v1 }
  0xa0   : > { %1750 = vmatpush3.bf16.msra.mxu0 %v1861_v18 }
  0xa1   : > { %1751 = vmatprep.subr.bf16.mxu0 %v1871_v1 }
  0xa4   : > { %1752 = vmatpush3.bf16.msra.mxu0 %v1862_v19 }
  0xa7   : > { %1754 = vmatmul.mubr.bf16.vlgmr.msra.gmra.mrb[4].mxu0 %v857_v11 }
  0xf9   : > { %v370_v20 = vpop.f32.mrb[0].mxu1 }
  0xfa   : > { %v1595_v21 = vpop.f32.mrb[1].mxu1 }
  0xfb   : > { %v373_v22 = vpop.f32.mrb[2].mxu1 }
  0xfc   : > { %v1596_v23 = vpop.f32.mrb[3].mxu1 }
 0x159   : > { %v1063_v24 = vpop.f32.mrb[4].mxu1 }
 0x15a   : > { %v957_v25 = vpop.f32.mrb[0].mxu0  ;;  %v1180_v26 = vcombine.high %v1063_v24, %v1063_v24  ;;  %v1487_v27 = vrot.slane %v1063_v24, 9  ;;  %v1735_v28 = vpop.f32.mrb[5].mxu1 }
 0x15b   : > { %v1757_v29 = vadd.f32 %v957_v25, %v370_v20  ;;  %v1715_v30 = vpop.f32.mrb[1].mxu0  ;;  %v1066_v31 = vpop.f32.mrb[6].mxu1 }
 0x15c   : > { %v1488_v32 = vrot.slane %v1180_v26, 9  ;;  %v960_v33 = vpop.f32.mrb[2].mxu0  ;;  %v1736_v34 = vpop.f32.mrb[7].mxu1 }
 0x15d   : > { %v1177_v35 = vcombine.high %v1757_v29, %v1757_v29  ;;  %v1187_v1 = vadd.f32 %v1757_v29, %v1487_v27  ;;  %v1716_v36 = vpop.f32.mrb[3].mxu0 }
 0x15f   : > { %v1188_v37 = vadd.f32 %v1488_v32, %v1177_v35 }
 0x17a   : > { %v1169_v38 = vpop.f32.mrb[4].mxu0 }
 0x17b   : > { %v1190_v39 = vcombine.high %v1169_v38, %v1169_v38  ;;  %v1489_v40 = vrot.slane %v1169_v38, 10  ;;  %v1755_v41 = vpop.f32.mrb[5].mxu0 }
 0x17c   : > { %v1172_v43 = vpop.f32.mrb[6].mxu0 }
 0x17d   : > { %v1490_v44 = vrot.slane %v1190_v39, 10  ;;  %v1197_v45 = vadd.f32 %v1489_v40, %v1187_v1  ;;  %v1756_v46 = vpop.f32.mrb[7].mxu0 }
 0x17f   : > { %v1198_v48 = vadd.f32 %v1490_v44, %v1188_v37  ;;  %v1206_v49 = vadd.f32 %v1491_v42, %v1197_v45 }
 0x181   : > { %v1207_v50 = vadd.f32 %v1491_v42, %v1198_v48  ;;  %vm1209_vm1 = vcmp.gt.f32.partialorder %v1206_v49, 0.0  ;;  %v1217_v51 = vmul.f32 %v1492_v47, %v1206_v49 }
 0x183   : > { %vm1210_vm3 = vcmp.gt.f32.partialorder %v1207_v50, 0.0  ;;  %v1218_v52 = vmul.f32 %v1492_v47, %v1207_v50  ;;  %v1219_v53 = vsel %vm1209_vm1, %v1206_v49, %v1217_v51 }
 0x184   : > { %1222 = vst.msk [vmem:[%s194_s28] sm:$0x3] %vm1221_vm2, %v1219_v53 }
 0x185   : > { %v1220_v54 = vsel %vm1210_vm3, %v1207_v50, %v1218_v52 }
 0x186   : > { %1223 = vst.msk [vmem:[%s194_s28 + $0x2] sm:$0x3] %vm1221_vm2, %v1220_v54 }
 0x187 PF: > { %s14_s15 = sadd.s32 1, %s1869_s15  }
 0x188   : > { %p11_p4 = scmp.ge.s32.totalorder %s14_s15, 4  }
 0x18a   :  { %13 = sbr.rel (!%p11_p4) target bundleno = 1 (0x1), region = 76 }

// kernel: multiscale_flow_forward.19
= control target key start
LH: loop header
LB: loop body
LE: loop exit
PB: predicated region body
PF: predicated region fallthrough
CT: control target
= control target key end

     0   :  { %s2673_s15 = smov 0   ;;  %s3052_s0 = inlined_call_operand.vmem [shape: bf16[2,4,4,128], index: 0, kind: input, shape index: {}]   ;;  %s3053_s1 = inlined_call_operand.vmem [shape: bf16[3,3,128,128], index: 1, kind: input, shape index: {}]   ;;  %s3054_s2 = inlined_call_operand.vmem [shape: f32[1,128], index: 2, kind: input, shape index: {}]   ;;  %s3055_s3 = inlined_call_operand.vmem [shape: f32[1,128], index: 3, kind: input, shape index: {}]   ;;  %s3056_s4 = inlined_call_operand.vmem [shape: bf16[2,4,4,128], index: 4, kind: output, shape index: {}]  }
   0x1 LB: > { %s2032_s16 = sadd.s32 4294967295, %s2644_s15   ;;  %p2036_p0 = scmp.ge.s32.totalorder %s2644_s15, 1  ;;  %s2644_s15 = sphi %s2673_s15, %s14_s15  }
   0x2   : > { %p162_p1 = scmp.lt.s32.totalorder %s2644_s15, 3 }
   0x4   : > { %p163_p2 = pnand %p2036_p0, %p162_p1 }
   0x5   : > { %v2554_v0 = vld [vmem:[%s3053_s1 + $0xc0] sm:$0xff] (!%p163_p2)   ;;  %v2556_v2 = vld [vmem:[%s3053_s1 + $0xc8] sm:$0xff] (!%p163_p2)   ;;  %p2690_p3 = scmp.lt.s32.totalorder (!%p163_p2), %s2032_s16, 1  ;;  %v2646_v3 = vmov (!%p163_p2), 0.0   ;;  %v2558_v5 = vld [vmem:[%s3053_s1 + $0xd0] sm:$0xff] (!%p163_p2)   ;;  %v230_v10 = vlaneseq (!%p163_p2)  ;;  %vm1742_vm0 = vcmask (!%p163_p2), 1040384  }
   0x6   : > { %166 = sbr.rel (%p163_p2) target bundleno = 414 (0x19e), region = 36  ;;  %v2555_v1 = vld [vmem:[%s3053_s1] sm:$0xff] (!%p163_p2)   ;;  %2341 = vmatprep.subr.bf16.mxu1 (!%p163_p2), %v2554_v0  ;;  %200 = vst [vmem:[#allocation2 + $0x8] sm:$0x3f] (!%p163_p2), %v2646_v3  ;;  %201 = vst [vmem:[#allocation2 + $0x10] sm:$0x3f] (!%p163_p2), %v2646_v3 }
   0x7   : > { %202 = vst [vmem:[#allocation2 + $0x18] sm:$0x3f] (!%p163_p2), %v2646_v3  ;;  %199 = vst [vmem:[#allocation2] sm:$0x3f] (!%p163_p2), %v2646_v3  ;;  %2361 = vmatprep.subr.bf16.mxu0 (!%p163_p2), %v2555_v1  ;;  %2342 = vmatpush3.bf16.msra.mxu1 (!%p163_p2), %v2554_v0  ;;  %v2557_v4 = vld [vmem:[%s3053_s1 + $0x8] sm:$0xff] (!%p163_p2)   ;;  %v2559_v6 = vld [vmem:[%s3053_s1 + $0x10] sm:$0xff] (!%p163_p2)  }
   0x8   : > { %203 = vst [vmem:[#allocation2 + $0x20] sm:$0x3f] (!%p163_p2), %v2646_v3  ;;  %204 = vst [vmem:[#allocation2 + $0x28] sm:$0x3f] (!%p163_p2), %v2646_v3  ;;  %2362 = vmatpush3.bf16.msra.mxu0 (!%p163_p2), %v2555_v1  ;;  %2343 = vmatprep.subr.bf16.mxu1 (!%p163_p2), %v2556_v2  ;;  %v2560_v7 = vld [vmem:[%s3053_s1 + $0xd8] sm:$0xff] (!%p163_p2)   ;;  %v2562_v9 = vld [vmem:[%s3053_s1 + $0xe0] sm:$0xff] (!%p163_p2)  }
   0x9   : > { %2363 = vmatprep.subr.bf16.mxu0 (!%p163_p2), %v2557_v4  ;;  %v2561_v8 = vld [vmem:[%s3053_s1 + $0x18] sm:$0xff] (!%p163_p2)   ;;  %v2563_v11 = vld [vmem:[%s3053_s1 + $0x20] sm:$0xff] (!%p163_p2)   ;;  %v2564_v12 = vld [vmem:[%s3053_s1 + $0xe8] sm:$0xff] (!%p163_p2)   ;;  %v231_v15 = vshrl.u32 (!%p163_p2), %v230_v10, 7  ;;  %v2647_v18 = vmov (!%p163_p2), 1983009808  }
   0xa   : > { %v2565_v13 = vld [vmem:[%s3053_s1 + $0x28] sm:$0xff] (!%p163_p2)   ;;  %v228_v19 = vunpack.c.l.s4 (!%p163_p2), %v2647_v18  ;;  %v2566_v22 = vld [vmem:[%s3053_s1 + $0xf0] sm:$0xff] (!%p163_p2)   ;;  %v2568_v27 = vld [vmem:[%s3053_s1 + $0xf8] sm:$0xff] (!%p163_p2)   ;;  %vm1743_vm1 = vcmask (!%p163_p2), 1042434   ;;  %vm1745_vm3 = vcmask (!%p163_p2), 1044484   ;;  %vm1747_vm5 = vcmask (!%p163_p2), 1046534  }
   0xb   : > { %2344 = vmatpush3.bf16.msra.mxu1 (!%p163_p2), %v2556_v2  ;;  %v2567_v23 = vld [vmem:[%s3053_s1 + $0x30] sm:$0xff] (!%p163_p2)   ;;  %v2569_v28 = vld [vmem:[%s3053_s1 + $0x38] sm:$0xff] (!%p163_p2)   ;;  %v2756_v47 = vld [vmem:[%s3053_s1 + $0x100] sm:$0xff] (!%p163_p2)  }
   0xc   : > { %2364 = vmatpush3.bf16.msra.mxu0 (!%p163_p2), %v2557_v4  ;;  %2345 = vmatprep.subr.bf16.mxu1 (!%p163_p2), %v2558_v5  ;;  %v229_v20 = vunpack.c.0.s8 (!%p163_p2), %v228_v19  ;;  %v2763_v52 = vld [vmem:[%s3053_s1 + $0x140] sm:$0xff] (!%p163_p2)   ;;  %vm1744_vm2 = vmor (!%p163_p2), %vm1742_vm0, %vm1743_vm1 }
   0xd   : > { %s3063_s16 = smov (!%p2690_p3, %s2032_s16), 1  ;;  %2365 = vmatprep.subr.bf16.mxu0 %v2559_v6  ;;  %vm2991_vm4 = vmor %vm1744_vm2, %vm1745_vm3 }
   0xe   : > { %s2249_s8 = sshll.u32 %s3063_s16, 3  ;;  %v218_v21 = vld [vmem:[#allocation2] sm:$0x3f]  ;;  %v2737_v24 = vsub.s32 %v229_v20, %v231_v15  ;;  %vm2998_vm6 = vmor %vm2991_vm4, %vm1747_vm5 }
   0xf   : > { %2346 = vmatpush3.bf16.msra.mxu1 %v2558_v5  ;;  %s192_s17 = scalar_lea.vmem %s3052_s0, %s2249_s8  ;;  %v226_v25 = vcombine.high %v218_v21, %v218_v21  ;;  %s197_s7 = scalar_lea.vmem %s3056_s4, %s2249_s8 }
  0x10   : > { %2366 = vmatpush3.bf16.msra.mxu0 %v2559_v6  ;;  %2347 = vmatprep.subr.bf16.mxu1 %v2560_v7  ;;  %v205_v14 = vld [vmem:[%s192_s17] sm:$0xff]   ;;  %v233_v26 = vrot.slane %v218_v21, %v2737_v24 }
  0x11   : > { %2367 = vmatprep.subr.bf16.mxu0 %v2561_v8  ;;  %v209_v16 = vunpack.c.l.bf16 %v205_v14  ;;  %v211_v17 = vunpack.c.h.bf16 %v205_v14  ;;  %v240_v32 = vrot.slane %v226_v25, %v2737_v24 }
  0x12   : > { %v241_v33 = vcombine.high %v233_v26, %v233_v26 }
  0x13   : > { %2348 = vmatpush3.bf16.msra.mxu1 %v2560_v7  ;;  %214 = vst [vmem:[#allocation2 + $0x9] ss:$8 sps:$4 sm:$0xff] %v209_v16   ;;  %216 = vst [vmem:[#allocation2 + $0x19] sm:$0xf] %v211_v17 }
  0x14   : > { %2368 = vmatpush3.bf16.msra.mxu0 %v2561_v8  ;;  %2349 = vmatprep.subr.bf16.mxu1 %v2562_v9  ;;  %217 = vst [vmem:[#allocation2 + $0x1d] sm:$0xf0] %v211_v17  ;;  %v290_v56 = vcombine.low %v233_v26, %v241_v33 }
  0x15   : > { %2369 = vmatprep.subr.bf16.mxu0 %v2563_v11 }
  0x16   : > { %v298_v1 = vrot.slane %v290_v56, %v2737_v24  ;;  %v2597_v56 = vld [vmem:[%s3053_s1 + $0x88] sm:$0xff]  }
  0x17   : > { %2350 = vmatpush3.bf16.msra.mxu1 %v2562_v9 }
  0x18   : > { %2370 = vmatpush3.bf16.msra.mxu0 %v2563_v11  ;;  %2351 = vmatprep.subr.bf16.mxu1 %v2564_v12 }
  0x19   : > { %2371 = vmatprep.subr.bf16.mxu0 %v2565_v13 }
  0x1a   : > { %v396_v29 = vld [vmem:[#allocation2 + $0x8] sm:$0x3f]  ;;  %v397_v30 = vld [vmem:[#allocation2 + $0x10] sm:$0x3f]  ;;  %v398_v31 = vld [vmem:[#allocation2 + $0x18] sm:$0x3f] }
  0x1b   : > { %2352 = vmatpush3.bf16.msra.mxu1 %v2564_v12  ;;  %v404_v34 = vcombine.high %v396_v29, %v396_v29  ;;  %v411_v35 = vrot.slane %v396_v29, %v2737_v24  ;;  %v420_v36 = vcombine.high %v397_v30, %v397_v30  ;;  %v427_v37 = vrot.slane %v397_v30, %v2737_v24  ;;  %v219_v38 = vld [vmem:[#allocation2 + $0x8] sm:$0x3f]  ;;  %v220_v39 = vld [vmem:[#allocation2 + $0x10] sm:$0x3f]  ;;  %v399_v61 = vld [vmem:[#allocation2 + $0x20] sm:$0x3f] }
  0x1c   : > { %2372 = vmatpush3.bf16.msra.mxu0 %v2565_v13  ;;  %2353 = vmatprep.subr.bf16.mxu1 %v2566_v22  ;;  %v443_v40 = vrot.slane %v398_v31, %v2737_v24  ;;  %v242_v41 = vcombine.high %v219_v38, %v219_v38  ;;  %v249_v42 = vrot.slane %v219_v38, %v2737_v24  ;;  %v221_v6 = vld [vmem:[#allocation2 + $0x18] sm:$0x3f] }
  0x1d   : > { %2373 = vmatprep.subr.bf16.mxu0 %v2567_v23  ;;  %v418_v43 = vrot.slane %v404_v34, %v2737_v24  ;;  %v419_v44 = vcombine.high %v411_v35, %v411_v35  ;;  %v434_v45 = vrot.slane %v420_v36, %v2737_v24  ;;  %v435_v46 = vcombine.high %v427_v37, %v427_v37 }
  0x1e   : > { %v451_v48 = vcombine.high %v443_v40, %v443_v40  ;;  %v256_v49 = vrot.slane %v242_v41, %v2737_v24  ;;  %v257_v50 = vcombine.high %v249_v42, %v249_v42  ;;  %v265_v51 = vrot.slane %v220_v39, %v2737_v24  ;;  %v2582_v41 = vld [vmem:[%s3053_s1 + $0x110] sm:$0xff]  }
  0x1f   : > { %2354 = vmatpush3.bf16.msra.mxu1 %v2566_v22  ;;  %v468_v53 = vcombine.low %v411_v35, %v419_v44  ;;  %v469_v54 = vcombine.low %v418_v43, %v427_v37  ;;  %v485_v55 = vcombine.low %v435_v46, %v434_v45  ;;  %v291_v59 = vcombine.low %v240_v32, %v249_v42  ;;  %v2580_v37 = vld [vmem:[%s3053_s1 + $0x108] sm:$0xff]   ;;  %v2583_v42 = vld [vmem:[%s3053_s1 + $0x150] sm:$0xff]   ;;  %v2584_v43 = vld [vmem:[%s3053_s1 + $0x118] sm:$0xff]  }
  0x20   : > { %2374 = vmatpush3.bf16.msra.mxu0 %v2567_v23  ;;  %2355 = vmatprep.subr.bf16.mxu1 %v2568_v27  ;;  %v486_v57 = vcombine.low %v443_v40, %v451_v48  ;;  %v273_v58 = vcombine.high %v265_v51, %v265_v51  ;;  %v307_v60 = vcombine.low %v257_v50, %v256_v49  ;;  %v2581_v40 = vld [vmem:[%s3053_s1 + $0x148] sm:$0xff]   ;;  %v2585_v44 = vld [vmem:[%s3053_s1 + $0x158] sm:$0xff]   ;;  %v2586_v45 = vld [vmem:[%s3053_s1 + $0x120] sm:$0xff]  }
  0x21   : > { %2375 = vmatprep.subr.bf16.mxu0 %v2569_v28  ;;  %v476_v62 = vrot.slane %v468_v53, %v2737_v24  ;;  %v483_v63 = vrot.slane %v469_v54, %v2737_v24  ;;  %v493_v0 = vrot.slane %v485_v55, %v2737_v24  ;;  %v305_v3 = vrot.slane %v291_v59, %v2737_v24  ;;  %v2587_v46 = vld [vmem:[%s3053_s1 + $0x160] sm:$0xff]   ;;  %v2589_v48 = vld [vmem:[%s3053_s1 + $0x168] sm:$0xff]   ;;  %v2590_v49 = vld [vmem:[%s3053_s1 + $0x130] sm:$0xff]  }
  0x22   : > { %v500_v2 = vrot.slane %v486_v57, %v2737_v24  ;;  %v308_v4 = vcombine.low %v265_v51, %v273_v58  ;;  %v315_v5 = vrot.slane %v307_v60, %v2737_v24  ;;  %v436_v8 = vcombine.high %v398_v31, %v398_v31  ;;  %v2591_v50 = vld [vmem:[%s3053_s1 + $0x170] sm:$0xff]   ;;  %v2592_v51 = vld [vmem:[%s3053_s1 + $0x138] sm:$0xff]   ;;  %v2594_v53 = vld [vmem:[%s3053_s1 + $0x40] sm:$0xff]  }
  0x23   : > { %2356 = vmatpush3.bf16.msra.mxu1 %v2568_v27  ;;  %v484_v7 = vcombine.low %v476_v62, %v483_v63  ;;  %v452_v9 = vcombine.high %v399_v61, %v399_v61  ;;  %v459_v10 = vrot.slane %v399_v61, %v2737_v24  ;;  %v306_v12 = vcombine.low %v298_v1, %v305_v3  ;;  %v2595_v54 = vld [vmem:[%s3053_s1 + $0x80] sm:$0xff]   ;;  %v2596_v55 = vld [vmem:[%s3053_s1 + $0x48] sm:$0xff]   ;;  %v2598_v57 = vld [vmem:[%s3053_s1 + $0x50] sm:$0xff]  }
  0x24   : > { %2376 = vmatpush3.bf16.msra.mxu0 %v2569_v28  ;;  %2381 = vmatprep.subr.bf16.mxu1 %v2756_v47  ;;  %v501_v11 = vcombine.low %v493_v0, %v500_v2  ;;  %v322_v13 = vrot.slane %v308_v4, %v2737_v24  ;;  %v258_v14 = vcombine.high %v220_v39, %v220_v39  ;;  %v2599_v58 = vld [vmem:[%s3053_s1 + $0x90] sm:$0xff]   ;;  %v2600_v59 = vld [vmem:[%s3053_s1 + $0x58] sm:$0xff]   ;;  %v2858_v62 = vld [vmem:[#allocation2 + $0x20] sm:$0x3f] }
  0x25   : > { %2421 = vmatprep.subr.bf16.mxu0 %v2763_v52  ;;  %v450_v15 = vrot.slane %v436_v8, %v2737_v24  ;;  %v466_v16 = vrot.slane %v452_v9, %v2737_v24  ;;  %v467_v17 = vcombine.high %v459_v10, %v459_v10  ;;  %v274_v18 = vcombine.high %v221_v6, %v221_v6  ;;  %v1152_v60 = vld [vmem:[#allocation2 + $0x10] sm:$0x3f]  ;;  %v1153_v61 = vld [vmem:[#allocation2 + $0x18] sm:$0x3f]  ;;  %v2602_v1 = vld [vmem:[%s3053_s1 + $0x60] sm:$0xff]  }
  0x26   : > { %v522_v19 = vpack.c.bf16 %v501_v11, %v484_v7  ;;  %v323_v20 = vcombine.low %v315_v5, %v322_v13  ;;  %v272_v21 = vrot.slane %v258_v14, %v2737_v24  ;;  %v281_v22 = vrot.slane %v221_v6, %v2737_v24  ;;  %v2601_v63 = vld [vmem:[%s3053_s1 + $0x98] sm:$0xff]   ;;  %v2603_v6 = vld [vmem:[%s3053_s1 + $0xa0] sm:$0xff]   ;;  %v2604_v8 = vld [vmem:[%s3053_s1 + $0x68] sm:$0xff]  }
  0x27   : > { %v502_v23 = vcombine.low %v450_v15, %v459_v10  ;;  %v503_v25 = vcombine.low %v467_v17, %v466_v16  ;;  %v288_v26 = vrot.slane %v274_v18, %v2737_v24  ;;  %v1160_v0 = vcombine.high %v1152_v60, %v1152_v60  ;;  %v2605_v13 = vld [vmem:[%s3053_s1 + $0xa8] sm:$0xff]   ;;  %v2606_v14 = vld [vmem:[%s3053_s1 + $0x70] sm:$0xff]  }
  0x28   : > { %2357 = vmatprep.mubr.bf16.mxu1 %v522_v19  ;;  %v2781_v27 = vpack.c.bf16 %v323_v20, %v306_v12  ;;  %v289_v28 = vcombine.high %v281_v22, %v281_v22  ;;  %v324_v29 = vcombine.low %v272_v21, %v281_v22  ;;  %v1167_v2 = vrot.slane %v1152_v60, %v2737_v24  ;;  %v2608_v20 = vld [vmem:[%s3053_s1 + $0x78] sm:$0xff]   ;;  %v2631_v60 = vld [vmem:[%s3053_s1 + $0x208] sm:$0xff]  }
  0x29   : > { %v510_v30 = vrot.slane %v502_v23, %v2737_v24  ;;  %v517_v31 = vrot.slane %v503_v25, %v2737_v24  ;;  %v1176_v3 = vcombine.high %v1153_v61, %v1153_v61  ;;  %v1183_v4 = vrot.slane %v1153_v61, %v2737_v24  ;;  %v2632_v61 = vld [vmem:[%s3053_s1 + $0x210] sm:$0xff]  }
  0x2a   : > { %2377 = vmatprep.mubr.bf16.mxu0 %v2781_v27  ;;  %v325_v32 = vcombine.low %v289_v28, %v288_v26  ;;  %v332_v33 = vrot.slane %v324_v29, %v2737_v24  ;;  %v1199_v5 = vrot.slane %v2858_v62, %v2737_v24  ;;  %v1174_v7 = vrot.slane %v1160_v0, %v2737_v24  ;;  %v2609_v26 = vld [vmem:[%s3053_s1 + $0xb8] sm:$0xff]   ;;  %v2635_v0 = vld [vmem:[%s3053_s1 + $0x228] sm:$0xff]  }
  0x2b   : > { %v518_v34 = vcombine.low %v510_v30, %v517_v31  ;;  %v1175_v9 = vcombine.high %v1167_v2, %v1167_v2  ;;  %v1190_v10 = vrot.slane %v1176_v3, %v2737_v24  ;;  %v1191_v11 = vcombine.high %v1183_v4, %v1183_v4  ;;  %v2610_v30 = vld [vmem:[%s3053_s1 + $0x180] sm:$0xff]   ;;  %v2613_v31 = vld [vmem:[%s3053_s1 + $0x1c8] sm:$0xff]  }
  0x2c   : > { %v339_v35 = vrot.slane %v325_v32, %v2737_v24  ;;  %v1207_v12 = vcombine.high %v1199_v5, %v1199_v5  ;;  %v1225_v16 = vcombine.low %v1174_v7, %v1183_v4 }
  0x2d   : > { %v523_v36 = vpack.c.bf16 %v518_v34, %v518_v34  ;;  %v1224_v15 = vcombine.low %v1167_v2, %v1175_v9  ;;  %v1241_v17 = vcombine.low %v1191_v11, %v1190_v10  ;;  %v2615_v34 = vld [vmem:[%s3053_s1 + $0x1d0] sm:$0xff]   ;;  %v2637_v2 = vld [vmem:[%s3053_s1 + $0x238] sm:$0xff]  }
  0x2e   : > { %v340_v38 = vcombine.low %v332_v33, %v339_v35  ;;  %v1242_v18 = vcombine.low %v1199_v5, %v1207_v12  ;;  %v1239_v22 = vrot.slane %v1225_v16, %v2737_v24  ;;  %v2612_v33 = vld [vmem:[%s3053_s1 + $0x188] sm:$0xff]   ;;  %v2614_v35 = vld [vmem:[%s3053_s1 + $0x190] sm:$0xff]  }
  0x2f   : > { %2358 = vmatmul.mubr.bf16.vlgmr.msra.gmra.mrb[0].mxu1 %v523_v36  ;;  %v1232_v21 = vrot.slane %v1224_v15, %v2737_v24  ;;  %v1249_v23 = vrot.slane %v1241_v17, %v2737_v24 }
  0x30   : > { %v2791_v39 = vpack.c.bf16 %v340_v38, %v340_v38  ;;  %2382 = vmatpush3.bf16.msra.mxu1 %v2756_v47  ;;  %2397 = vmatprep.mubr.bf16.mxu1 %v522_v19  ;;  %v2588_v47 = vld [vmem:[%s3053_s1 + $0x128] sm:$0xff]   ;;  %v1256_v25 = vrot.slane %v1242_v18, %v2737_v24  ;;  %v1192_v38 = vcombine.high %v2858_v62, %v2858_v62  ;;  %v2633_v62 = vld [vmem:[%s3053_s1 + $0x218] sm:$0xff]  }
  0x31   : > { %2383 = vmatprep.subr.bf16.mxu1 %v2580_v37  ;;  %v1240_v28 = vcombine.low %v1232_v21, %v1239_v22 }
  0x32   : > { %2378 = vmatmul.mubr.bf16.vlgmr.msra.gmra.mrb[0].mxu0 %v2791_v39  ;;  %v1257_v29 = vcombine.low %v1249_v23, %v1256_v25 }
  0x33   : > { %2422 = vmatpush3.bf16.msra.mxu0 %v2763_v52  ;;  %2437 = vmatprep.mubr.bf16.mxu0 %v522_v19  ;;  %v2593_v52 = vld [vmem:[%s3053_s1 + $0x178] sm:$0xff]   ;;  %v2607_v19 = vld [vmem:[%s3053_s1 + $0xb0] sm:$0xff]  }
  0x34   : > { %2423 = vmatprep.subr.bf16.mxu0 %v2581_v40  ;;  %2384 = vmatpush3.bf16.msra.mxu1 %v2580_v37  ;;  %v2906_v32 = vpack.c.bf16 %v1257_v29, %v1240_v28  ;;  %v2617_v37 = vld [vmem:[%s3053_s1 + $0x1d8] sm:$0xff]  }
  0x35   : > { %2385 = vmatprep.subr.bf16.mxu1 %v2582_v41 }
  0x37   : > { %2424 = vmatpush3.bf16.msra.mxu0 %v2581_v40 }
  0x38   : > { %2425 = vmatprep.subr.bf16.mxu0 %v2583_v42  ;;  %2386 = vmatpush3.bf16.msra.mxu1 %v2582_v41  ;;  %v2616_v41 = vld [vmem:[%s3053_s1 + $0x198] sm:$0xff]  }
  0x39   : > { %2387 = vmatprep.subr.bf16.mxu1 %v2584_v43 }
  0x3b   : > { %2426 = vmatpush3.bf16.msra.mxu0 %v2583_v42  ;;  %v2619_v42 = vld [vmem:[%s3053_s1 + $0x1e0] sm:$0xff]  }
  0x3c   : > { %2427 = vmatprep.subr.bf16.mxu0 %v2585_v44  ;;  %2388 = vmatpush3.bf16.msra.mxu1 %v2584_v43  ;;  %v1206_v43 = vrot.slane %v1192_v38, %v2737_v24 }
  0x3d   : > { %2389 = vmatprep.subr.bf16.mxu1 %v2586_v45 }
  0x3f   : > { %2428 = vmatpush3.bf16.msra.mxu0 %v2585_v44 }
  0x40   : > { %2429 = vmatprep.subr.bf16.mxu0 %v2587_v46  ;;  %2390 = vmatpush3.bf16.msra.mxu1 %v2586_v45 }
  0x41   : > { %2391 = vmatprep.subr.bf16.mxu1 %v2588_v47 }
  0x43   : > { %2430 = vmatpush3.bf16.msra.mxu0 %v2587_v46  ;;  %v2618_v46 = vld [vmem:[%s3053_s1 + $0x1a0] sm:$0xff]  }
  0x44   : > { %2431 = vmatprep.subr.bf16.mxu0 %v2589_v48  ;;  %2392 = vmatpush3.bf16.msra.mxu1 %v2588_v47  ;;  %v2621_v47 = vld [vmem:[%s3053_s1 + $0x1e8] sm:$0xff]  }
  0x45   : > { %2393 = vmatprep.subr.bf16.mxu1 %v2590_v49 }
  0x47   : > { %2432 = vmatpush3.bf16.msra.mxu0 %v2589_v48 }
  0x48   : > { %2433 = vmatprep.subr.bf16.mxu0 %v2591_v50  ;;  %2394 = vmatpush3.bf16.msra.mxu1 %v2590_v49 }
  0x49   : > { %2395 = vmatprep.subr.bf16.mxu1 %v2592_v51 }
  0x4b   : > { %2434 = vmatpush3.bf16.msra.mxu0 %v2591_v50  ;;  %v2620_v50 = vld [vmem:[%s3053_s1 + $0x1a8] sm:$0xff]  }
  0x4c   : > { %2435 = vmatprep.subr.bf16.mxu0 %v2593_v52  ;;  %2396 = vmatpush3.bf16.msra.mxu1 %v2592_v51  ;;  %v2623_v51 = vld [vmem:[%s3053_s1 + $0x1f0] sm:$0xff]  }
  0x4d   : > { %2401 = vmatprep.subr.bf16.mxu1 %v2594_v53 }
  0x4f   : > { %2436 = vmatpush3.bf16.msra.mxu0 %v2593_v52  ;;  %2398 = vmatmul.mubr.bf16.vlgmr.msra.gmra.mrb[4].mxu1 %v523_v36 }
  0x50   : > { %2441 = vmatprep.subr.bf16.mxu0 %v2595_v54  ;;  %2402 = vmatpush3.bf16.msra.mxu1 %v2594_v53 }
  0x51   : > { %2403 = vmatprep.subr.bf16.mxu1 %v2596_v55  ;;  %2417 = vmatprep.mubr.bf16.mxu1 %v2781_v27 }
  0x52   : > { %2438 = vmatmul.mubr.bf16.vlgmr.msra.gmra.mrb[4].mxu0 %v523_v36  ;;  %v1155_v36 = vld [vmem:[#allocation2 + $0x28] sm:$0x3f] }
  0x53   : > { %2442 = vmatpush3.bf16.msra.mxu0 %v2595_v54  ;;  %2457 = vmatprep.mubr.bf16.mxu0 %v2781_v27  ;;  %v2611_v27 = vld [vmem:[%s3053_s1 + $0x1c0] sm:$0xff]   ;;  %v1215_v40 = vrot.slane %v1155_v36, %v2737_v24  ;;  %v2622_v54 = vld [vmem:[%s3053_s1 + $0x1b0] sm:$0xff]  }
  0x54   : > { %2443 = vmatprep.subr.bf16.mxu0 %v2597_v56  ;;  %2404 = vmatpush3.bf16.msra.mxu1 %v2596_v55  ;;  %v2625_v55 = vld [vmem:[%s3053_s1 + $0x1f8] sm:$0xff]  }
  0x55   : > { %2405 = vmatprep.subr.bf16.mxu1 %v2598_v57  ;;  %v1223_v45 = vcombine.high %v1215_v40, %v1215_v40  ;;  %v1258_v48 = vcombine.low %v1206_v43, %v1215_v40 }
  0x57   : > { %2444 = vmatpush3.bf16.msra.mxu0 %v2597_v56  ;;  %v1266_v52 = vrot.slane %v1258_v48, %v2737_v24 }
  0x58   : > { %2445 = vmatprep.subr.bf16.mxu0 %v2599_v58  ;;  %2406 = vmatpush3.bf16.msra.mxu1 %v2598_v57  ;;  %v2624_v57 = vld [vmem:[%s3053_s1 + $0x1b8] sm:$0xff]  }
  0x59   : > { %2407 = vmatprep.subr.bf16.mxu1 %v2600_v59 }
  0x5b   : > { %2446 = vmatpush3.bf16.msra.mxu0 %v2599_v58 }
  0x5c   : > { %2447 = vmatprep.subr.bf16.mxu0 %v2601_v63  ;;  %2408 = vmatpush3.bf16.msra.mxu1 %v2600_v59  ;;  %v2630_v59 = vld [vmem:[%s3053_s1 + $0x200] sm:$0xff]  }
  0x5d   : > { %2409 = vmatprep.subr.bf16.mxu1 %v2602_v1 }
  0x5f   : > { %2448 = vmatpush3.bf16.msra.mxu0 %v2601_v63  ;;  %v2634_v63 = vld [vmem:[%s3053_s1 + $0x220] sm:$0xff]  }
  0x60   : > { %2449 = vmatprep.subr.bf16.mxu0 %v2603_v6  ;;  %2410 = vmatpush3.bf16.msra.mxu1 %v2602_v1  ;;  %v2636_v1 = vld [vmem:[%s3053_s1 + $0x230] sm:$0xff]  }
  0x61   : > { %2411 = vmatprep.subr.bf16.mxu1 %v2604_v8 }
  0x63   : > { %2450 = vmatpush3.bf16.msra.mxu0 %v2603_v6 }
  0x64   : > { %2451 = vmatprep.subr.bf16.mxu0 %v2605_v13  ;;  %2412 = vmatpush3.bf16.msra.mxu1 %v2604_v8 }
  0x65   : > { %2413 = vmatprep.subr.bf16.mxu1 %v2606_v14 }
  0x67   : > { %2452 = vmatpush3.bf16.msra.mxu0 %v2605_v13 }
  0x68   : > { %2453 = vmatprep.subr.bf16.mxu0 %v2607_v19  ;;  %2414 = vmatpush3.bf16.msra.mxu1 %v2606_v14 }
  0x69   : > { %2415 = vmatprep.subr.bf16.mxu1 %v2608_v20 }
  0x6b   : > { %2454 = vmatpush3.bf16.msra.mxu0 %v2607_v19 }
  0x6c   : > { %2455 = vmatprep.subr.bf16.mxu0 %v2609_v26  ;;  %2416 = vmatpush3.bf16.msra.mxu1 %v2608_v20 }
  0x6d   : > { %2481 = vmatprep.subr.bf16.mxu1 %v2611_v27 }
  0x6f   : > { %2456 = vmatpush3.bf16.msra.mxu0 %v2609_v26  ;;  %2418 = vmatmul.mubr.bf16.vlgmr.msra.gmra.mrb[4].mxu1 %v2791_v39 }
  0x70   : > { %2461 = vmatprep.subr.bf16.mxu0 %v2610_v30  ;;  %2482 = vmatpush3.bf16.msra.mxu1 %v2611_v27 }
  0x71   : > { %2483 = vmatprep.subr.bf16.mxu1 %v2613_v31  ;;  %2497 = vmatprep.mubr.bf16.mxu1 %v2906_v32 }
  0x72   : > { %2458 = vmatmul.mubr.bf16.vlgmr.msra.gmra.mrb[4].mxu0 %v2791_v39  ;;  %v1208_v39 = vcombine.high %v1155_v36, %v1155_v36 }
  0x73   : > { %2462 = vmatpush3.bf16.msra.mxu0 %v2610_v30  ;;  %2477 = vmatprep.mubr.bf16.mxu0 %v2906_v32 }
  0x74   : > { %2463 = vmatprep.subr.bf16.mxu0 %v2612_v33  ;;  %2484 = vmatpush3.bf16.msra.mxu1 %v2613_v31  ;;  %v1222_v44 = vrot.slane %v1208_v39, %v2737_v24 }
  0x75   : > { %2485 = vmatprep.subr.bf16.mxu1 %v2615_v34 }
  0x76   : > { %v1259_v49 = vcombine.low %v1223_v45, %v1222_v44 }
  0x77   : > { %2464 = vmatpush3.bf16.msra.mxu0 %v2612_v33 }
  0x78   : > { %2465 = vmatprep.subr.bf16.mxu0 %v2614_v35  ;;  %2486 = vmatpush3.bf16.msra.mxu1 %v2615_v34  ;;  %v1273_v53 = vrot.slane %v1259_v49, %v2737_v24 }
  0x79   : > { %2487 = vmatprep.subr.bf16.mxu1 %v2617_v37 }
  0x7a   : > { %v1274_v56 = vcombine.low %v1266_v52, %v1273_v53 }
  0x7b   : > { %2466 = vmatpush3.bf16.msra.mxu0 %v2614_v35 }
  0x7c   : > { %2467 = vmatprep.subr.bf16.mxu0 %v2616_v41  ;;  %2488 = vmatpush3.bf16.msra.mxu1 %v2617_v37  ;;  %v1279_v58 = vpack.c.bf16 %v1274_v56, %v1274_v56 }
  0x7d   : > { %2489 = vmatprep.subr.bf16.mxu1 %v2619_v42 }
  0x7f   : > { %2468 = vmatpush3.bf16.msra.mxu0 %v2616_v41 }
  0x80   : > { %2469 = vmatprep.subr.bf16.mxu0 %v2618_v46  ;;  %2490 = vmatpush3.bf16.msra.mxu1 %v2619_v42 }
  0x81   : > { %2491 = vmatprep.subr.bf16.mxu1 %v2621_v47 }
  0x83   : > { %2470 = vmatpush3.bf16.msra.mxu0 %v2618_v46 }
  0x84   : > { %2471 = vmatprep.subr.bf16.mxu0 %v2620_v50  ;;  %2492 = vmatpush3.bf16.msra.mxu1 %v2621_v47 }
  0x85   : > { %2493 = vmatprep.subr.bf16.mxu1 %v2623_v51 }
  0x87   : > { %2472 = vmatpush3.bf16.msra.mxu0 %v2620_v50 }
  0x88   : > { %2473 = vmatprep.subr.bf16.mxu0 %v2622_v54  ;;  %2494 = vmatpush3.bf16.msra.mxu1 %v2623_v51 }
  0x89   : > { %2495 = vmatprep.subr.bf16.mxu1 %v2625_v55 }
  0x8b   : > { %2474 = vmatpush3.bf16.msra.mxu0 %v2622_v54 }
  0x8c   : > { %2475 = vmatprep.subr.bf16.mxu0 %v2624_v57  ;;  %2496 = vmatpush3.bf16.msra.mxu1 %v2625_v55 }
  0x8f   : > { %2476 = vmatpush3.bf16.msra.mxu0 %v2624_v57  ;;  %2498 = vmatmul.mubr.bf16.vlgmr.msra.gmra.mrb[4].mxu1 %v1279_v58 }
  0x90   : > { %2501 = vmatprep.subr.bf16.mxu0 %v2630_v59 }
  0x92   : > { %2478 = vmatmul.mubr.bf16.vlgmr.msra.gmra.mrb[0].mxu0 %v1279_v58 }
  0x93   : > { %2502 = vmatpush3.bf16.msra.mxu0 %v2630_v59  ;;  %2517 = vmatprep.mubr.bf16.mxu0 %v2906_v32 }
  0x94   : > { %2503 = vmatprep.subr.bf16.mxu0 %v2631_v60 }
  0x97   : > { %2504 = vmatpush3.bf16.msra.mxu0 %v2631_v60 }
  0x98   : > { %2505 = vmatprep.subr.bf16.mxu0 %v2632_v61 }
  0x9b   : > { %2506 = vmatpush3.bf16.msra.mxu0 %v2632_v61 }
  0x9c   : > { %2507 = vmatprep.subr.bf16.mxu0 %v2633_v62 }
  0x9f   : > { %2508 = vmatpush3.bf16.msra.mxu0 %v2633_v62 }
  0xa0   : > { %2509 = vmatprep.subr.bf16.mxu0 %v2634_v63 }
  0xa3   : > { %2510 = vmatpush3.bf16.msra.mxu0 %v2634_v63 }
  0xa4   : > { %2511 = vmatprep.subr.bf16.mxu0 %v2635_v0 }
  0xa7   : > { %2512 = vmatpush3.bf16.msra.mxu0 %v2635_v0 }
  0xa8   : > { %2513 = vmatprep.subr.bf16.mxu0 %v2636_v1 }
  0xab   : > { %2514 = vmatpush3.bf16.msra.mxu0 %v2636_v1 }
  0xac   : > { %2515 = vmatprep.subr.bf16.mxu0 %v2637_v2 }
  0xaf   : > { %2516 = vmatpush3.bf16.msra.mxu0 %v2637_v2 }
  0xb2   : > { %2518 = vmatmul.mubr.bf16.vlgmr.msra.gmra.mrb[4].mxu0 %v1279_v58 }
 0x102   : > { %v2359_v3 = vpop.f32.mrb[0].mxu1 }
 0x103   : > { %v623_v4 = vpop.f32.mrb[1].mxu1 }
 0x104   : > { %v2360_v5 = vpop.f32.mrb[2].mxu1 }
 0x105   : > { %v626_v6 = vpop.f32.mrb[3].mxu1 }
 0x162   : > { %v2499_v7 = vpop.f32.mrb[4].mxu1 }
 0x163   : > { %v1725_v8 = vcombine.high %v2499_v7, %v2499_v7  ;;  %v2984_v9 = vrot.slane %v2499_v7, %v2737_v24  ;;  %v1495_v10 = vpop.f32.mrb[5].mxu1 }
 0x164   : > { %v1691_v11 = vcombine.high %v1495_v10, %v1495_v10  ;;  %v1698_v12 = vrot.slane %v1495_v10, %v2737_v24  ;;  %v2500_v13 = vpop.f32.mrb[6].mxu1 }
 0x165   : > { %v2479_v14 = vpop.f32.mrb[0].mxu0  ;;  %v1739_v15 = vrot.slane %v1725_v8, %v2737_v24  ;;  %v1740_v16 = vcombine.high %v2984_v9, %v2984_v9  ;;  %v1498_v17 = vpop.f32.mrb[7].mxu1 }
 0x166   : > { %v2521_v18 = vadd.f32 %v2479_v14, %v2359_v3  ;;  %v1379_v19 = vpop.f32.mrb[1].mxu0  ;;  %v1705_v20 = vrot.slane %v1691_v11, %v2737_v24  ;;  %v1706_v21 = vcombine.high %v1698_v12, %v1698_v12  ;;  %v2241_v41 = vrot.slane %v1698_v12, 9 }
 0x167   : > { %v1741_v23 = vcombine.high %v1739_v15, %v1739_v15  ;;  %v1772_v25 = vrot.slane %v1739_v15, 7  ;;  %v2522_v26 = vadd.f32 %v1379_v19, %v623_v4  ;;  %v2480_v27 = vpop.f32.mrb[2].mxu0  ;;  %v2244_v30 = vrot.slane %v1740_v16, 9 }
 0x168   : > { %v1664_v28 = vcombine.high %v2521_v18, %v2521_v18  ;;  %v1671_v29 = vrot.slane %v2521_v18, %v2737_v24  ;;  %v1751_v31 = vrot.slane %v1706_v21, 7  ;;  %v1382_v32 = vpop.f32.mrb[3].mxu0  ;;  %v1707_v36 = vcombine.high %v1705_v20, %v1705_v20  ;;  %v2245_v18 = vld [vmem:[%s3054_s2] ss:$0 sm:$0xff] }
 0x169   : > { %v1774_v33 = vrot.slane %v1772_v25, 2  ;;  %v1775_v34 = vrot.slane %v1741_v23, 7  ;;  %v1631_v35 = vcombine.high %v2522_v26, %v2522_v26  ;;  %v1638_v40 = vrot.slane %v2522_v26, %v2737_v24 }
 0x16a   : > { %v1678_v38 = vrot.slane %v1664_v28, %v2737_v24  ;;  %v1679_v39 = vcombine.high %v1671_v29, %v1671_v29  ;;  %v1753_v43 = vrot.slane %v1751_v31, 2  ;;  %v1754_v44 = vrot.slane %v1705_v20, 7 }
 0x16b   : > { %v1645_v42 = vrot.slane %v1631_v35, %v2737_v24  ;;  %v2523_v45 = vadd.f32 %v1382_v32, %v626_v6  ;;  %v1708_v46 = vcombine.high %v1498_v17, %v1498_v17  ;;  %v1715_v47 = vrot.slane %v1498_v17, %v2737_v24 }
 0x16c   : > { %v1773_v48 = vsel %vm2998_vm6, %v2244_v30, %v1772_v25  ;;  %v1776_v49 = vsel %vm2998_vm6, %v1774_v33, %v1775_v34  ;;  %v2242_v51 = vrot.slane %v1707_v36, 9  ;;  %v1646_v58 = vcombine.high %v1638_v40, %v1638_v40 }
 0x16d   : > { %v1647_v50 = vcombine.high %v1645_v42, %v1645_v42  ;;  %v1648_v52 = vcombine.high %v2523_v45, %v2523_v45  ;;  %v1791_v53 = vadd.f32 %v1773_v48, %v1679_v39  ;;  %v1722_v54 = vrot.slane %v1708_v46, %v2737_v24 }
 0x16e   : > { %v1723_v55 = vcombine.high %v1715_v47, %v1715_v47  ;;  %v1758_v56 = vrot.slane %v1715_v47, 7  ;;  %v1792_v57 = vadd.f32 %v1776_v49, %v1678_v38  ;;  %v1752_v59 = vsel %vm2998_vm6, %v2241_v41, %v1751_v31 }
 0x16f   : > { %v1755_v60 = vsel %vm2998_vm6, %v1753_v43, %v1754_v44  ;;  %v1655_v61 = vrot.slane %v2523_v45, %v2737_v24  ;;  %v1724_v62 = vcombine.high %v1722_v54, %v1722_v54  ;;  %v1662_v1 = vrot.slane %v1648_v52, %v2737_v24 }
 0x170   : > { %v1760_v63 = vrot.slane %v1758_v56, 2  ;;  %v1761_v0 = vrot.slane %v1723_v55, 7  ;;  %v1785_v2 = vadd.f32 %v1752_v59, %v1638_v40  ;;  %v1786_v3 = vadd.f32 %v1755_v60, %v1646_v58 }
 0x171   : > { %v1759_v4 = vsel %vm2998_vm6, %v2242_v51, %v1758_v56  ;;  %v2243_v5 = vrot.slane %v1722_v54, 9  ;;  %v1765_v6 = vrot.slane %v1724_v62, 7  ;;  %v1768_v11 = vrot.slane %v2984_v9, 7  ;;  %v2246_v9 = vld [vmem:[%s3055_s3] ss:$0 sm:$0xff] }
 0x172   : > { %v1762_v7 = vsel %vm2998_vm6, %v1760_v63, %v1761_v0  ;;  %v1787_v8 = vadd.f32 %v1759_v4, %v1647_v50  ;;  %v1663_v14 = vcombine.high %v1662_v1, %v1662_v1  ;;  %v1873_v19 = vrot.slane %v2245_v18, %v2737_v24 }
 0x173   : > { %v1788_v10 = vadd.f32 %v1762_v7, %v1655_v61  ;;  %v1767_v12 = vrot.slane %v1765_v6, 2  ;;  %v1766_v13 = vsel %vm2998_vm6, %v2243_v5, %v1765_v6  ;;  %v1905_v25 = vrot.slane %v2246_v9, %v2737_v24 }
 0x174   : > { %v1789_v15 = vadd.f32 %v1766_v13, %v1662_v1  ;;  %v1874_v31 = vcombine.high %v1873_v19, %v1873_v19 }
 0x175   : > { %v1769_v16 = vsel %vm2998_vm6, %v1767_v12, %v1768_v11  ;;  %v1906_v39 = vcombine.high %v1905_v25, %v1905_v25 }
 0x176   : > { %v1790_v17 = vadd.f32 %v1769_v16, %v1663_v14 }
 0x185   : > { %v2519_v20 = vpop.f32.mrb[4].mxu0 }
 0x186   : > { %v1829_v21 = vcombine.high %v2519_v20, %v2519_v20  ;;  %v1836_v22 = vrot.slane %v2519_v20, %v2737_v24  ;;  %v1611_v23 = vpop.f32.mrb[5].mxu0 }
 0x187   : > { %v1796_v26 = vcombine.high %v1611_v23, %v1611_v23  ;;  %v1803_v27 = vrot.slane %v1611_v23, %v2737_v24  ;;  %v2520_v28 = vpop.f32.mrb[6].mxu0 }
 0x188   : > { %v1843_v29 = vrot.slane %v1829_v21, %v2737_v24  ;;  %v1858_v30 = vadd.f32 %v1836_v22, %v1790_v17  ;;  %v1614_v32 = vpop.f32.mrb[7].mxu0 }
 0x189   : > { %v1810_v33 = vrot.slane %v1796_v26, %v2737_v24  ;;  %v1811_v34 = vcombine.high %v1803_v27, %v1803_v27  ;;  %v1812_v35 = vcombine.high %v1614_v32, %v1614_v32  ;;  %v1819_v36 = vrot.slane %v1614_v32, %v2737_v24 }
 0x18a   : > { %v1844_v37 = vcombine.high %v1843_v29, %v1843_v29  ;;  %v1859_v38 = vadd.f32 %v1843_v29, %v1791_v53  ;;  %v1882_v44 = vadd.f32 %v1874_v31, %v1858_v30 }
 0x18b   : > { %v1853_v40 = vadd.f32 %v1811_v34, %v1785_v2  ;;  %v1854_v41 = vadd.f32 %v1810_v33, %v1786_v3  ;;  %v1826_v42 = vrot.slane %v1812_v35, %v2737_v24  ;;  %v1827_v46 = vcombine.high %v1819_v36, %v1819_v36 }
 0x18c   : > { %v1860_v43 = vadd.f32 %v1844_v37, %v1792_v57  ;;  %v1883_v45 = vadd.f32 %v1873_v19, %v1859_v38  ;;  %v1855_v50 = vadd.f32 %v1819_v36, %v1787_v8  ;;  %v1914_v55 = vmul.f32 %v1906_v39, %v1882_v44 }
 0x18d   : > { %v1877_v47 = vadd.f32 %v1873_v19, %v1853_v40  ;;  %v1878_v48 = vadd.f32 %v1874_v31, %v1854_v41  ;;  %v1828_v49 = vcombine.high %v1826_v42, %v1826_v42  ;;  %v1856_v58 = vadd.f32 %v1827_v46, %v1788_v10 }
 0x18e   : > { %v1884_v51 = vadd.f32 %v1874_v31, %v1860_v43  ;;  %vm1892_vm7 = vcmp.gt.f32.partialorder %v1883_v45, 0.0  ;;  %v1915_v52 = vmul.f32 %v1905_v25, %v1883_v45  ;;  %v1879_v61 = vadd.f32 %v1873_v19, %v1855_v50 }
 0x18f   : > { %vm1886_vm8 = vcmp.gt.f32.partialorder %v1877_v47, 0.0  ;;  %vm1887_vm9 = vcmp.gt.f32.partialorder %v1878_v48, 0.0  ;;  %v1909_v54 = vmul.f32 %v1905_v25, %v1877_v47  ;;  %v1910_v53 = vmul.f32 %v1906_v39, %v1878_v48 }
 0x190   : > { %vm1893_vm10 = vcmp.gt.f32.partialorder %v1884_v51, 0.0  ;;  %v1916_v56 = vmul.f32 %v1906_v39, %v1884_v51  ;;  %v1857_v60 = vadd.f32 %v1828_v49, %v1789_v15  ;;  %v1923_v62 = vsel %vm1892_vm7, %v1883_v45, %v1915_v52 }
 0x191   : > { %v1917_v59 = vsel %vm1886_vm8, %v1877_v47, %v1909_v54  ;;  %v1918_v57 = vsel %vm1887_vm9, %v1878_v48, %v1910_v53  ;;  %v1880_v1 = vadd.f32 %v1874_v31, %v1856_v58  ;;  %vm1888_vm11 = vcmp.gt.f32.partialorder %v1879_v61, 0.0 }
 0x192   : > { %v1924_v63 = vsel %vm1893_vm10, %v1884_v51, %v1916_v56  ;;  %v1933_v0 = vcombine.low %v1917_v59, %v1918_v57  ;;  %v1881_v3 = vadd.f32 %v1873_v19, %v1857_v60  ;;  %v1911_v4 = vmul.f32 %v1905_v25, %v1879_v61 }
 0x193   : > { %v1957_v2 = vcombine.low %v1923_v62, %v1924_v63  ;;  %vm1891_vm12 = vcmp.gt.f32.partialorder %v1882_v44, 0.0  ;;  %vm1889_vm13 = vcmp.gt.f32.partialorder %v1880_v1, 0.0  ;;  %v1912_v6 = vmul.f32 %v1906_v39, %v1880_v1 }
 0x194   : > { %v1940_v5 = vrot.slane %v1933_v0, %v2737_v24  ;;  %vm1890_vm14 = vcmp.gt.f32.partialorder %v1881_v3, 0.0  ;;  %v1913_v8 = vmul.f32 %v1905_v25, %v1881_v3  ;;  %v1919_v11 = vsel %vm1888_vm11, %v1879_v61, %v1911_v4 }
 0x195   : > { %v1964_v7 = vrot.slane %v1957_v2, %v2737_v24  ;;  %v1920_v12 = vsel %vm1889_vm13, %v1880_v1, %v1912_v6  ;;  %v1922_v13 = vsel %vm1891_vm12, %v1882_v44, %v1914_v55 }
 0x196   : > { %v1969_v10 = vpack.c.bf16 %v1940_v5, %v1940_v5  ;;  %v1921_v15 = vsel %vm1890_vm14, %v1881_v3, %v1913_v8  ;;  %v1941_v16 = vcombine.low %v1919_v11, %v1920_v12 }
 0x197   : > { %v1972_v14 = vpack.c.bf16 %v1964_v7, %v1964_v7  ;;  %v1949_v17 = vcombine.low %v1921_v15, %v1922_v13 }
 0x198   : > { %1973 = vst [vmem:[%s197_s7] sm:$0x3] %v1969_v10  ;;  %v1948_v18 = vrot.slane %v1941_v16, %v2737_v24 }
 0x199   : > { %1976 = vst [vmem:[%s197_s7 + $0x6] sm:$0x3] %v1972_v14  ;;  %v1956_v19 = vrot.slane %v1949_v17, %v2737_v24 }
 0x19a   : > { %v1970_v9 = vpack.c.bf16 %v1948_v18, %v1948_v18 }
 0x19b   : > { %v1971_v20 = vpack.c.bf16 %v1956_v19, %v1956_v19 }
 0x19c   : > { %1974 = vst [vmem:[%s197_s7 + $0x2] sm:$0x3] %v1970_v9 }
 0x19d   : > { %1975 = vst [vmem:[%s197_s7 + $0x4] sm:$0x3] %v1971_v20 }
 0x19e PF: > { %s14_s15 = sadd.s32 1, %s2644_s15  }
 0x19f   : > { %p11_p4 = scmp.ge.s32.totalorder %s14_s15, 4  }
 0x1a1   :  { %13 = sbr.rel (!%p11_p4) target bundleno = 1 (0x1), region = 76 }

// kernel: multiscale_flow_forward.18
= control target key start
LH: loop header
LB: loop body
LE: loop exit
PB: predicated region body
PF: predicated region fallthrough
CT: control target
= control target key end

     0   :  { %s2040_s15 = smov 0   ;;  %s2347_s0 = inlined_call_operand.vmem [shape: bf16[2,4,4,40], index: 0, kind: input, shape index: {}]   ;;  %s2348_s1 = inlined_call_operand.vmem [shape: bf16[3,3,40,128], index: 1, kind: input, shape index: {}]   ;;  %s2349_s2 = inlined_call_operand.vmem [shape: f32[1,128], index: 2, kind: input, shape index: {}]   ;;  %s2350_s3 = inlined_call_operand.vmem [shape: f32[1,128], index: 3, kind: input, shape index: {}]   ;;  %s2351_s4 = inlined_call_operand.vmem [shape: bf16[2,4,4,128], index: 4, kind: output, shape index: {}]  }
   0x1 LB: > { %s1685_s16 = sadd.s32 4294967295, %s2011_s15   ;;  %p1689_p0 = scmp.ge.s32.totalorder %s2011_s15, 1  ;;  %s2011_s15 = sphi %s2040_s15, %s14_s15  }
   0x2   : > { %p162_p1 = scmp.lt.s32.totalorder %s2011_s15, 3 }
   0x4   : > { %p163_p2 = pnand %p1689_p0, %p162_p1 }
   0x5   : > { %v1966_v0 = vld [vmem:[%s2348_s1 + $0x3c] sm:$0xff] (!%p163_p2)   ;;  %vm521_vm0 = vcmask (!%p163_p2), 1043456   ;;  %p188_p3 = scmp.lt.s32.totalorder (!%p163_p2), %s1685_s16, 1  ;;  %v1968_v2 = vld [vmem:[%s2348_s1 + $0x44] sm:$0xff] (!%p163_p2)   ;;  %vm199_vm1 = vcmask (!%p163_p2), 324608   ;;  %v232_v3 = vlaneseq (!%p163_p2)  ;;  %v2013_v7 = vmov (!%p163_p2), 0.0  }
   0x6   : > { %166 = sbr.rel (%p163_p2) target bundleno = 335 (0x14f), region = 36  ;;  %v1967_v1 = vld [vmem:[%s2348_s1] sm:$0xff] (!%p163_p2)   ;;  %1834 = vmatprep.subr.bf16.mxu1 (!%p163_p2), %v1966_v0  ;;  %v1969_v4 = vld [vmem:[%s2348_s1 + $0x8] sm:$0xff] (!%p163_p2)   ;;  %v1971_v6 = vld [vmem:[%s2348_s1 + $0x10] ss:$0 sps:$4 sm:$0xff] (!%p163_p2)   ;;  %vm215_vm2 = vcmask (!%p163_p2), 322560  }
   0x7   : > { %1844 = vmatprep.subr.bf16.mxu0 (!%p163_p2), %v1967_v1  ;;  %1835 = vmatpush3.bf16.msra.mxu1 (!%p163_p2), %v1966_v0  ;;  %v1970_v5 = vld [vmem:[%s2348_s1 + $0x4c] ss:$0 sps:$4 sm:$0xff] (!%p163_p2)   ;;  %201 = vst.msk [vmem:[#allocation2 + $0x8] sm:$0x3f] (!%p163_p2), %vm199_vm1, %v2013_v7  ;;  %202 = vst.msk [vmem:[#allocation2 + $0x10] sm:$0x3f] (!%p163_p2), %vm199_vm1, %v2013_v7 }
   0x8   : > { %1845 = vmatpush3.bf16.msra.mxu0 (!%p163_p2), %v1967_v1  ;;  %1836 = vmatprep.subr.bf16.mxu1 (!%p163_p2), %v1968_v2  ;;  %203 = vst.msk [vmem:[#allocation2 + $0x18] sm:$0x3f] (!%p163_p2), %vm199_vm1, %v2013_v7  ;;  %v233_v8 = vshrl.u32 (!%p163_p2), %v232_v3, 7  ;;  %200 = vst.msk [vmem:[#allocation2] sm:$0x3f] (!%p163_p2), %vm199_vm1, %v2013_v7  ;;  %v523_v9 = vsel (!%p163_p2), %vm521_vm0, %v1970_v5, 0 }
   0x9   : > { %1846 = vmatprep.subr.bf16.mxu0 (!%p163_p2), %v1969_v4  ;;  %204 = vst.msk [vmem:[#allocation2 + $0x20] sm:$0x3f] (!%p163_p2), %vm199_vm1, %v2013_v7  ;;  %205 = vst.msk [vmem:[#allocation2 + $0x28] sm:$0x3f] (!%p163_p2), %vm199_vm1, %v2013_v7  ;;  %v2014_v12 = vmov (!%p163_p2), 1983009808  }
   0xa   : > { %v230_v13 = vunpack.c.l.s4 (!%p163_p2), %v2014_v12  ;;  %v2084_v14 = vld [vmem:[%s2348_s1 + $0x50] sm:$0xff] (!%p163_p2)   ;;  %v595_v18 = vsel (!%p163_p2), %vm521_vm0, %v1971_v6, 0  ;;  %v2092_v21 = vld [vmem:[%s2348_s1 + $0x64] sm:$0xff] (!%p163_p2)   ;;  %vm514_vm3 = vcmask (!%p163_p2), 326656   ;;  %vm1395_vm4 = vcmask (!%p163_p2), 1040384  }
   0xb   : > { %1837 = vmatpush3.bf16.msra.mxu1 (!%p163_p2), %v1968_v2  ;;  %vm1396_vm5 = vcmask (!%p163_p2), 1042434   ;;  %vm1398_vm6 = vcmask (!%p163_p2), 1044484   ;;  %vm1400_vm8 = vcmask (!%p163_p2), 1046534  }
   0xc   : > { %1847 = vmatpush3.bf16.msra.mxu0 (!%p163_p2), %v1969_v4  ;;  %1947 = vmatprep.subr.msk.bf16.mxu1 (!%p163_p2), %vm521_vm0, %v1970_v5  ;;  %v231_v20 = vunpack.c.0.s8 (!%p163_p2), %v230_v13  ;;  %vm2260_vm7 = vmor (!%p163_p2), %vm1395_vm4, %vm1396_vm5 }
   0xd   : > { %s2357_s16 = smov (!%p188_p3, %s1685_s16), 1  ;;  %1948 = vmatprep.subr.msk.bf16.mxu0 %vm521_vm0, %v1971_v6  ;;  %vm1399_vm9 = vmor %vm2260_vm7, %vm1398_vm6 }
   0xe   : > { %s1787_s29 = sshll.u32 %s2357_s16, 3  ;;  %v2097_v24 = vsub.s32 %v231_v20, %v233_v8  ;;  %vm2286_vm10 = vmor %vm1399_vm9, %vm1400_vm8 }
   0xf   : > { %s192_s6 = scalar_lea.vmem %s2347_s0, %s1787_s29  ;;  %1839 = vmatpush3.bf16.msra.mxu1 %v523_v9  ;;  %v220_v25 = vld [vmem:[#allocation2] sm:$0x3f]  ;;  %s197_s9 = scalar_lea.vmem %s2351_s4, %s1787_s29 }
  0x10   : > { %v206_v10 = vld [vmem:[%s192_s6] sm:$0x3]  ;;  %v207_v11 = vld [vmem:[%s192_s6 + $0x2] sm:$0x3]  ;;  %v208_v15 = vld [vmem:[%s192_s6 + $0x4] sm:$0x3]  ;;  %1849 = vmatpush3.bf16.msra.mxu0 %v595_v18  ;;  %1854 = vmatprep.subr.bf16.mxu1 %v2084_v14  ;;  %v228_v26 = vcombine.high %v220_v25, %v220_v25  ;;  %v235_v27 = vrot.slane %v220_v25, %v2097_v24 }
  0x11   : > { %v210_v16 = vunpack.c.l.bf16 %v206_v10  ;;  %v211_v17 = vunpack.c.l.bf16 %v207_v11  ;;  %v212_v19 = vunpack.c.l.bf16 %v208_v15  ;;  %v209_v22 = vld [vmem:[%s192_s6 + $0x6] sm:$0x3]  ;;  %1874 = vmatprep.subr.bf16.mxu0 %v2092_v21 }
  0x12   : > { %v213_v23 = vunpack.c.l.bf16 %v209_v22  ;;  %v242_v31 = vrot.slane %v228_v26, %v2097_v24  ;;  %v243_v32 = vcombine.high %v235_v27, %v235_v27 }
  0x13   : > { %216 = vst.msk [vmem:[#allocation2 + $0x9] sm:$0xf] %vm215_vm2, %v210_v16  ;;  %217 = vst.msk [vmem:[#allocation2 + $0x11] sm:$0xf] %vm215_vm2, %v211_v17 }
  0x14   : > { %218 = vst.msk [vmem:[#allocation2 + $0x19] sm:$0xf] %vm215_vm2, %v212_v19  ;;  %219 = vst.msk [vmem:[#allocation2 + $0x21] sm:$0xf] %vm215_vm2, %v213_v23  ;;  %v292_v56 = vcombine.low %v235_v27, %v243_v32 }
  0x16   : > { %v300_v1 = vrot.slane %v292_v56, %v2097_v24 }
  0x1a   : > { %v365_v28 = vld [vmem:[#allocation2 + $0x8] sm:$0x3f]  ;;  %v366_v29 = vld [vmem:[#allocation2 + $0x10] sm:$0x3f] }
  0x1b   : > { %v221_v30 = vld [vmem:[#allocation2 + $0x8] sm:$0x3f]  ;;  %v367_v33 = vld [vmem:[#allocation2 + $0x18] sm:$0x3f]  ;;  %v373_v34 = vcombine.high %v365_v28, %v365_v28  ;;  %v380_v35 = vrot.slane %v365_v28, %v2097_v24  ;;  %v389_v36 = vcombine.high %v366_v29, %v366_v29  ;;  %v396_v37 = vrot.slane %v366_v29, %v2097_v24  ;;  %v222_v38 = vld [vmem:[#allocation2 + $0x10] sm:$0x3f] }
  0x1c   : > { %v405_v39 = vcombine.high %v367_v33, %v367_v33  ;;  %v412_v40 = vrot.slane %v367_v33, %v2097_v24  ;;  %v244_v41 = vcombine.high %v221_v30, %v221_v30  ;;  %v251_v42 = vrot.slane %v221_v30, %v2097_v24  ;;  %v368_v59 = vld [vmem:[#allocation2 + $0x20] sm:$0x3f]  ;;  %v223_v4 = vld [vmem:[#allocation2 + $0x18] sm:$0x3f] }
  0x1d   : > { %v387_v43 = vrot.slane %v373_v34, %v2097_v24  ;;  %v388_v44 = vcombine.high %v380_v35, %v380_v35  ;;  %v403_v45 = vrot.slane %v389_v36, %v2097_v24  ;;  %v404_v46 = vcombine.high %v396_v37, %v396_v37 }
  0x1e   : > { %v420_v47 = vcombine.high %v412_v40, %v412_v40  ;;  %v258_v48 = vrot.slane %v244_v41, %v2097_v24  ;;  %v259_v49 = vcombine.high %v251_v42, %v251_v42  ;;  %v260_v50 = vcombine.high %v222_v38, %v222_v38  ;;  %v923_v41 = vld [vmem:[#allocation2 + $0x18] sm:$0x3f] }
  0x1f   : > { %v437_v51 = vcombine.low %v380_v35, %v388_v44  ;;  %v438_v52 = vcombine.low %v387_v43, %v396_v37  ;;  %v454_v53 = vcombine.low %v404_v46, %v403_v45  ;;  %v267_v54 = vrot.slane %v222_v38, %v2097_v24  ;;  %v1982_v37 = vld [vmem:[%s2348_s1 + $0x58] sm:$0xff]   ;;  %v1984_v43 = vld [vmem:[%s2348_s1 + $0x60] ss:$0 sps:$4 sm:$0xff]   ;;  %v1985_v44 = vld [vmem:[%s2348_s1 + $0x74] ss:$0 sps:$4 sm:$0xff]  }
  0x20   : > { %v455_v55 = vcombine.low %v412_v40, %v420_v47  ;;  %v293_v57 = vcombine.low %v242_v31, %v251_v42  ;;  %v309_v58 = vcombine.low %v259_v49, %v258_v48  ;;  %v419_v7 = vrot.slane %v405_v39, %v2097_v24  ;;  %v1983_v39 = vld [vmem:[%s2348_s1 + $0x6c] sm:$0xff]   ;;  %v924_v42 = vld [vmem:[#allocation2 + $0x20] sm:$0x3f] }
  0x21   : > { %v445_v60 = vrot.slane %v437_v51, %v2097_v24  ;;  %v452_v61 = vrot.slane %v438_v52, %v2097_v24  ;;  %v462_v62 = vrot.slane %v454_v53, %v2097_v24  ;;  %v275_v63 = vcombine.high %v267_v54, %v267_v54  ;;  %v922_v40 = vld [vmem:[#allocation2 + $0x10] sm:$0x3f]  ;;  %v1987_v52 = vld [vmem:[%s2348_s1 + $0x28] sm:$0xff]  }
  0x22   : > { %v469_v0 = vrot.slane %v455_v55, %v2097_v24  ;;  %v307_v2 = vrot.slane %v293_v57, %v2097_v24  ;;  %v317_v3 = vrot.slane %v309_v58, %v2097_v24  ;;  %v421_v8 = vcombine.high %v368_v59, %v368_v59  ;;  %v925_v57 = vld [vmem:[#allocation2 + $0x28] sm:$0x3f]  ;;  %v1988_v58 = vld [vmem:[%s2348_s1 + $0x1c] sm:$0xff]  }
  0x23   : > { %v453_v5 = vcombine.low %v445_v60, %v452_v61  ;;  %v310_v6 = vcombine.low %v267_v54, %v275_v63  ;;  %v428_v11 = vrot.slane %v368_v59, %v2097_v24  ;;  %v274_v12 = vrot.slane %v260_v50, %v2097_v24  ;;  %v1986_v50 = vld [vmem:[%s2348_s1 + $0x14] sm:$0xff]  }
  0x24   : > { %v470_v9 = vcombine.low %v462_v62, %v469_v0  ;;  %v308_v10 = vcombine.low %v300_v1, %v307_v2  ;;  %v435_v15 = vrot.slane %v421_v8, %v2097_v24  ;;  %v276_v16 = vcombine.high %v223_v4, %v223_v4  ;;  %v1989_v60 = vld [vmem:[%s2348_s1 + $0x30] sm:$0xff]  }
  0x25   : > { %v324_v13 = vrot.slane %v310_v6, %v2097_v24  ;;  %v283_v17 = vrot.slane %v223_v4, %v2097_v24  ;;  %v436_v19 = vcombine.high %v428_v11, %v428_v11  ;;  %v471_v20 = vcombine.low %v419_v7, %v428_v11 }
  0x26   : > { %v491_v18 = vpack.c.bf16 %v470_v9, %v453_v5  ;;  %v290_v23 = vrot.slane %v276_v16, %v2097_v24  ;;  %v930_v45 = vcombine.high %v922_v40, %v922_v40  ;;  %v937_v46 = vrot.slane %v922_v40, %v2097_v24  ;;  %v1991_v5 = vld [vmem:[%s2348_s1 + $0x38] ss:$0 sps:$4 sm:$0xff]  }
  0x27   : > { %v325_v22 = vcombine.low %v317_v3, %v324_v13  ;;  %v291_v25 = vcombine.high %v283_v17, %v283_v17  ;;  %v326_v26 = vcombine.low %v274_v12, %v283_v17  ;;  %v472_v27 = vcombine.low %v436_v19, %v435_v15  ;;  %v1990_v3 = vld [vmem:[%s2348_s1 + $0x24] ss:$0 sps:$4 sm:$0xff]   ;;  %v1993_v13 = vld [vmem:[%s2348_s1 + $0x8c] sm:$0xff]   ;;  %v1992_v16 = vld [vmem:[%s2348_s1 + $0x78] sm:$0xff]  }
  0x28   : > { %1840 = vmatprep.mubr.msk.bf16.mxu1 %vm514_vm3, %v491_v18  ;;  %v479_v28 = vrot.slane %v471_v20, %v2097_v24  ;;  %v946_v47 = vcombine.high %v923_v41, %v923_v41  ;;  %v667_v48 = vsel %vm521_vm0, %v1984_v43, 0  ;;  %v805_v49 = vsel %vm521_vm0, %v1985_v44, 0 }
  0x29   : > { %v2128_v29 = vpack.c.bf16 %v325_v22, %v308_v10  ;;  %v327_v30 = vcombine.low %v291_v25, %v290_v23  ;;  %v334_v31 = vrot.slane %v326_v26, %v2097_v24  ;;  %v486_v32 = vrot.slane %v472_v27, %v2097_v24  ;;  %v1995_v22 = vld [vmem:[%s2348_s1 + $0x94] sm:$0xff]   ;;  %v1994_v23 = vld [vmem:[%s2348_s1 + $0x80] sm:$0xff]  }
  0x2a   : > { %v945_v51 = vcombine.high %v937_v46, %v937_v46  ;;  %v944_v53 = vrot.slane %v930_v45, %v2097_v24  ;;  %v960_v54 = vrot.slane %v946_v47, %v2097_v24  ;;  %v962_v0 = vcombine.high %v924_v42, %v924_v42 }
  0x2b   : > { %1850 = vmatprep.mubr.msk.bf16.mxu0 %vm514_vm3, %v2128_v29  ;;  %v341_v33 = vrot.slane %v327_v30, %v2097_v24  ;;  %v487_v34 = vcombine.low %v479_v28, %v486_v32  ;;  %v978_v1 = vcombine.high %v925_v57, %v925_v57  ;;  %v985_v2 = vrot.slane %v925_v57, %v2097_v24  ;;  %v1997_v28 = vld [vmem:[%s2348_s1 + $0x9c] ss:$0 sps:$4 sm:$0xff]  }
  0x2c   : > { %v994_v59 = vcombine.low %v937_v46, %v945_v51  ;;  %v976_v9 = vrot.slane %v962_v0, %v2097_v24  ;;  %v733_v12 = vsel %vm521_vm0, %v1990_v3, 0  ;;  %v871_v15 = vsel %vm521_vm0, %v1991_v5, 0 }
  0x2d   : > { %v342_v35 = vcombine.low %v334_v31, %v341_v33  ;;  %v492_v36 = vpack.c.bf16 %v487_v34, %v487_v34  ;;  %v992_v10 = vrot.slane %v978_v1, %v2097_v24  ;;  %v993_v11 = vcombine.high %v985_v2, %v985_v2  ;;  %v2002_v33 = vld [vmem:[%s2348_s1 + $0xa0] sm:$0xff]  }
  0x2e   : > { %v1002_v4 = vrot.slane %v994_v59, %v2097_v24  ;;  %v1028_v19 = vcombine.low %v976_v9, %v985_v2  ;;  %v1153_v31 = vsel %vm521_vm0, %v1997_v28, 0 }
  0x2f   : > { %v2138_v38 = vpack.c.bf16 %v342_v35, %v342_v35  ;;  %1841 = vmatmul.mubr.msk.bf16.vlgmr.msra.gmra.mrb[0].mxu1 %vm514_vm3, %v492_v36  ;;  %v1029_v20 = vcombine.low %v993_v11, %v992_v10  ;;  %v2003_v35 = vld [vmem:[%s2348_s1 + $0xa8] sm:$0xff]  }
  0x30   : > { %1855 = vmatpush3.bf16.msra.mxu1 %v2084_v14  ;;  %1860 = vmatprep.mubr.msk.bf16.mxu1 %vm514_vm3, %v491_v18  ;;  %v953_v14 = vrot.slane %v923_v41, %v2097_v24  ;;  %v1036_v26 = vrot.slane %v1028_v19, %v2097_v24 }
  0x31   : > { %1851 = vmatmul.mubr.msk.bf16.vlgmr.msra.gmra.mrb[0].mxu0 %vm514_vm3, %v2138_v38  ;;  %1856 = vmatprep.subr.bf16.mxu1 %v1982_v37  ;;  %v1043_v27 = vrot.slane %v1029_v20, %v2097_v24 }
  0x32   : > { %1875 = vmatpush3.bf16.msra.mxu0 %v2092_v21  ;;  %v969_v21 = vrot.slane %v924_v42, %v2097_v24  ;;  %1880 = vmatprep.mubr.msk.bf16.mxu0 %vm514_vm3, %v491_v18  ;;  %v961_v55 = vcombine.high %v953_v14, %v953_v14  ;;  %v995_v61 = vcombine.low %v944_v53, %v953_v14  ;;  %v1783_v42 = vld [vmem:[%s2349_s2] ss:$0 sm:$0xff] }
  0x33   : > { %1876 = vmatprep.subr.bf16.mxu0 %v1983_v39  ;;  %v1044_v30 = vcombine.low %v1036_v26, %v1043_v27 }
  0x34   : > { %1857 = vmatpush3.bf16.msra.mxu1 %v1982_v37  ;;  %v977_v56 = vcombine.high %v969_v21, %v969_v21  ;;  %v1011_v62 = vcombine.low %v961_v55, %v960_v54  ;;  %v1009_v6 = vrot.slane %v995_v61, %v2097_v24 }
  0x35   : > { %1949 = vmatprep.subr.msk.bf16.mxu1 %vm521_vm0, %v1984_v43  ;;  %v1049_v34 = vpack.c.bf16 %v1044_v30, %v1044_v30  ;;  %v1784_v43 = vld [vmem:[%s2350_s3] ss:$0 sm:$0xff] }
  0x36   : > { %1877 = vmatpush3.bf16.msra.mxu0 %v1983_v39  ;;  %v1012_v63 = vcombine.low %v969_v21, %v977_v56  ;;  %v1019_v7 = vrot.slane %v1011_v62, %v2097_v24  ;;  %v1010_v17 = vcombine.low %v1002_v4, %v1009_v6  ;;  %v2255_v45 = vrot.slane %v1784_v43, %v2097_v24 }
  0x37   : > { %1951 = vmatprep.subr.msk.bf16.mxu0 %vm521_vm0, %v1985_v44  ;;  %v2252_v44 = vrot.slane %v1783_v42, %v2097_v24 }
  0x38   : > { %1859 = vmatpush3.bf16.msra.mxu1 %v667_v48  ;;  %v1026_v8 = vrot.slane %v1012_v63, %v2097_v24  ;;  %v2271_v56 = vcombine.high %v2255_v45, %v2255_v45 }
  0x39   : > { %1864 = vmatprep.subr.bf16.mxu1 %v1986_v50 }
  0x3a   : > { %1879 = vmatpush3.bf16.msra.mxu0 %v805_v49  ;;  %v1027_v18 = vcombine.low %v1019_v7, %v1026_v8 }
  0x3b   : > { %1884 = vmatprep.subr.bf16.mxu0 %v1987_v52  ;;  %1861 = vmatmul.mubr.msk.bf16.vlgmr.msra.gmra.mrb[4].mxu1 %vm514_vm3, %v492_v36 }
  0x3c   : > { %1865 = vmatpush3.bf16.msra.mxu1 %v1986_v50  ;;  %1870 = vmatprep.mubr.msk.bf16.mxu1 %vm514_vm3, %v2128_v29  ;;  %v1048_v25 = vpack.c.bf16 %v1027_v18, %v1010_v17  ;;  %v2266_v50 = vcombine.high %v2252_v44, %v2252_v44 }
  0x3d   : > { %1881 = vmatmul.mubr.msk.bf16.vlgmr.msra.gmra.mrb[4].mxu0 %vm514_vm3, %v492_v36  ;;  %1866 = vmatprep.subr.bf16.mxu1 %v1988_v58  ;;  %v2004_v36 = vld [vmem:[%s2348_s1 + $0xb0] ss:$0 sps:$4 sm:$0xff]  }
  0x3e   : > { %1885 = vmatpush3.bf16.msra.mxu0 %v1987_v52  ;;  %1890 = vmatprep.mubr.msk.bf16.mxu0 %vm514_vm3, %v2128_v29  ;;  %v1996_v29 = vld [vmem:[%s2348_s1 + $0x88] ss:$0 sps:$4 sm:$0xff]   ;;  %v1228_v37 = vsel %vm521_vm0, %v2004_v36, 0 }
  0x3f   : > { %1886 = vmatprep.subr.bf16.mxu0 %v1989_v60  ;;  %v1078_v32 = vsel %vm521_vm0, %v1996_v29, 0 }
  0x40   : > { %1867 = vmatpush3.bf16.msra.mxu1 %v1988_v58 }
  0x41   : > { %1950 = vmatprep.subr.msk.bf16.mxu1 %vm521_vm0, %v1990_v3 }
  0x42   : > { %1887 = vmatpush3.bf16.msra.mxu0 %v1989_v60 }
  0x43   : > { %1952 = vmatprep.subr.msk.bf16.mxu0 %vm521_vm0, %v1991_v5 }
  0x44   : > { %1869 = vmatpush3.bf16.msra.mxu1 %v733_v12 }
  0x45   : > { %1904 = vmatprep.subr.bf16.mxu1 %v1993_v13 }
  0x46   : > { %1889 = vmatpush3.bf16.msra.mxu0 %v871_v15 }
  0x47   : > { %1894 = vmatprep.subr.bf16.mxu0 %v1992_v16  ;;  %1871 = vmatmul.mubr.msk.bf16.vlgmr.msra.gmra.mrb[4].mxu1 %vm514_vm3, %v2138_v38 }
  0x48   : > { %1905 = vmatpush3.bf16.msra.mxu1 %v1993_v13  ;;  %1910 = vmatprep.mubr.msk.bf16.mxu1 %vm514_vm3, %v1048_v25 }
  0x49   : > { %1891 = vmatmul.mubr.msk.bf16.vlgmr.msra.gmra.mrb[4].mxu0 %vm514_vm3, %v2138_v38  ;;  %1906 = vmatprep.subr.bf16.mxu1 %v1995_v22 }
  0x4a   : > { %1895 = vmatpush3.bf16.msra.mxu0 %v1992_v16  ;;  %1900 = vmatprep.mubr.msk.bf16.mxu0 %vm514_vm3, %v1048_v25 }
  0x4b   : > { %1896 = vmatprep.subr.bf16.mxu0 %v1994_v23 }
  0x4c   : > { %1907 = vmatpush3.bf16.msra.mxu1 %v1995_v22 }
  0x4d   : > { %1954 = vmatprep.subr.msk.bf16.mxu1 %vm521_vm0, %v1997_v28 }
  0x4e   : > { %1897 = vmatpush3.bf16.msra.mxu0 %v1994_v23 }
  0x4f   : > { %1953 = vmatprep.subr.msk.bf16.mxu0 %vm521_vm0, %v1996_v29 }
  0x50   : > { %1909 = vmatpush3.bf16.msra.mxu1 %v1153_v31 }
  0x52   : > { %1899 = vmatpush3.bf16.msra.mxu0 %v1078_v32 }
  0x53   : > { %1914 = vmatprep.subr.bf16.mxu0 %v2002_v33  ;;  %1911 = vmatmul.mubr.msk.bf16.vlgmr.msra.gmra.mrb[4].mxu1 %vm514_vm3, %v1049_v34 }
  0x55   : > { %1901 = vmatmul.mubr.msk.bf16.vlgmr.msra.gmra.mrb[0].mxu0 %vm514_vm3, %v1049_v34 }
  0x56   : > { %1915 = vmatpush3.bf16.msra.mxu0 %v2002_v33  ;;  %1920 = vmatprep.mubr.msk.bf16.mxu0 %vm514_vm3, %v1048_v25 }
  0x57   : > { %1916 = vmatprep.subr.bf16.mxu0 %v2003_v35 }
  0x5a   : > { %1917 = vmatpush3.bf16.msra.mxu0 %v2003_v35 }
  0x5b   : > { %1955 = vmatprep.subr.msk.bf16.mxu0 %vm521_vm0, %v2004_v36 }
  0x5e   : > { %1919 = vmatpush3.bf16.msra.mxu0 %v1228_v37 }
  0x61   : > { %1921 = vmatmul.mubr.msk.bf16.vlgmr.msra.gmra.mrb[4].mxu0 %vm514_vm3, %v1049_v34 }
 0x102   : > { %v1842_v38 = vpop.f32.mrb[0].mxu1 }
 0x103   : > { %v559_v39 = vpop.f32.mrb[1].mxu1 }
 0x104   : > { %v1843_v40 = vpop.f32.mrb[2].mxu1 }
 0x105   : > { %v562_v41 = vpop.f32.mrb[3].mxu1 }
 0x126   : > { %v1912_v46 = vpop.f32.mrb[4].mxu1 }
 0x127   : > { %v1378_v14 = vcombine.high %v1912_v46, %v1912_v46  ;;  %v2258_v21 = vrot.slane %v1912_v46, %v2097_v24  ;;  %v1189_v48 = vpop.f32.mrb[5].mxu1 }
 0x128   : > { %v1902_v47 = vpop.f32.mrb[0].mxu0  ;;  %v1344_v53 = vcombine.high %v1189_v48, %v1189_v48  ;;  %v1351_v54 = vrot.slane %v1189_v48, %v2097_v24  ;;  %v1913_v55 = vpop.f32.mrb[6].mxu1 }
 0x129   : > { %v1924_v51 = vadd.f32 %v1902_v47, %v1842_v38  ;;  %v1114_v52 = vpop.f32.mrb[1].mxu0  ;;  %v1392_v57 = vrot.slane %v1378_v14, %v2097_v24  ;;  %v1393_v58 = vcombine.high %v2258_v21, %v2258_v21  ;;  %v1421_v59 = vrot.slane %v2258_v21, 7  ;;  %v1192_v62 = vpop.f32.mrb[7].mxu1 }
 0x12a   : > { %v1925_v60 = vadd.f32 %v1114_v52, %v559_v39  ;;  %v1903_v61 = vpop.f32.mrb[2].mxu0  ;;  %v1358_v1 = vrot.slane %v1344_v53, %v2097_v24  ;;  %v1359_v2 = vcombine.high %v1351_v54, %v1351_v54  ;;  %v1779_v16 = vrot.slane %v1351_v54, 9 }
 0x12b   : > { %v1317_v63 = vcombine.high %v1924_v51, %v1924_v51  ;;  %v1324_v0 = vrot.slane %v1924_v51, %v2097_v24  ;;  %v1117_v3 = vpop.f32.mrb[3].mxu0  ;;  %v1394_v4 = vcombine.high %v1392_v57, %v1392_v57  ;;  %v1782_v5 = vrot.slane %v1393_v58, 9 }
 0x12c   : > { %v1425_v6 = vrot.slane %v1392_v57, 7  ;;  %v1284_v7 = vcombine.high %v1925_v60, %v1925_v60  ;;  %v1291_v10 = vrot.slane %v1925_v60, %v2097_v24  ;;  %v1360_v11 = vcombine.high %v1358_v1, %v1358_v1 }
 0x12d   : > { %v1331_v8 = vrot.slane %v1317_v63, %v2097_v24  ;;  %v1332_v9 = vcombine.high %v1324_v0, %v1324_v0  ;;  %v1428_v13 = vrot.slane %v1394_v4, 7  ;;  %v1404_v19 = vrot.slane %v1359_v2, 7 }
 0x12e   : > { %v1427_v12 = vrot.slane %v1425_v6, 2  ;;  %v1298_v15 = vrot.slane %v1284_v7, %v2097_v24  ;;  %v1299_v18 = vcombine.high %v1291_v10, %v1291_v10  ;;  %v1407_v20 = vrot.slane %v1358_v1, 7 }
 0x12f   : > { %v1780_v22 = vrot.slane %v1360_v11, 9  ;;  %v1926_v25 = vadd.f32 %v1117_v3, %v562_v41  ;;  %v1361_v26 = vcombine.high %v1192_v62, %v1192_v62  ;;  %v1368_v27 = vrot.slane %v1192_v62, %v2097_v24 }
 0x130   : > { %v1300_v23 = vcombine.high %v1298_v15, %v1298_v15  ;;  %v1406_v28 = vrot.slane %v1404_v19, 2  ;;  %v1426_v29 = vsel %vm2286_vm10, %v1782_v5, %v1425_v6  ;;  %v1429_v30 = vsel %vm2286_vm10, %v1427_v12, %v1428_v13 }
 0x131   : > { %v1405_v31 = vsel %vm2286_vm10, %v1779_v16, %v1404_v19  ;;  %v1301_v32 = vcombine.high %v1926_v25, %v1926_v25  ;;  %v1308_v33 = vrot.slane %v1926_v25, %v2097_v24  ;;  %v1375_v34 = vrot.slane %v1361_v26, %v2097_v24 }
 0x132   : > { %v1376_v35 = vcombine.high %v1368_v27, %v1368_v27  ;;  %v1411_v36 = vrot.slane %v1368_v27, 7  ;;  %v1444_v37 = vadd.f32 %v1426_v29, %v1332_v9  ;;  %v1445_v38 = vadd.f32 %v1429_v30, %v1331_v8 }
 0x133   : > { %v1408_v39 = vsel %vm2286_vm10, %v1406_v28, %v1407_v20  ;;  %v1315_v40 = vrot.slane %v1301_v32, %v2097_v24  ;;  %v1377_v41 = vcombine.high %v1375_v34, %v1375_v34  ;;  %v1781_v43 = vrot.slane %v1375_v34, 9 }
 0x134   : > { %v1414_v42 = vrot.slane %v1376_v35, 7  ;;  %v1922_v46 = vpop.f32.mrb[4].mxu0  ;;  %v1413_v47 = vrot.slane %v1411_v36, 2  ;;  %v1438_v51 = vadd.f32 %v1405_v31, %v1291_v10  ;;  %v1439_v54 = vadd.f32 %v1408_v39, %v1299_v18 }
 0x135   : > { %v1482_v14 = vcombine.high %v1922_v46, %v1922_v46  ;;  %v1489_v48 = vrot.slane %v1922_v46, %v2097_v24  ;;  %v1264_v49 = vpop.f32.mrb[5].mxu0  ;;  %v1316_v52 = vcombine.high %v1315_v40, %v1315_v40  ;;  %v1418_v53 = vrot.slane %v1377_v41, 7 }
 0x136   : > { %v1449_v55 = vcombine.high %v1264_v49, %v1264_v49  ;;  %v1923_v57 = vpop.f32.mrb[6].mxu0  ;;  %v1456_v60 = vrot.slane %v1264_v49, %v2097_v24  ;;  %v1412_v62 = vsel %vm2286_vm10, %v1780_v22, %v1411_v36  ;;  %v1415_v63 = vsel %vm2286_vm10, %v1413_v47, %v1414_v42 }
 0x137   : > { %v1496_v58 = vrot.slane %v1482_v14, %v2097_v24  ;;  %v1267_v61 = vpop.f32.mrb[7].mxu0  ;;  %v1420_v0 = vrot.slane %v1418_v53, 2  ;;  %v1419_v2 = vsel %vm2286_vm10, %v1781_v43, %v1418_v53  ;;  %v1440_v3 = vadd.f32 %v1412_v62, %v1300_v23 }
 0x138   : > { %v1463_v1 = vrot.slane %v1449_v55, %v2097_v24  ;;  %v1464_v6 = vcombine.high %v1456_v60, %v1456_v60  ;;  %v1441_v7 = vadd.f32 %v1415_v63, %v1308_v33  ;;  %v1442_v10 = vadd.f32 %v1419_v2, %v1315_v40 }
 0x139   : > { %v1497_v4 = vcombine.high %v1496_v58, %v1496_v58  ;;  %v1512_v5 = vadd.f32 %v1496_v58, %v1444_v37  ;;  %v1422_v8 = vsel %vm2286_vm10, %v1420_v0, %v1421_v59  ;;  %v1465_v11 = vcombine.high %v1267_v61, %v1267_v61 }
 0x13a   : > { %v1507_v9 = vadd.f32 %v1463_v1, %v1439_v54  ;;  %v1443_v12 = vadd.f32 %v1422_v8, %v1316_v52  ;;  %v1506_v16 = vadd.f32 %v1464_v6, %v1438_v51  ;;  %v1472_v19 = vrot.slane %v1267_v61, %v2097_v24 }
 0x13b   : > { %v1513_v13 = vadd.f32 %v1497_v4, %v1445_v38  ;;  %v1536_v15 = vadd.f32 %v2252_v44, %v1512_v5  ;;  %v1479_v20 = vrot.slane %v1465_v11, %v2097_v24 }
 0x13c   : > { %v1531_v18 = vadd.f32 %v2266_v50, %v1507_v9  ;;  %v1511_v22 = vadd.f32 %v1489_v48, %v1443_v12  ;;  %v1530_v17 = vadd.f32 %v2252_v44, %v1506_v16  ;;  %v1480_v25 = vcombine.high %v1472_v19, %v1472_v19 }
 0x13d   : > { %v1537_v21 = vadd.f32 %v2266_v50, %v1513_v13  ;;  %vm1545_vm11 = vcmp.gt.f32.partialorder %v1536_v15, 0.0  ;;  %v1568_v59 = vmul.f32 %v2255_v45, %v1536_v15  ;;  %v1481_v30 = vcombine.high %v1479_v20, %v1479_v20 }
 0x13e   : > { %vm1540_vm12 = vcmp.gt.f32.partialorder %v1531_v18, 0.0  ;;  %v1563_v23 = vmul.f32 %v2271_v56, %v1531_v18  ;;  %v1535_v26 = vadd.f32 %v2266_v50, %v1511_v22  ;;  %vm1539_vm14 = vcmp.gt.f32.partialorder %v1530_v17, 0.0 }
 0x13f   : > { %vm1546_vm13 = vcmp.gt.f32.partialorder %v1537_v21, 0.0  ;;  %v1569_v27 = vmul.f32 %v2271_v56, %v1537_v21  ;;  %v1562_v28 = vmul.f32 %v2255_v45, %v1530_v17  ;;  %v1576_v31 = vsel %vm1545_vm11, %v1536_v15, %v1568_v59 }
 0x140   : > { %v1571_v29 = vsel %vm1540_vm12, %v1531_v18, %v1563_v23  ;;  %v1508_v33 = vadd.f32 %v1472_v19, %v1440_v3  ;;  %v1509_v36 = vadd.f32 %v1480_v25, %v1441_v7  ;;  %v1510_v37 = vadd.f32 %v1481_v30, %v1442_v10 }
 0x141   : > { %v1577_v32 = vsel %vm1546_vm13, %v1537_v21, %v1569_v27  ;;  %v1570_v35 = vsel %vm1539_vm14, %v1530_v17, %v1562_v28  ;;  %vm1544_vm15 = vcmp.gt.f32.partialorder %v1535_v26, 0.0  ;;  %v1567_v43 = vmul.f32 %v2271_v56, %v1535_v26 }
 0x142   : > { %v1610_v34 = vcombine.low %v1576_v31, %v1577_v32  ;;  %v1586_v38 = vcombine.low %v1570_v35, %v1571_v29  ;;  %v1532_v39 = vadd.f32 %v2252_v44, %v1508_v33  ;;  %v1533_v41 = vadd.f32 %v2266_v50, %v1509_v36 }
 0x143   : > { %v1534_v42 = vadd.f32 %v2252_v44, %v1510_v37  ;;  %v1575_v52 = vsel %vm1544_vm15, %v1535_v26, %v1567_v43 }
 0x144   : > { %v1617_v40 = vrot.slane %v1610_v34, %v2097_v24  ;;  %v1593_v46 = vrot.slane %v1586_v38, %v2097_v24  ;;  %vm1541_vm0 = vcmp.gt.f32.partialorder %v1532_v39, 0.0  ;;  %v1564_v47 = vmul.f32 %v2255_v45, %v1532_v39 }
 0x145   : > { %vm1542_vm1 = vcmp.gt.f32.partialorder %v1533_v41, 0.0  ;;  %vm1543_vm2 = vcmp.gt.f32.partialorder %v1534_v42, 0.0  ;;  %v1565_v48 = vmul.f32 %v2271_v56, %v1533_v41  ;;  %v1566_v44 = vmul.f32 %v2255_v45, %v1534_v42 }
 0x146   : > { %v1625_v14 = vpack.c.bf16 %v1617_v40, %v1617_v40  ;;  %v1622_v50 = vpack.c.bf16 %v1593_v46, %v1593_v46  ;;  %v1572_v49 = vsel %vm1541_vm0, %v1532_v39, %v1564_v47 }
 0x147   : > { %v1573_v51 = vsel %vm1542_vm1, %v1533_v41, %v1565_v48  ;;  %v1574_v53 = vsel %vm1543_vm2, %v1534_v42, %v1566_v44 }
 0x148   : > { %1629 = vst [vmem:[%s197_s9 + $0x6] sm:$0x3] %v1625_v14  ;;  %1626 = vst [vmem:[%s197_s9] sm:$0x3] %v1622_v50  ;;  %v1594_v54 = vcombine.low %v1572_v49, %v1573_v51  ;;  %v1602_v55 = vcombine.low %v1574_v53, %v1575_v52 }
 0x14a   : > { %v1601_v57 = vrot.slane %v1594_v54, %v2097_v24  ;;  %v1609_v58 = vrot.slane %v1602_v55, %v2097_v24 }
 0x14c   : > { %v1623_v60 = vpack.c.bf16 %v1601_v57, %v1601_v57  ;;  %v1624_v61 = vpack.c.bf16 %v1609_v58, %v1609_v58 }
 0x14e   : > { %1627 = vst [vmem:[%s197_s9 + $0x2] sm:$0x3] %v1623_v60  ;;  %1628 = vst [vmem:[%s197_s9 + $0x4] sm:$0x3] %v1624_v61 }
 0x14f PF: > { %s14_s15 = sadd.s32 1, %s2011_s15  }
 0x150   : > { %p11_p4 = scmp.ge.s32.totalorder %s14_s15, 4  }
 0x152   :  { %13 = sbr.rel (!%p11_p4) target bundleno = 1 (0x1), region = 76 }

// kernel: multiscale_flow_forward.22
= control target key start
LH: loop header
LB: loop body
LE: loop exit
PB: predicated region body
PF: predicated region fallthrough
CT: control target
= control target key end

     0   :  { %s2670_s15 = smov 0   ;;  %s3051_s0 = inlined_call_operand.vmem [shape: bf16[2,4,4,128], index: 0, kind: input, shape index: {}]   ;;  %s3052_s1 = inlined_call_operand.vmem [shape: bf16[3,3,128,8], index: 1, kind: input, shape index: {}]   ;;  %s3053_s2 = inlined_call_operand.vmem [shape: f32[1,8], index: 2, kind: input, shape index: {}]   ;;  %s3054_s3 = inlined_call_operand.vmem [shape: f32[1,8], index: 3, kind: input, shape index: {}]   ;;  %s3055_s4 = inlined_call_operand.vmem [shape: f32[2,4,4,8], index: 4, kind: output, shape index: {}]  }
   0x1 LB: > { %s2029_s16 = sadd.s32 4294967295, %s2641_s15   ;;  %p2033_p0 = scmp.ge.s32.totalorder %s2641_s15, 1  ;;  %s2641_s15 = sphi %s2670_s15, %s14_s15  }
   0x2   : > { %p162_p1 = scmp.lt.s32.totalorder %s2641_s15, 3 }
   0x4   : > { %p163_p2 = pnand %p2033_p0, %p162_p1 }
   0x5   : > { %v2551_v0 = vld [vmem:[%s3052_s1 + $0xc0] sm:$0xff] (!%p163_p2)   ;;  %v2553_v2 = vld [vmem:[%s3052_s1 + $0xc8] sm:$0xff] (!%p163_p2)   ;;  %p2687_p3 = scmp.lt.s32.totalorder (!%p163_p2), %s2029_s16, 1  ;;  %v2643_v3 = vmov (!%p163_p2), 0.0   ;;  %v2555_v5 = vld [vmem:[%s3052_s1 + $0xd0] sm:$0xff] (!%p163_p2)   ;;  %v230_v10 = vlaneseq (!%p163_p2)  ;;  %vm1742_vm0 = vcmask (!%p163_p2), 1040384  }
   0x6   : > { %166 = sbr.rel (%p163_p2) target bundleno = 412 (0x19c), region = 36  ;;  %v2552_v1 = vld [vmem:[%s3052_s1] sm:$0xff] (!%p163_p2)   ;;  %2338 = vmatprep.subr.bf16.mxu1 (!%p163_p2), %v2551_v0  ;;  %200 = vst [vmem:[#allocation2 + $0x8] sm:$0x3f] (!%p163_p2), %v2643_v3  ;;  %201 = vst [vmem:[#allocation2 + $0x10] sm:$0x3f] (!%p163_p2), %v2643_v3 }
   0x7   : > { %202 = vst [vmem:[#allocation2 + $0x18] sm:$0x3f] (!%p163_p2), %v2643_v3  ;;  %199 = vst [vmem:[#allocation2] sm:$0x3f] (!%p163_p2), %v2643_v3  ;;  %2358 = vmatprep.subr.bf16.mxu0 (!%p163_p2), %v2552_v1  ;;  %2339 = vmatpush3.bf16.msra.mxu1 (!%p163_p2), %v2551_v0  ;;  %v2554_v4 = vld [vmem:[%s3052_s1 + $0x8] sm:$0xff] (!%p163_p2)   ;;  %v2556_v6 = vld [vmem:[%s3052_s1 + $0x10] sm:$0xff] (!%p163_p2)  }
   0x8   : > { %203 = vst [vmem:[#allocation2 + $0x20] sm:$0x3f] (!%p163_p2), %v2643_v3  ;;  %204 = vst [vmem:[#allocation2 + $0x28] sm:$0x3f] (!%p163_p2), %v2643_v3  ;;  %2359 = vmatpush3.bf16.msra.mxu0 (!%p163_p2), %v2552_v1  ;;  %2340 = vmatprep.subr.bf16.mxu1 (!%p163_p2), %v2553_v2  ;;  %v2557_v7 = vld [vmem:[%s3052_s1 + $0xd8] sm:$0xff] (!%p163_p2)   ;;  %v2559_v9 = vld [vmem:[%s3052_s1 + $0xe0] sm:$0xff] (!%p163_p2)  }
   0x9   : > { %2360 = vmatprep.subr.bf16.mxu0 (!%p163_p2), %v2554_v4  ;;  %v2558_v8 = vld [vmem:[%s3052_s1 + $0x18] sm:$0xff] (!%p163_p2)   ;;  %v2560_v11 = vld [vmem:[%s3052_s1 + $0x20] sm:$0xff] (!%p163_p2)   ;;  %v2561_v12 = vld [vmem:[%s3052_s1 + $0xe8] sm:$0xff] (!%p163_p2)   ;;  %v231_v15 = vshrl.u32 (!%p163_p2), %v230_v10, 7  ;;  %v2644_v18 = vmov (!%p163_p2), 1983009808  }
   0xa   : > { %v2562_v13 = vld [vmem:[%s3052_s1 + $0x28] sm:$0xff] (!%p163_p2)   ;;  %v228_v19 = vunpack.c.l.s4 (!%p163_p2), %v2644_v18  ;;  %v2563_v22 = vld [vmem:[%s3052_s1 + $0xf0] sm:$0xff] (!%p163_p2)   ;;  %v2565_v27 = vld [vmem:[%s3052_s1 + $0xf8] sm:$0xff] (!%p163_p2)   ;;  %vm1743_vm1 = vcmask (!%p163_p2), 1042434   ;;  %vm1745_vm3 = vcmask (!%p163_p2), 1044484   ;;  %vm1747_vm5 = vcmask (!%p163_p2), 1046534  }
   0xb   : > { %2341 = vmatpush3.bf16.msra.mxu1 (!%p163_p2), %v2553_v2  ;;  %v2564_v23 = vld [vmem:[%s3052_s1 + $0x30] sm:$0xff] (!%p163_p2)   ;;  %v2566_v28 = vld [vmem:[%s3052_s1 + $0x38] sm:$0xff] (!%p163_p2)   ;;  %v2751_v47 = vld [vmem:[%s3052_s1 + $0x100] sm:$0xff] (!%p163_p2)   ;;  %vm1969_vm8 = vcmask (!%p163_p2), 60416  }
   0xc   : > { %2361 = vmatpush3.bf16.msra.mxu0 (!%p163_p2), %v2554_v4  ;;  %2342 = vmatprep.subr.bf16.mxu1 (!%p163_p2), %v2555_v5  ;;  %v229_v20 = vunpack.c.0.s8 (!%p163_p2), %v228_v19  ;;  %v2758_v52 = vld [vmem:[%s3052_s1 + $0x140] sm:$0xff] (!%p163_p2)   ;;  %vm1744_vm2 = vmor (!%p163_p2), %vm1742_vm0, %vm1743_vm1 }
   0xd   : > { %s3062_s16 = smov (!%p2687_p3, %s2029_s16), 1  ;;  %2362 = vmatprep.subr.bf16.mxu0 %v2556_v6  ;;  %vm2986_vm4 = vmor %vm1744_vm2, %vm1745_vm3 }
   0xe   : > { %s2246_s8 = sshll.u32 %s3062_s16, 3  ;;  %v218_v21 = vld [vmem:[#allocation2] sm:$0x3f]  ;;  %v2732_v24 = vsub.s32 %v229_v20, %v231_v15  ;;  %vm2993_vm6 = vmor %vm2986_vm4, %vm1747_vm5  ;;  %s2247_s26 = sshll.u32 %s3062_s16, 4 }
   0xf   : > { %2343 = vmatpush3.bf16.msra.mxu1 %v2555_v5  ;;  %s192_s17 = scalar_lea.vmem %s3051_s0, %s2246_s8  ;;  %v226_v25 = vcombine.high %v218_v21, %v218_v21  ;;  %s197_s29 = scalar_lea.vmem %s3055_s4, %s2247_s26 }
  0x10   : > { %2363 = vmatpush3.bf16.msra.mxu0 %v2556_v6  ;;  %2344 = vmatprep.subr.bf16.mxu1 %v2557_v7  ;;  %v205_v14 = vld [vmem:[%s192_s17] sm:$0xff]   ;;  %v233_v26 = vrot.slane %v218_v21, %v2732_v24 }
  0x11   : > { %2364 = vmatprep.subr.bf16.mxu0 %v2558_v8  ;;  %v209_v16 = vunpack.c.l.bf16 %v205_v14  ;;  %v211_v17 = vunpack.c.h.bf16 %v205_v14  ;;  %v240_v32 = vrot.slane %v226_v25, %v2732_v24 }
  0x12   : > { %v241_v33 = vcombine.high %v233_v26, %v233_v26 }
  0x13   : > { %2345 = vmatpush3.bf16.msra.mxu1 %v2557_v7  ;;  %214 = vst [vmem:[#allocation2 + $0x9] ss:$8 sps:$4 sm:$0xff] %v209_v16   ;;  %216 = vst [vmem:[#allocation2 + $0x19] sm:$0xf] %v211_v17 }
  0x14   : > { %2365 = vmatpush3.bf16.msra.mxu0 %v2558_v8  ;;  %2346 = vmatprep.subr.bf16.mxu1 %v2559_v9  ;;  %217 = vst [vmem:[#allocation2 + $0x1d] sm:$0xf0] %v211_v17  ;;  %v290_v56 = vcombine.low %v233_v26, %v241_v33 }
  0x15   : > { %2366 = vmatprep.subr.bf16.mxu0 %v2560_v11 }
  0x16   : > { %v298_v1 = vrot.slane %v290_v56, %v2732_v24  ;;  %v2594_v56 = vld [vmem:[%s3052_s1 + $0x88] sm:$0xff]  }
  0x17   : > { %2347 = vmatpush3.bf16.msra.mxu1 %v2559_v9 }
  0x18   : > { %2367 = vmatpush3.bf16.msra.mxu0 %v2560_v11  ;;  %2348 = vmatprep.subr.bf16.mxu1 %v2561_v12 }
  0x19   : > { %2368 = vmatprep.subr.bf16.mxu0 %v2562_v13 }
  0x1a   : > { %v396_v29 = vld [vmem:[#allocation2 + $0x8] sm:$0x3f]  ;;  %v397_v30 = vld [vmem:[#allocation2 + $0x10] sm:$0x3f]  ;;  %v398_v31 = vld [vmem:[#allocation2 + $0x18] sm:$0x3f] }
  0x1b   : > { %2349 = vmatpush3.bf16.msra.mxu1 %v2561_v12  ;;  %v404_v34 = vcombine.high %v396_v29, %v396_v29  ;;  %v411_v35 = vrot.slane %v396_v29, %v2732_v24  ;;  %v420_v36 = vcombine.high %v397_v30, %v397_v30  ;;  %v427_v37 = vrot.slane %v397_v30, %v2732_v24  ;;  %v219_v38 = vld [vmem:[#allocation2 + $0x8] sm:$0x3f]  ;;  %v220_v39 = vld [vmem:[#allocation2 + $0x10] sm:$0x3f]  ;;  %v399_v61 = vld [vmem:[#allocation2 + $0x20] sm:$0x3f] }
  0x1c   : > { %2369 = vmatpush3.bf16.msra.mxu0 %v2562_v13  ;;  %2350 = vmatprep.subr.bf16.mxu1 %v2563_v22  ;;  %v443_v40 = vrot.slane %v398_v31, %v2732_v24  ;;  %v242_v41 = vcombine.high %v219_v38, %v219_v38  ;;  %v249_v42 = vrot.slane %v219_v38, %v2732_v24  ;;  %v221_v6 = vld [vmem:[#allocation2 + $0x18] sm:$0x3f] }
  0x1d   : > { %2370 = vmatprep.subr.bf16.mxu0 %v2564_v23  ;;  %v418_v43 = vrot.slane %v404_v34, %v2732_v24  ;;  %v419_v44 = vcombine.high %v411_v35, %v411_v35  ;;  %v434_v45 = vrot.slane %v420_v36, %v2732_v24  ;;  %v435_v46 = vcombine.high %v427_v37, %v427_v37 }
  0x1e   : > { %v451_v48 = vcombine.high %v443_v40, %v443_v40  ;;  %v256_v49 = vrot.slane %v242_v41, %v2732_v24  ;;  %v257_v50 = vcombine.high %v249_v42, %v249_v42  ;;  %v265_v51 = vrot.slane %v220_v39, %v2732_v24  ;;  %v2579_v41 = vld [vmem:[%s3052_s1 + $0x110] sm:$0xff]  }
  0x1f   : > { %2351 = vmatpush3.bf16.msra.mxu1 %v2563_v22  ;;  %v468_v53 = vcombine.low %v411_v35, %v419_v44  ;;  %v469_v54 = vcombine.low %v418_v43, %v427_v37  ;;  %v485_v55 = vcombine.low %v435_v46, %v434_v45  ;;  %v291_v59 = vcombine.low %v240_v32, %v249_v42  ;;  %v2577_v37 = vld [vmem:[%s3052_s1 + $0x108] sm:$0xff]   ;;  %v2580_v42 = vld [vmem:[%s3052_s1 + $0x150] sm:$0xff]   ;;  %v2581_v43 = vld [vmem:[%s3052_s1 + $0x118] sm:$0xff]  }
  0x20   : > { %2371 = vmatpush3.bf16.msra.mxu0 %v2564_v23  ;;  %2352 = vmatprep.subr.bf16.mxu1 %v2565_v27  ;;  %v486_v57 = vcombine.low %v443_v40, %v451_v48  ;;  %v273_v58 = vcombine.high %v265_v51, %v265_v51  ;;  %v307_v60 = vcombine.low %v257_v50, %v256_v49  ;;  %v2578_v40 = vld [vmem:[%s3052_s1 + $0x148] sm:$0xff]   ;;  %v2582_v44 = vld [vmem:[%s3052_s1 + $0x158] sm:$0xff]   ;;  %v2583_v45 = vld [vmem:[%s3052_s1 + $0x120] sm:$0xff]  }
  0x21   : > { %2372 = vmatprep.subr.bf16.mxu0 %v2566_v28  ;;  %v476_v62 = vrot.slane %v468_v53, %v2732_v24  ;;  %v483_v63 = vrot.slane %v469_v54, %v2732_v24  ;;  %v493_v0 = vrot.slane %v485_v55, %v2732_v24  ;;  %v305_v3 = vrot.slane %v291_v59, %v2732_v24  ;;  %v2584_v46 = vld [vmem:[%s3052_s1 + $0x160] sm:$0xff]   ;;  %v2586_v48 = vld [vmem:[%s3052_s1 + $0x168] sm:$0xff]   ;;  %v2587_v49 = vld [vmem:[%s3052_s1 + $0x130] sm:$0xff]  }
  0x22   : > { %v500_v2 = vrot.slane %v486_v57, %v2732_v24  ;;  %v308_v4 = vcombine.low %v265_v51, %v273_v58  ;;  %v315_v5 = vrot.slane %v307_v60, %v2732_v24  ;;  %v436_v8 = vcombine.high %v398_v31, %v398_v31  ;;  %v2588_v50 = vld [vmem:[%s3052_s1 + $0x170] sm:$0xff]   ;;  %v2589_v51 = vld [vmem:[%s3052_s1 + $0x138] sm:$0xff]   ;;  %v2591_v53 = vld [vmem:[%s3052_s1 + $0x40] sm:$0xff]  }
  0x23   : > { %2353 = vmatpush3.bf16.msra.mxu1 %v2565_v27  ;;  %v484_v7 = vcombine.low %v476_v62, %v483_v63  ;;  %v452_v9 = vcombine.high %v399_v61, %v399_v61  ;;  %v459_v10 = vrot.slane %v399_v61, %v2732_v24  ;;  %v306_v12 = vcombine.low %v298_v1, %v305_v3  ;;  %v2592_v54 = vld [vmem:[%s3052_s1 + $0x80] sm:$0xff]   ;;  %v2593_v55 = vld [vmem:[%s3052_s1 + $0x48] sm:$0xff]   ;;  %v2595_v57 = vld [vmem:[%s3052_s1 + $0x50] sm:$0xff]  }
  0x24   : > { %2373 = vmatpush3.bf16.msra.mxu0 %v2566_v28  ;;  %2378 = vmatprep.subr.bf16.mxu1 %v2751_v47  ;;  %v501_v11 = vcombine.low %v493_v0, %v500_v2  ;;  %v322_v13 = vrot.slane %v308_v4, %v2732_v24  ;;  %v258_v14 = vcombine.high %v220_v39, %v220_v39  ;;  %v2596_v58 = vld [vmem:[%s3052_s1 + $0x90] sm:$0xff]   ;;  %v2597_v59 = vld [vmem:[%s3052_s1 + $0x58] sm:$0xff]   ;;  %v2853_v62 = vld [vmem:[#allocation2 + $0x20] sm:$0x3f] }
  0x25   : > { %2418 = vmatprep.subr.bf16.mxu0 %v2758_v52  ;;  %v450_v15 = vrot.slane %v436_v8, %v2732_v24  ;;  %v466_v16 = vrot.slane %v452_v9, %v2732_v24  ;;  %v467_v17 = vcombine.high %v459_v10, %v459_v10  ;;  %v274_v18 = vcombine.high %v221_v6, %v221_v6  ;;  %v1152_v60 = vld [vmem:[#allocation2 + $0x10] sm:$0x3f]  ;;  %v1153_v61 = vld [vmem:[#allocation2 + $0x18] sm:$0x3f]  ;;  %v2599_v1 = vld [vmem:[%s3052_s1 + $0x60] sm:$0xff]  }
  0x26   : > { %v522_v19 = vpack.c.bf16 %v501_v11, %v484_v7  ;;  %v323_v20 = vcombine.low %v315_v5, %v322_v13  ;;  %v272_v21 = vrot.slane %v258_v14, %v2732_v24  ;;  %v281_v22 = vrot.slane %v221_v6, %v2732_v24  ;;  %v2598_v63 = vld [vmem:[%s3052_s1 + $0x98] sm:$0xff]   ;;  %v2600_v6 = vld [vmem:[%s3052_s1 + $0xa0] sm:$0xff]   ;;  %v2601_v8 = vld [vmem:[%s3052_s1 + $0x68] sm:$0xff]  }
  0x27   : > { %v502_v23 = vcombine.low %v450_v15, %v459_v10  ;;  %v503_v25 = vcombine.low %v467_v17, %v466_v16  ;;  %v288_v26 = vrot.slane %v274_v18, %v2732_v24  ;;  %v1160_v0 = vcombine.high %v1152_v60, %v1152_v60  ;;  %v2602_v13 = vld [vmem:[%s3052_s1 + $0xa8] sm:$0xff]   ;;  %v2603_v14 = vld [vmem:[%s3052_s1 + $0x70] sm:$0xff]  }
  0x28   : > { %2354 = vmatprep.mubr.bf16.mxu1 %v522_v19  ;;  %v2776_v27 = vpack.c.bf16 %v323_v20, %v306_v12  ;;  %v289_v28 = vcombine.high %v281_v22, %v281_v22  ;;  %v324_v29 = vcombine.low %v272_v21, %v281_v22  ;;  %v1167_v2 = vrot.slane %v1152_v60, %v2732_v24  ;;  %v2605_v20 = vld [vmem:[%s3052_s1 + $0x78] sm:$0xff]   ;;  %v2628_v60 = vld [vmem:[%s3052_s1 + $0x208] sm:$0xff]  }
  0x29   : > { %v510_v30 = vrot.slane %v502_v23, %v2732_v24  ;;  %v517_v31 = vrot.slane %v503_v25, %v2732_v24  ;;  %v1176_v3 = vcombine.high %v1153_v61, %v1153_v61  ;;  %v1183_v4 = vrot.slane %v1153_v61, %v2732_v24  ;;  %v2629_v61 = vld [vmem:[%s3052_s1 + $0x210] sm:$0xff]  }
  0x2a   : > { %2374 = vmatprep.mubr.bf16.mxu0 %v2776_v27  ;;  %v325_v32 = vcombine.low %v289_v28, %v288_v26  ;;  %v332_v33 = vrot.slane %v324_v29, %v2732_v24  ;;  %v1199_v5 = vrot.slane %v2853_v62, %v2732_v24  ;;  %v1174_v7 = vrot.slane %v1160_v0, %v2732_v24  ;;  %v2606_v26 = vld [vmem:[%s3052_s1 + $0xb8] sm:$0xff]   ;;  %v2632_v0 = vld [vmem:[%s3052_s1 + $0x228] sm:$0xff]  }
  0x2b   : > { %v518_v34 = vcombine.low %v510_v30, %v517_v31  ;;  %v1175_v9 = vcombine.high %v1167_v2, %v1167_v2  ;;  %v1190_v10 = vrot.slane %v1176_v3, %v2732_v24  ;;  %v1191_v11 = vcombine.high %v1183_v4, %v1183_v4  ;;  %v2607_v30 = vld [vmem:[%s3052_s1 + $0x180] sm:$0xff]   ;;  %v2610_v31 = vld [vmem:[%s3052_s1 + $0x1c8] sm:$0xff]  }
  0x2c   : > { %v339_v35 = vrot.slane %v325_v32, %v2732_v24  ;;  %v1207_v12 = vcombine.high %v1199_v5, %v1199_v5  ;;  %v1225_v16 = vcombine.low %v1174_v7, %v1183_v4 }
  0x2d   : > { %v523_v36 = vpack.c.bf16 %v518_v34, %v518_v34  ;;  %v1224_v15 = vcombine.low %v1167_v2, %v1175_v9  ;;  %v1241_v17 = vcombine.low %v1191_v11, %v1190_v10  ;;  %v2612_v34 = vld [vmem:[%s3052_s1 + $0x1d0] sm:$0xff]   ;;  %v2634_v2 = vld [vmem:[%s3052_s1 + $0x238] sm:$0xff]  }
  0x2e   : > { %v340_v38 = vcombine.low %v332_v33, %v339_v35  ;;  %v1242_v18 = vcombine.low %v1199_v5, %v1207_v12  ;;  %v1239_v22 = vrot.slane %v1225_v16, %v2732_v24  ;;  %v2609_v33 = vld [vmem:[%s3052_s1 + $0x188] sm:$0xff]   ;;  %v2611_v35 = vld [vmem:[%s3052_s1 + $0x190] sm:$0xff]  }
  0x2f   : > { %2355 = vmatmul.mubr.bf16.vlgmr.msra.gmra.mrb[0].mxu1 %v523_v36  ;;  %v1232_v21 = vrot.slane %v1224_v15, %v2732_v24  ;;  %v1249_v23 = vrot.slane %v1241_v17, %v2732_v24 }
  0x30   : > { %v2786_v39 = vpack.c.bf16 %v340_v38, %v340_v38  ;;  %2379 = vmatpush3.bf16.msra.mxu1 %v2751_v47  ;;  %2394 = vmatprep.mubr.bf16.mxu1 %v522_v19  ;;  %v2585_v47 = vld [vmem:[%s3052_s1 + $0x128] sm:$0xff]   ;;  %v1256_v25 = vrot.slane %v1242_v18, %v2732_v24  ;;  %v1192_v38 = vcombine.high %v2853_v62, %v2853_v62  ;;  %v2630_v62 = vld [vmem:[%s3052_s1 + $0x218] sm:$0xff]  }
  0x31   : > { %2380 = vmatprep.subr.bf16.mxu1 %v2577_v37  ;;  %v1240_v28 = vcombine.low %v1232_v21, %v1239_v22 }
  0x32   : > { %2375 = vmatmul.mubr.bf16.vlgmr.msra.gmra.mrb[0].mxu0 %v2786_v39  ;;  %v1257_v29 = vcombine.low %v1249_v23, %v1256_v25 }
  0x33   : > { %2419 = vmatpush3.bf16.msra.mxu0 %v2758_v52  ;;  %2434 = vmatprep.mubr.bf16.mxu0 %v522_v19  ;;  %v2590_v52 = vld [vmem:[%s3052_s1 + $0x178] sm:$0xff]   ;;  %v2604_v19 = vld [vmem:[%s3052_s1 + $0xb0] sm:$0xff]  }
  0x34   : > { %2420 = vmatprep.subr.bf16.mxu0 %v2578_v40  ;;  %2381 = vmatpush3.bf16.msra.mxu1 %v2577_v37  ;;  %v2901_v32 = vpack.c.bf16 %v1257_v29, %v1240_v28  ;;  %v2614_v37 = vld [vmem:[%s3052_s1 + $0x1d8] sm:$0xff]  }
  0x35   : > { %2382 = vmatprep.subr.bf16.mxu1 %v2579_v41 }
  0x37   : > { %2421 = vmatpush3.bf16.msra.mxu0 %v2578_v40 }
  0x38   : > { %2422 = vmatprep.subr.bf16.mxu0 %v2580_v42  ;;  %2383 = vmatpush3.bf16.msra.mxu1 %v2579_v41  ;;  %v2613_v41 = vld [vmem:[%s3052_s1 + $0x198] sm:$0xff]  }
  0x39   : > { %2384 = vmatprep.subr.bf16.mxu1 %v2581_v43 }
  0x3b   : > { %2423 = vmatpush3.bf16.msra.mxu0 %v2580_v42  ;;  %v2616_v42 = vld [vmem:[%s3052_s1 + $0x1e0] sm:$0xff]  }
  0x3c   : > { %2424 = vmatprep.subr.bf16.mxu0 %v2582_v44  ;;  %2385 = vmatpush3.bf16.msra.mxu1 %v2581_v43  ;;  %v1206_v43 = vrot.slane %v1192_v38, %v2732_v24 }
  0x3d   : > { %2386 = vmatprep.subr.bf16.mxu1 %v2583_v45 }
  0x3f   : > { %2425 = vmatpush3.bf16.msra.mxu0 %v2582_v44 }
  0x40   : > { %2426 = vmatprep.subr.bf16.mxu0 %v2584_v46  ;;  %2387 = vmatpush3.bf16.msra.mxu1 %v2583_v45 }
  0x41   : > { %2388 = vmatprep.subr.bf16.mxu1 %v2585_v47 }
  0x43   : > { %2427 = vmatpush3.bf16.msra.mxu0 %v2584_v46  ;;  %v2615_v46 = vld [vmem:[%s3052_s1 + $0x1a0] sm:$0xff]  }
  0x44   : > { %2428 = vmatprep.subr.bf16.mxu0 %v2586_v48  ;;  %2389 = vmatpush3.bf16.msra.mxu1 %v2585_v47  ;;  %v2618_v47 = vld [vmem:[%s3052_s1 + $0x1e8] sm:$0xff]  }
  0x45   : > { %2390 = vmatprep.subr.bf16.mxu1 %v2587_v49 }
  0x47   : > { %2429 = vmatpush3.bf16.msra.mxu0 %v2586_v48 }
  0x48   : > { %2430 = vmatprep.subr.bf16.mxu0 %v2588_v50  ;;  %2391 = vmatpush3.bf16.msra.mxu1 %v2587_v49 }
  0x49   : > { %2392 = vmatprep.subr.bf16.mxu1 %v2589_v51 }
  0x4b   : > { %2431 = vmatpush3.bf16.msra.mxu0 %v2588_v50  ;;  %v2617_v50 = vld [vmem:[%s3052_s1 + $0x1a8] sm:$0xff]  }
  0x4c   : > { %2432 = vmatprep.subr.bf16.mxu0 %v2590_v52  ;;  %2393 = vmatpush3.bf16.msra.mxu1 %v2589_v51  ;;  %v2620_v51 = vld [vmem:[%s3052_s1 + $0x1f0] sm:$0xff]  }
  0x4d   : > { %2398 = vmatprep.subr.bf16.mxu1 %v2591_v53 }
  0x4f   : > { %2433 = vmatpush3.bf16.msra.mxu0 %v2590_v52  ;;  %2395 = vmatmul.mubr.bf16.vlgmr.msra.gmra.mrb[4].mxu1 %v523_v36 }
  0x50   : > { %2438 = vmatprep.subr.bf16.mxu0 %v2592_v54  ;;  %2399 = vmatpush3.bf16.msra.mxu1 %v2591_v53 }
  0x51   : > { %2400 = vmatprep.subr.bf16.mxu1 %v2593_v55  ;;  %2414 = vmatprep.mubr.bf16.mxu1 %v2776_v27 }
  0x52   : > { %2435 = vmatmul.mubr.bf16.vlgmr.msra.gmra.mrb[4].mxu0 %v523_v36  ;;  %v1155_v36 = vld [vmem:[#allocation2 + $0x28] sm:$0x3f] }
  0x53   : > { %2439 = vmatpush3.bf16.msra.mxu0 %v2592_v54  ;;  %2454 = vmatprep.mubr.bf16.mxu0 %v2776_v27  ;;  %v2608_v27 = vld [vmem:[%s3052_s1 + $0x1c0] sm:$0xff]   ;;  %v1215_v40 = vrot.slane %v1155_v36, %v2732_v24  ;;  %v2619_v54 = vld [vmem:[%s3052_s1 + $0x1b0] sm:$0xff]  }
  0x54   : > { %2440 = vmatprep.subr.bf16.mxu0 %v2594_v56  ;;  %2401 = vmatpush3.bf16.msra.mxu1 %v2593_v55  ;;  %v2622_v55 = vld [vmem:[%s3052_s1 + $0x1f8] sm:$0xff]  }
  0x55   : > { %2402 = vmatprep.subr.bf16.mxu1 %v2595_v57  ;;  %v1223_v45 = vcombine.high %v1215_v40, %v1215_v40  ;;  %v1258_v48 = vcombine.low %v1206_v43, %v1215_v40 }
  0x57   : > { %2441 = vmatpush3.bf16.msra.mxu0 %v2594_v56  ;;  %v1266_v52 = vrot.slane %v1258_v48, %v2732_v24 }
  0x58   : > { %2442 = vmatprep.subr.bf16.mxu0 %v2596_v58  ;;  %2403 = vmatpush3.bf16.msra.mxu1 %v2595_v57  ;;  %v2621_v57 = vld [vmem:[%s3052_s1 + $0x1b8] sm:$0xff]  }
  0x59   : > { %2404 = vmatprep.subr.bf16.mxu1 %v2597_v59 }
  0x5b   : > { %2443 = vmatpush3.bf16.msra.mxu0 %v2596_v58 }
  0x5c   : > { %2444 = vmatprep.subr.bf16.mxu0 %v2598_v63  ;;  %2405 = vmatpush3.bf16.msra.mxu1 %v2597_v59  ;;  %v2627_v59 = vld [vmem:[%s3052_s1 + $0x200] sm:$0xff]  }
  0x5d   : > { %2406 = vmatprep.subr.bf16.mxu1 %v2599_v1 }
  0x5f   : > { %2445 = vmatpush3.bf16.msra.mxu0 %v2598_v63  ;;  %v2631_v63 = vld [vmem:[%s3052_s1 + $0x220] sm:$0xff]  }
  0x60   : > { %2446 = vmatprep.subr.bf16.mxu0 %v2600_v6  ;;  %2407 = vmatpush3.bf16.msra.mxu1 %v2599_v1  ;;  %v2633_v1 = vld [vmem:[%s3052_s1 + $0x230] sm:$0xff]  }
  0x61   : > { %2408 = vmatprep.subr.bf16.mxu1 %v2601_v8 }
  0x63   : > { %2447 = vmatpush3.bf16.msra.mxu0 %v2600_v6 }
  0x64   : > { %2448 = vmatprep.subr.bf16.mxu0 %v2602_v13  ;;  %2409 = vmatpush3.bf16.msra.mxu1 %v2601_v8 }
  0x65   : > { %2410 = vmatprep.subr.bf16.mxu1 %v2603_v14 }
  0x67   : > { %2449 = vmatpush3.bf16.msra.mxu0 %v2602_v13 }
  0x68   : > { %2450 = vmatprep.subr.bf16.mxu0 %v2604_v19  ;;  %2411 = vmatpush3.bf16.msra.mxu1 %v2603_v14 }
  0x69   : > { %2412 = vmatprep.subr.bf16.mxu1 %v2605_v20 }
  0x6b   : > { %2451 = vmatpush3.bf16.msra.mxu0 %v2604_v19 }
  0x6c   : > { %2452 = vmatprep.subr.bf16.mxu0 %v2606_v26  ;;  %2413 = vmatpush3.bf16.msra.mxu1 %v2605_v20 }
  0x6d   : > { %2478 = vmatprep.subr.bf16.mxu1 %v2608_v27 }
  0x6f   : > { %2453 = vmatpush3.bf16.msra.mxu0 %v2606_v26  ;;  %2415 = vmatmul.mubr.bf16.vlgmr.msra.gmra.mrb[4].mxu1 %v2786_v39 }
  0x70   : > { %2458 = vmatprep.subr.bf16.mxu0 %v2607_v30  ;;  %2479 = vmatpush3.bf16.msra.mxu1 %v2608_v27 }
  0x71   : > { %2480 = vmatprep.subr.bf16.mxu1 %v2610_v31  ;;  %2494 = vmatprep.mubr.bf16.mxu1 %v2901_v32 }
  0x72   : > { %2455 = vmatmul.mubr.bf16.vlgmr.msra.gmra.mrb[4].mxu0 %v2786_v39  ;;  %v1208_v39 = vcombine.high %v1155_v36, %v1155_v36 }
  0x73   : > { %2459 = vmatpush3.bf16.msra.mxu0 %v2607_v30  ;;  %2474 = vmatprep.mubr.bf16.mxu0 %v2901_v32 }
  0x74   : > { %2460 = vmatprep.subr.bf16.mxu0 %v2609_v33  ;;  %2481 = vmatpush3.bf16.msra.mxu1 %v2610_v31  ;;  %v1222_v44 = vrot.slane %v1208_v39, %v2732_v24 }
  0x75   : > { %2482 = vmatprep.subr.bf16.mxu1 %v2612_v34 }
  0x76   : > { %v1259_v49 = vcombine.low %v1223_v45, %v1222_v44 }
  0x77   : > { %2461 = vmatpush3.bf16.msra.mxu0 %v2609_v33 }
  0x78   : > { %2462 = vmatprep.subr.bf16.mxu0 %v2611_v35  ;;  %2483 = vmatpush3.bf16.msra.mxu1 %v2612_v34  ;;  %v1273_v53 = vrot.slane %v1259_v49, %v2732_v24 }
  0x79   : > { %2484 = vmatprep.subr.bf16.mxu1 %v2614_v37 }
  0x7a   : > { %v1274_v56 = vcombine.low %v1266_v52, %v1273_v53 }
  0x7b   : > { %2463 = vmatpush3.bf16.msra.mxu0 %v2611_v35 }
  0x7c   : > { %2464 = vmatprep.subr.bf16.mxu0 %v2613_v41  ;;  %2485 = vmatpush3.bf16.msra.mxu1 %v2614_v37  ;;  %v1279_v58 = vpack.c.bf16 %v1274_v56, %v1274_v56 }
  0x7d   : > { %2486 = vmatprep.subr.bf16.mxu1 %v2616_v42 }
  0x7f   : > { %2465 = vmatpush3.bf16.msra.mxu0 %v2613_v41 }
  0x80   : > { %2466 = vmatprep.subr.bf16.mxu0 %v2615_v46  ;;  %2487 = vmatpush3.bf16.msra.mxu1 %v2616_v42 }
  0x81   : > { %2488 = vmatprep.subr.bf16.mxu1 %v2618_v47 }
  0x83   : > { %2467 = vmatpush3.bf16.msra.mxu0 %v2615_v46 }
  0x84   : > { %2468 = vmatprep.subr.bf16.mxu0 %v2617_v50  ;;  %2489 = vmatpush3.bf16.msra.mxu1 %v2618_v47 }
  0x85   : > { %2490 = vmatprep.subr.bf16.mxu1 %v2620_v51 }
  0x87   : > { %2469 = vmatpush3.bf16.msra.mxu0 %v2617_v50 }
  0x88   : > { %2470 = vmatprep.subr.bf16.mxu0 %v2619_v54  ;;  %2491 = vmatpush3.bf16.msra.mxu1 %v2620_v51 }
  0x89   : > { %2492 = vmatprep.subr.bf16.mxu1 %v2622_v55 }
  0x8b   : > { %2471 = vmatpush3.bf16.msra.mxu0 %v2619_v54 }
  0x8c   : > { %2472 = vmatprep.subr.bf16.mxu0 %v2621_v57  ;;  %2493 = vmatpush3.bf16.msra.mxu1 %v2622_v55 }
  0x8f   : > { %2473 = vmatpush3.bf16.msra.mxu0 %v2621_v57  ;;  %2495 = vmatmul.mubr.bf16.vlgmr.msra.gmra.mrb[4].mxu1 %v1279_v58 }
  0x90   : > { %2498 = vmatprep.subr.bf16.mxu0 %v2627_v59 }
  0x92   : > { %2475 = vmatmul.mubr.bf16.vlgmr.msra.gmra.mrb[0].mxu0 %v1279_v58 }
  0x93   : > { %2499 = vmatpush3.bf16.msra.mxu0 %v2627_v59  ;;  %2514 = vmatprep.mubr.bf16.mxu0 %v2901_v32 }
  0x94   : > { %2500 = vmatprep.subr.bf16.mxu0 %v2628_v60 }
  0x97   : > { %2501 = vmatpush3.bf16.msra.mxu0 %v2628_v60 }
  0x98   : > { %2502 = vmatprep.subr.bf16.mxu0 %v2629_v61 }
  0x9b   : > { %2503 = vmatpush3.bf16.msra.mxu0 %v2629_v61 }
  0x9c   : > { %2504 = vmatprep.subr.bf16.mxu0 %v2630_v62 }
  0x9f   : > { %2505 = vmatpush3.bf16.msra.mxu0 %v2630_v62 }
  0xa0   : > { %2506 = vmatprep.subr.bf16.mxu0 %v2631_v63 }
  0xa3   : > { %2507 = vmatpush3.bf16.msra.mxu0 %v2631_v63 }
  0xa4   : > { %2508 = vmatprep.subr.bf16.mxu0 %v2632_v0 }
  0xa7   : > { %2509 = vmatpush3.bf16.msra.mxu0 %v2632_v0 }
  0xa8   : > { %2510 = vmatprep.subr.bf16.mxu0 %v2633_v1 }
  0xab   : > { %2511 = vmatpush3.bf16.msra.mxu0 %v2633_v1 }
  0xac   : > { %2512 = vmatprep.subr.bf16.mxu0 %v2634_v2 }
  0xaf   : > { %2513 = vmatpush3.bf16.msra.mxu0 %v2634_v2 }
  0xb2   : > { %2515 = vmatmul.mubr.bf16.vlgmr.msra.gmra.mrb[4].mxu0 %v1279_v58 }
 0x102   : > { %v2356_v3 = vpop.f32.mrb[0].mxu1 }
 0x103   : > { %v623_v4 = vpop.f32.mrb[1].mxu1 }
 0x104   : > { %v2357_v5 = vpop.f32.mrb[2].mxu1 }
 0x105   : > { %v626_v6 = vpop.f32.mrb[3].mxu1 }
 0x162   : > { %v2496_v7 = vpop.f32.mrb[4].mxu1 }
 0x163   : > { %v1725_v8 = vcombine.high %v2496_v7, %v2496_v7  ;;  %v2979_v9 = vrot.slane %v2496_v7, %v2732_v24  ;;  %v1495_v10 = vpop.f32.mrb[5].mxu1 }
 0x164   : > { %v1691_v11 = vcombine.high %v1495_v10, %v1495_v10  ;;  %v1698_v12 = vrot.slane %v1495_v10, %v2732_v24  ;;  %v2497_v13 = vpop.f32.mrb[6].mxu1 }
 0x165   : > { %v2476_v14 = vpop.f32.mrb[0].mxu0  ;;  %v1739_v15 = vrot.slane %v1725_v8, %v2732_v24  ;;  %v1740_v16 = vcombine.high %v2979_v9, %v2979_v9  ;;  %v1498_v17 = vpop.f32.mrb[7].mxu1 }
 0x166   : > { %v2518_v18 = vadd.f32 %v2476_v14, %v2356_v3  ;;  %v1379_v19 = vpop.f32.mrb[1].mxu0  ;;  %v1705_v20 = vrot.slane %v1691_v11, %v2732_v24  ;;  %v1706_v21 = vcombine.high %v1698_v12, %v1698_v12  ;;  %v2238_v41 = vrot.slane %v1698_v12, 9 }
 0x167   : > { %v1741_v23 = vcombine.high %v1739_v15, %v1739_v15  ;;  %v1772_v25 = vrot.slane %v1739_v15, 7  ;;  %v2519_v26 = vadd.f32 %v1379_v19, %v623_v4  ;;  %v2477_v27 = vpop.f32.mrb[2].mxu0  ;;  %v2241_v30 = vrot.slane %v1740_v16, 9 }
 0x168   : > { %v1664_v28 = vcombine.high %v2518_v18, %v2518_v18  ;;  %v1671_v29 = vrot.slane %v2518_v18, %v2732_v24  ;;  %v1751_v31 = vrot.slane %v1706_v21, 7  ;;  %v1382_v32 = vpop.f32.mrb[3].mxu0  ;;  %v1707_v36 = vcombine.high %v1705_v20, %v1705_v20  ;;  %v2242_v18 = vld [vmem:[%s3053_s2] ss:$0 sm:$0xff] }
 0x169   : > { %v1774_v33 = vrot.slane %v1772_v25, 2  ;;  %v1775_v34 = vrot.slane %v1741_v23, 7  ;;  %v1631_v35 = vcombine.high %v2519_v26, %v2519_v26  ;;  %v1638_v40 = vrot.slane %v2519_v26, %v2732_v24 }
 0x16a   : > { %v1678_v38 = vrot.slane %v1664_v28, %v2732_v24  ;;  %v1679_v39 = vcombine.high %v1671_v29, %v1671_v29  ;;  %v1753_v43 = vrot.slane %v1751_v31, 2  ;;  %v1754_v44 = vrot.slane %v1705_v20, 7 }
 0x16b   : > { %v1645_v42 = vrot.slane %v1631_v35, %v2732_v24  ;;  %v2520_v45 = vadd.f32 %v1382_v32, %v626_v6  ;;  %v1708_v46 = vcombine.high %v1498_v17, %v1498_v17  ;;  %v1715_v47 = vrot.slane %v1498_v17, %v2732_v24 }
 0x16c   : > { %v1773_v48 = vsel %vm2993_vm6, %v2241_v30, %v1772_v25  ;;  %v1776_v49 = vsel %vm2993_vm6, %v1774_v33, %v1775_v34  ;;  %v2239_v51 = vrot.slane %v1707_v36, 9  ;;  %v1646_v58 = vcombine.high %v1638_v40, %v1638_v40 }
 0x16d   : > { %v1647_v50 = vcombine.high %v1645_v42, %v1645_v42  ;;  %v1648_v52 = vcombine.high %v2520_v45, %v2520_v45  ;;  %v1791_v53 = vadd.f32 %v1773_v48, %v1679_v39  ;;  %v1722_v54 = vrot.slane %v1708_v46, %v2732_v24 }
 0x16e   : > { %v1723_v55 = vcombine.high %v1715_v47, %v1715_v47  ;;  %v1758_v56 = vrot.slane %v1715_v47, 7  ;;  %v1792_v57 = vadd.f32 %v1776_v49, %v1678_v38  ;;  %v1752_v59 = vsel %vm2993_vm6, %v2238_v41, %v1751_v31 }
 0x16f   : > { %v1755_v60 = vsel %vm2993_vm6, %v1753_v43, %v1754_v44  ;;  %v1655_v61 = vrot.slane %v2520_v45, %v2732_v24  ;;  %v1724_v62 = vcombine.high %v1722_v54, %v1722_v54  ;;  %v1662_v1 = vrot.slane %v1648_v52, %v2732_v24 }
 0x170   : > { %v1760_v63 = vrot.slane %v1758_v56, 2  ;;  %v1761_v0 = vrot.slane %v1723_v55, 7  ;;  %v1785_v2 = vadd.f32 %v1752_v59, %v1638_v40  ;;  %v1786_v3 = vadd.f32 %v1755_v60, %v1646_v58 }
 0x171   : > { %v1759_v4 = vsel %vm2993_vm6, %v2239_v51, %v1758_v56  ;;  %v2240_v5 = vrot.slane %v1722_v54, 9  ;;  %v1765_v6 = vrot.slane %v1724_v62, 7  ;;  %v1768_v11 = vrot.slane %v2979_v9, 7  ;;  %v2243_v9 = vld [vmem:[%s3054_s3] ss:$0 sm:$0xff] }
 0x172   : > { %v1762_v7 = vsel %vm2993_vm6, %v1760_v63, %v1761_v0  ;;  %v1787_v8 = vadd.f32 %v1759_v4, %v1647_v50  ;;  %v1663_v14 = vcombine.high %v1662_v1, %v1662_v1  ;;  %v1873_v19 = vrot.slane %v2242_v18, %v2732_v24 }
 0x173   : > { %v1788_v10 = vadd.f32 %v1762_v7, %v1655_v61  ;;  %v1767_v12 = vrot.slane %v1765_v6, 2  ;;  %v1766_v13 = vsel %vm2993_vm6, %v2240_v5, %v1765_v6  ;;  %v1905_v25 = vrot.slane %v2243_v9, %v2732_v24 }
 0x174   : > { %v1789_v15 = vadd.f32 %v1766_v13, %v1662_v1  ;;  %v1874_v31 = vcombine.high %v1873_v19, %v1873_v19 }
 0x175   : > { %v1769_v16 = vsel %vm2993_vm6, %v1767_v12, %v1768_v11  ;;  %v1906_v39 = vcombine.high %v1905_v25, %v1905_v25 }
 0x176   : > { %v1790_v17 = vadd.f32 %v1769_v16, %v1663_v14 }
 0x185   : > { %v2516_v20 = vpop.f32.mrb[4].mxu0 }
 0x186   : > { %v1829_v21 = vcombine.high %v2516_v20, %v2516_v20  ;;  %v1836_v22 = vrot.slane %v2516_v20, %v2732_v24  ;;  %v1611_v23 = vpop.f32.mrb[5].mxu0 }
 0x187   : > { %v1796_v26 = vcombine.high %v1611_v23, %v1611_v23  ;;  %v1803_v27 = vrot.slane %v1611_v23, %v2732_v24  ;;  %v2517_v28 = vpop.f32.mrb[6].mxu0 }
 0x188   : > { %v1843_v29 = vrot.slane %v1829_v21, %v2732_v24  ;;  %v1858_v30 = vadd.f32 %v1836_v22, %v1790_v17  ;;  %v1614_v32 = vpop.f32.mrb[7].mxu0 }
 0x189   : > { %v1810_v33 = vrot.slane %v1796_v26, %v2732_v24  ;;  %v1811_v34 = vcombine.high %v1803_v27, %v1803_v27  ;;  %v1812_v35 = vcombine.high %v1614_v32, %v1614_v32  ;;  %v1819_v36 = vrot.slane %v1614_v32, %v2732_v24 }
 0x18a   : > { %v1844_v37 = vcombine.high %v1843_v29, %v1843_v29  ;;  %v1859_v38 = vadd.f32 %v1843_v29, %v1791_v53  ;;  %v1882_v44 = vadd.f32 %v1874_v31, %v1858_v30 }
 0x18b   : > { %v1853_v40 = vadd.f32 %v1811_v34, %v1785_v2  ;;  %v1854_v41 = vadd.f32 %v1810_v33, %v1786_v3  ;;  %v1826_v42 = vrot.slane %v1812_v35, %v2732_v24  ;;  %v1827_v46 = vcombine.high %v1819_v36, %v1819_v36 }
 0x18c   : > { %v1860_v43 = vadd.f32 %v1844_v37, %v1792_v57  ;;  %v1883_v45 = vadd.f32 %v1873_v19, %v1859_v38  ;;  %v1855_v50 = vadd.f32 %v1819_v36, %v1787_v8  ;;  %v1914_v55 = vmul.f32 %v1906_v39, %v1882_v44 }
 0x18d   : > { %v1877_v47 = vadd.f32 %v1873_v19, %v1853_v40  ;;  %v1878_v48 = vadd.f32 %v1874_v31, %v1854_v41  ;;  %v1828_v49 = vcombine.high %v1826_v42, %v1826_v42  ;;  %v1856_v57 = vadd.f32 %v1827_v46, %v1788_v10 }
 0x18e   : > { %v1884_v51 = vadd.f32 %v1874_v31, %v1860_v43  ;;  %vm1892_vm7 = vcmp.gt.f32.partialorder %v1883_v45, 0.0  ;;  %v1915_v52 = vmul.f32 %v1905_v25, %v1883_v45  ;;  %v1879_v61 = vadd.f32 %v1873_v19, %v1855_v50 }
 0x18f   : > { %vm1886_vm9 = vcmp.gt.f32.partialorder %v1877_v47, 0.0  ;;  %vm1887_vm10 = vcmp.gt.f32.partialorder %v1878_v48, 0.0  ;;  %v1909_v53 = vmul.f32 %v1905_v25, %v1877_v47  ;;  %v1910_v54 = vmul.f32 %v1906_v39, %v1878_v48 }
 0x190   : > { %vm1893_vm11 = vcmp.gt.f32.partialorder %v1884_v51, 0.0  ;;  %v1916_v56 = vmul.f32 %v1906_v39, %v1884_v51  ;;  %v1857_v60 = vadd.f32 %v1828_v49, %v1789_v15  ;;  %v1923_v62 = vsel %vm1892_vm7, %v1883_v45, %v1915_v52 }
 0x191   : > { %v1917_v58 = vsel %vm1886_vm9, %v1877_v47, %v1909_v53  ;;  %v1918_v59 = vsel %vm1887_vm10, %v1878_v48, %v1910_v54  ;;  %v1880_v1 = vadd.f32 %v1874_v31, %v1856_v57  ;;  %vm1888_vm12 = vcmp.gt.f32.partialorder %v1879_v61, 0.0 }
 0x192   : > { %v1924_v63 = vsel %vm1893_vm11, %v1884_v51, %v1916_v56  ;;  %v1933_v0 = vcombine.low %v1917_v58, %v1918_v59  ;;  %v1881_v3 = vadd.f32 %v1873_v19, %v1857_v60  ;;  %v1911_v4 = vmul.f32 %v1905_v25, %v1879_v61 }
 0x193   : > { %v1957_v2 = vcombine.low %v1923_v62, %v1924_v63  ;;  %vm1891_vm13 = vcmp.gt.f32.partialorder %v1882_v44, 0.0  ;;  %vm1889_vm14 = vcmp.gt.f32.partialorder %v1880_v1, 0.0  ;;  %v1912_v6 = vmul.f32 %v1906_v39, %v1880_v1 }
 0x194   : > { %v1940_v5 = vrot.slane %v1933_v0, %v2732_v24  ;;  %vm1890_vm15 = vcmp.gt.f32.partialorder %v1881_v3, 0.0  ;;  %v1913_v8 = vmul.f32 %v1905_v25, %v1881_v3  ;;  %v1919_v10 = vsel %vm1888_vm12, %v1879_v61, %v1911_v4 }
 0x195   : > { %v1964_v7 = vrot.slane %v1957_v2, %v2732_v24  ;;  %v1920_v11 = vsel %vm1889_vm14, %v1880_v1, %v1912_v6  ;;  %v1922_v12 = vsel %vm1891_vm13, %v1882_v44, %v1914_v55 }
 0x196   : > { %1970 = vst.msk [vmem:[%s197_s29] sm:$0xf] %vm1969_vm8, %v1940_v5  ;;  %v1921_v13 = vsel %vm1890_vm15, %v1881_v3, %v1913_v8  ;;  %v1941_v14 = vcombine.low %v1919_v10, %v1920_v11 }
 0x197   : > { %1973 = vst.msk [vmem:[%s197_s29 + $0xc] sm:$0xf] %vm1969_vm8, %v1964_v7  ;;  %v1949_v15 = vcombine.low %v1921_v13, %v1922_v12 }
 0x198   : > { %v1948_v16 = vrot.slane %v1941_v14, %v2732_v24 }
 0x199   : > { %v1956_v17 = vrot.slane %v1949_v15, %v2732_v24 }
 0x19a   : > { %1971 = vst.msk [vmem:[%s197_s29 + $0x4] sm:$0xf] %vm1969_vm8, %v1948_v16 }
 0x19b   : > { %1972 = vst.msk [vmem:[%s197_s29 + $0x8] sm:$0xf] %vm1969_vm8, %v1956_v17 }
 0x19c PF: > { %s14_s15 = sadd.s32 1, %s2641_s15  }
 0x19d   : > { %p11_p4 = scmp.ge.s32.totalorder %s14_s15, 4  }
 0x19f   :  { %13 = sbr.rel (!%p11_p4) target bundleno = 1 (0x1), region = 76 }

// kernel: multiscale_flow_forward.17
= control target key start
LH: loop header
LB: loop body
LE: loop exit
PB: predicated region body
PF: predicated region fallthrough
CT: control target
= control target key end

     0   :  { %s461_s15 = smov 0   ;;  %s487_s0 = inlined_call_operand.vmem [shape: f32[2,3,256], index: 0, kind: input, shape index: {}]   ;;  %s488_s1 = inlined_call_operand.vmem [shape: f32[2,3,256], index: 1, kind: input, shape index: {}]   ;;  %s489_s2 = inlined_call_operand.vmem [shape: f32[2,1,256], index: 2, kind: input, shape index: {}]   ;;  %s490_s3 = inlined_call_operand.vmem [shape: f32[2,3,256], index: 3, kind: output, shape index: {0}]   ;;  %s491_s4 = inlined_call_operand.vmem [shape: f32[2,1,256], index: 4, kind: output, shape index: {1}]  }
   0x1 LB: > { %s397_s16 = sadd.s32 4294967295, %s434_s15   ;;  %p401_p0 = scmp.ge.s32.totalorder %s434_s15, 1  ;;  %s434_s15 = sphi %s461_s15, %s15_s15  }
   0x2   : > { %p184_p1 = scmp.lt.s32.totalorder %s434_s15, 3 }
   0x4   : > { %p185_p2 = pnand %p401_p0, %p184_p1 }
   0x5   : > { %p223_p3 = scmp.lt.s32.totalorder (!%p185_p2), %s397_s16, 1  ;;  %v253_v4 = vlaneseq (!%p185_p2) }
   0x6   : > { %188 = sbr.rel (%p185_p2) target bundleno = 54 (0x36), region = 32 }
   0x7   : > { %v261_v5 = vshrl.u32 (!%p185_p2), %v253_v4, 7  ;;  %vm255_vm0 = vcmp.lt.s32.totalorder (!%p185_p2), %v253_v4, 256 }
   0x9   : > { %v262_v6 = vsub.s32 (!%p185_p2), 0, %v261_v5  ;;  %v266_v7 = vsub.s32 (!%p185_p2), 1, %v261_v5 }
   0xd   : > { %s493_s16 = smov (!%p223_p3, %s397_s16), 1 }
   0xe   : > { %s406_s17 = sshll.u32 %s493_s16, 1  ;;  %s413_s21 = sshll.u32 %s493_s16, 3 }
   0xf   : > { %s236_s20 = scalar_lea.vmem %s489_s2, %s406_s17  ;;  %s245_s24 = scalar_lea.vmem %s491_s4, %s406_s17 }
  0x10   : > { %v246_v0 = vld [vmem:[%s236_s20] sm:$0x3]  ;;  %s227_s27 = scalar_lea.vmem %s487_s0, %s413_s21  ;;  %s232_s30 = scalar_lea.vmem %s488_s1, %s413_s21 }
  0x11   : > { %v410_v1 = vmul.f32 -1.442695, %v246_v0  ;;  %v258_v12 = vld [vmem:[%s227_s27] sm:$0x77]  ;;  %s241_s7 = scalar_lea.vmem %s490_s3, %s413_s21 }
  0x12   : > { %v271_v16 = vld [vmem:[%s232_s30] sm:$0x77] }
  0x13   : > { %424 = vpow2.f32 %v410_v1 }
  0x1d   : > { %v425_v2 = vpop.eup %424 }
  0x1e   : > { %v250_v3 = vadd.f32 1.0, %v425_v2 }
  0x20   : > { %426 = vrcp.f32 %v250_v3 }
  0x2a   : > { %v427_v8 = vpop.eup %426 }
  0x2b   : > { %257 = vst.msk [vmem:[%s245_s24] sm:$0x3] %vm255_vm0, %v427_v8  ;;  %v263_v9 = vrot.slane %v427_v8, %v262_v6  ;;  %v267_v10 = vrot.slane %v427_v8, %v266_v7  ;;  %v272_v11 = vsub.f32 1.0, %v427_v8 }
  0x2d   : > { %v268_v13 = vcombine.low %v263_v9, %v267_v10  ;;  %v277_v14 = vrot.slane %v272_v11, %v262_v6  ;;  %v281_v15 = vrot.slane %v272_v11, %v266_v7 }
  0x2f   : > { %v270_v17 = vmul.f32 %v268_v13, %v258_v12  ;;  %v282_v18 = vcombine.low %v277_v14, %v281_v15 }
  0x31   : > { %v284_v19 = vmul.f32 %v282_v18, %v271_v16 }
  0x33   : > { %v285_v20 = vadd.f32 %v284_v19, %v270_v17 }
  0x35   : > { %286 = vst [vmem:[%s241_s7] sm:$0x77] %v285_v20 }
  0x36 PF: > { %s15_s15 = sadd.s32 1, %s434_s15  }
  0x37   : > { %p12_p4 = scmp.ge.s32.totalorder %s15_s15, 4  }
  0x39   :  { %14 = sbr.rel (!%p12_p4) target bundleno = 1 (0x1), region = 80 }

</bundles_post_ra>
